<compile_context>
chip_gen: v6e
topology: v6e:2x2x1
jax: 0.10.0
libtpu: 0.0.40
codegen_flags: <defaults>
</compile_context>

<pallas_src>
import math

import numpy as np
import jax
import jax.numpy as jnp
from jax.experimental import pallas as pl
from jax.experimental.pallas import tpu as pltpu


def _bigen_kernel(emb_ref, mask_ref, wih_ref, bih_ref, whh_f_ref, whh_b_ref,
                  wz_ref, bz_ref, z_ref):
    Bb, T, E = emb_ref.shape
    H = whh_f_ref.shape[0]
    G = 4 * H

    # --- hoisted input projection, fused fwd||bwd: one MXU pass, 8H lanes wide
    x2d = emb_ref[...].reshape(Bb * T, E)
    gx = (jnp.dot(x2d, wih_ref[...], preferred_element_type=jnp.float32)
          + bih_ref[...])                       # (Bb*T, 8H); bias added once
    gx = gx.reshape(Bb, T, 2 * G)               # [..., :G] fwd, [..., G:] bwd

    mask = mask_ref[...]                        # (Bb, T)
    wz = wz_ref[...]                            # (1, 2H): [:, :H] fwd, [:, H:] bwd

    def cell(gx_t, m_t, h_prev, c_prev, whh_ref):
        # gate order i, f, g, o (PyTorch).  One sigmoid over all 4H lanes plus
        # one tanh on the g slice instead of four separate activations.
        gates = gx_t + jnp.dot(h_prev, whh_ref[...],
                               preferred_element_type=jnp.float32)   # (Bb, 4H)
        sig = jax.nn.sigmoid(gates)
        i = sig[:, 0 * H:1 * H]
        f = sig[:, 1 * H:2 * H]
        g = jnp.tanh(gates[:, 2 * H:3 * H])
        o = sig[:, 3 * H:4 * H]
        c_new = f * c_prev + i * g
        h_new = o * jnp.tanh(c_new)
        keep = m_t > 0.0
        # packed-sequence semantics: padded steps do not advance the state
        h_out = jnp.where(keep, h_new, h_prev)
        c_out = jnp.where(keep, c_new, c_prev)
        return h_out, c_out

    h_f = jnp.zeros((Bb, H), jnp.float32)
    c_f = jnp.zeros((Bb, H), jnp.float32)
    h_b = jnp.zeros((Bb, H), jnp.float32)
    c_b = jnp.zeros((Bb, H), jnp.float32)
    logit_f = [None] * T
    logit_b = [None] * T

    # Merged time loop: forward step t and backward step T-1-t are independent
    # chains -> interleaving gives the scheduler ILP to hide MXU/EUP latency.
    # TODO(synk): switch to lax.fori_loop(..., unroll=...) for large T to bound
    # vreg live ranges; static unroll is fine at this small T.
    for s in range(T):
        tf = s
        tb = T - 1 - s
        m_f = mask[:, tf:tf + 1]
        m_b = mask[:, tb:tb + 1]
        h_f, c_f = cell(gx[:, tf, :G], m_f, h_f, c_f, whh_f_ref)
        h_b, c_b = cell(gx[:, tb, G:], m_b, h_b, c_b, whh_b_ref)
        # pad_packed_sequence zeros padded positions (h*m); BernoulliGate
        # Linear(2H -> 1) folded into a per-step mul + lane reduce (VPU/XLU).
        logit_f[tf] = jnp.sum(h_f * m_f * wz[:, :H], axis=1, keepdims=True)
        logit_b[tb] = jnp.sum(h_b * m_b * wz[:, H:], axis=1, keepdims=True)

    logits = (jnp.concatenate(logit_f, axis=1)
              + jnp.concatenate(logit_b, axis=1)
              + bz_ref[...])                    # (Bb, T)

    # eval: z = (sigmoid(logits) >= 0.5) == (logits >= 0); then where(mask, z, 0)
    z_ref[...] = jnp.where(mask > 0.0,
                           (logits >= 0.0).astype(jnp.float32),
                           0.0)


def bernoulli_independent_generator(x, mask, params):
    """x: int32 (B, T) token ids; mask: bool/float (B, T). Returns z (B, T) f32."""
    embed_w = params["embed"]
    B, T = x.shape
    E = embed_w.shape[1]
    H = params["whh_f_t"].shape[0]

    # glue: embedding lookup (Dropout is identity in eval mode)
    emb = jnp.take(embed_w, x, axis=0).astype(jnp.float32)     # (B, T, E)
    mask_f = mask.astype(jnp.float32)                          # (B, T)

    # fuse fwd/bwd input projections -> single (E, 8H) weight, one hoisted matmul
    wih_fused = jnp.concatenate([params["wih_f_t"], params["wih_b_t"]], axis=1)  # (E, 8H)
    bih_fused = jnp.concatenate([params["b_f"], params["b_b"]], axis=1)          # (1, 8H)

    # batch grid: shards rows across TensorCores on v7x, bounds per-invocation
    # VMEM and pipelines the emb DMA.  Trivial (grid=1) at these toy sizes.
    bb = 8 if B % 8 == 0 else B
    grid = (B // bb,)

    def full(shape):
        return pl.BlockSpec(shape, lambda i: (0,) * len(shape))

    z = pl.pallas_call(
        _bigen_kernel,
        out_shape=jax.ShapeDtypeStruct((B, T), jnp.float32),
        grid=grid,
        in_specs=[
            pl.BlockSpec((bb, T, E), lambda i: (i, 0, 0)),     # emb
            pl.BlockSpec((bb, T), lambda i: (i, 0)),           # mask
            full((E, 8 * H)),                                  # W_ih fused (fwd||bwd)^T
            full((1, 8 * H)),                                  # bias fused
            full((H, 4 * H)),                                  # W_hh fwd^T
            full((H, 4 * H)),                                  # W_hh bwd^T
            full((1, 2 * H)),                                  # BernoulliGate weight row
            full((1, 1)),                                      # BernoulliGate bias
        ],
        out_specs=pl.BlockSpec((bb, T), lambda i: (i, 0)),
        compiler_params=pltpu.CompilerParams(
            dimension_semantics=("parallel",),
            vmem_limit_bytes=32 * 1024 * 1024,
        ),
    )(emb, mask_f, wih_fused, bih_fused,
      params["whh_f_t"], params["whh_b_t"], params["wz_row"], params["bz"])
    return z


def init_params(key, vocab, emb_size, hidden):
    """Deterministic synthetic parameters (shapes match the PyTorch module)."""
    H = hidden
    enc = 2 * H
    ks = jax.random.split(key, 12)

    def u(k, shape, bound):
        return jax.random.uniform(k, shape, jnp.float32, -bound, bound)

    be = 1.0 / math.sqrt(emb_size)
    bh = 1.0 / math.sqrt(H)
    bzb = 1.0 / math.sqrt(enc)

    embed = jax.random.normal(ks[0], (vocab, emb_size), jnp.float32) * 0.1
    wih_f = u(ks[1], (4 * H, emb_size), be)
    whh_f = u(ks[2], (4 * H, H), bh)
    bias_f = u(ks[3], (4 * H,), bh) + u(ks[4], (4 * H,), bh)     # b_ih + b_hh
    wih_b = u(ks[5], (4 * H, emb_size), be)
    whh_b = u(ks[6], (4 * H, H), bh)
    bias_b = u(ks[7], (4 * H,), bh) + u(ks[8], (4 * H,), bh)
    wz = u(ks[9], (1, enc), bzb)                                 # BernoulliGate Linear(enc, 1)
    bz = u(ks[10], (1,), bzb)

    return {
        "embed": embed,
        "wih_f_t": wih_f.T, "whh_f_t": whh_f.T, "b_f": bias_f[None, :],
        "wih_b_t": wih_b.T, "whh_b_t": whh_b.T, "b_b": bias_b[None, :],
        "wz_row": wz, "bz": bz[None, :],
    }


def reference_forward(x, mask, params):
    """Pure-JAX reference of the same eval-mode forward. Returns (z, logits)."""
    emb = jnp.take(params["embed"], x, axis=0).astype(jnp.float32)   # (B,T,E)
    maskf = mask.astype(jnp.float32)
    B, T, _ = emb.shape
    H = params["whh_f_t"].shape[0]

    def run(wih_t, whh_t, b, reverse):
        h = jnp.zeros((B, H), jnp.float32)
        c = jnp.zeros((B, H), jnp.float32)
        outs = [None] * T
        order = range(T - 1, -1, -1) if reverse else range(T)
        for t in order:
            xt = emb[:, t]
            m = maskf[:, t:t + 1]
            gates = xt @ wih_t + h @ whh_t + b
            i = jax.nn.sigmoid(gates[:, :H])
            f = jax.nn.sigmoid(gates[:, H:2 * H])
            g = jnp.tanh(gates[:, 2 * H:3 * H])
            o = jax.nn.sigmoid(gates[:, 3 * H:])
            cn = f * c + i * g
            hn = o * jnp.tanh(cn)
            h = jnp.where(m > 0, hn, h)
            c = jnp.where(m > 0, cn, c)
            outs[t] = h * m
        return jnp.stack(outs, axis=1)   # (B,T,H)

    hf = run(params["wih_f_t"], params["whh_f_t"], params["b_f"], False)
    hb = run(params["wih_b_t"], params["whh_b_t"], params["b_b"], True)
    hcat = jnp.concatenate([hf, hb], axis=-1)                      # (B,T,2H)
    logits = (hcat @ params["wz_row"].T + params["bz"])[..., 0]    # (B,T)
    z = (logits >= 0.0).astype(jnp.float32)
    return jnp.where(maskf > 0, z, 0.0), logits


if __name__ == "__main__":
    # keep both the XLA reference and the Pallas kernel at full f32 matmul accuracy
    jax.config.update("jax_default_matmul_precision", "highest")

    B, T, V, E, H = 2, 8, 50, 32, 16   # emb_size=32, hidden_size=16 -> enc_size=32

    key = jax.random.PRNGKey(0)
    kp, kx = jax.random.split(key)
    params = init_params(kp, V, E, H)

    x = jax.random.randint(kx, (B, T), 0, V, dtype=jnp.int32)
    lengths = jnp.array([T, 5], dtype=jnp.int32)
    mask = jnp.arange(T)[None, :] < lengths[:, None]          # (B, T) bool

    z = bernoulli_independent_generator(x, mask, params)
    z = jax.block_until_ready(z)

    z_ref, logits_ref = reference_forward(x, mask, params)
    z_np = np.asarray(z)
    zr_np = np.asarray(z_ref)
    lg_np = np.asarray(logits_ref)

    assert z_np.shape == (B, T)
    assert set(np.unique(z_np)).issubset({0.0, 1.0})
    # hard-threshold output: require exact agreement except where the logit is
    # within fp tolerance of the decision boundary (sigmoid(p)=0.5 <=> logit=0)
    disagree = z_np != zr_np
    assert not np.any(disagree & (np.abs(lg_np) > 1e-4)), (z_np, zr_np, lg_np)
    # padded positions must be exactly zero
    assert np.all(z_np[~np.asarray(mask)] == 0.0)

    print("KERNEL_OK")
</pallas_src>

<mosaic_0001>
module attributes {stable_mosaic.version = 11 : i64} {
  func.func @_bigen_kernel(%arg0: i32, %arg1: memref<2x8x32xf32, #tpu.memory_space<vmem>>, %arg2: memref<2x8xf32, #tpu.memory_space<vmem>>, %arg3: memref<32x128xf32, #tpu.memory_space<vmem>>, %arg4: memref<1x128xf32, #tpu.memory_space<vmem>>, %arg5: memref<16x64xf32, #tpu.memory_space<vmem>>, %arg6: memref<16x64xf32, #tpu.memory_space<vmem>>, %arg7: memref<1x32xf32, #tpu.memory_space<vmem>>, %arg8: memref<1x1xf32, #tpu.memory_space<vmem>>, %arg9: memref<2x8xf32, #tpu.memory_space<vmem>>) attributes {dimension_semantics = [#tpu.dimension_semantics<parallel>], iteration_bounds = array<i64: 1>, scalar_prefetch = 0 : i64, scratch_operands = 0 : i64, tpu.core_type = #tpu.core_type<tc>, window_params = [{transform_indices = @transform_0, window_bounds = array<i64: 2, 8, 32>}, {transform_indices = @transform_1, window_bounds = array<i64: 2, 8>}, {pipeline_mode = #tpu.pipeline_mode<synchronous>, transform_indices = @transform_2, window_bounds = array<i64: 32, 128>}, {pipeline_mode = #tpu.pipeline_mode<synchronous>, transform_indices = @transform_3, window_bounds = array<i64: 1, 128>}, {pipeline_mode = #tpu.pipeline_mode<synchronous>, transform_indices = @transform_4, window_bounds = array<i64: 16, 64>}, {pipeline_mode = #tpu.pipeline_mode<synchronous>, transform_indices = @transform_5, window_bounds = array<i64: 16, 64>}, {pipeline_mode = #tpu.pipeline_mode<synchronous>, transform_indices = @transform_6, window_bounds = array<i64: 1, 32>}, {pipeline_mode = #tpu.pipeline_mode<synchronous>, transform_indices = @transform_7, window_bounds = array<i64: 1, 1>}, {transform_indices = @transform_8, window_bounds = array<i64: 2, 8>}]} {
    %c0 = arith.constant 0 : index
    %c0_0 = arith.constant 0 : index
    %c0_1 = arith.constant 0 : index
    %0 = vector.load %arg1[%c0, %c0_0, %c0_1] : memref<2x8x32xf32, #tpu.memory_space<vmem>>, vector<2x8x32xf32>
    %1 = vector.shape_cast %0 : vector<2x8x32xf32> to vector<16x32xf32>
    %c0_2 = arith.constant 0 : index
    %c0_3 = arith.constant 0 : index
    %2 = vector.load %arg3[%c0_2, %c0_3] : memref<32x128xf32, #tpu.memory_space<vmem>>, vector<32x128xf32>
    %cst = arith.constant dense<0.000000e+00> : vector<16x128xf32>
    %3 = tpu.matmul %1, %2, %cst {dimension_numbers = #tpu.dot_dimension_numbers<[1], [0], [0], [1], [0, 0, 1, 1], [], []>, precision = #tpu.contract_precision<fp32>} : vector<16x32xf32>, vector<32x128xf32>, vector<16x128xf32> -> vector<16x128xf32>
    %c0_4 = arith.constant 0 : index
    %c0_5 = arith.constant 0 : index
    %4 = vector.load %arg4[%c0_4, %c0_5] : memref<1x128xf32, #tpu.memory_space<vmem>>, vector<1x128xf32>
    %5 = vector.broadcast %4 : vector<1x128xf32> to vector<16x128xf32>
    %6 = arith.addf %3, %5 : vector<16x128xf32>
    %7 = vector.shape_cast %6 : vector<16x128xf32> to vector<2x8x128xf32>
    %c0_6 = arith.constant 0 : index
    %c0_7 = arith.constant 0 : index
    %8 = vector.load %arg2[%c0_6, %c0_7] : memref<2x8xf32, #tpu.memory_space<vmem>>, vector<2x8xf32>
    %c0_8 = arith.constant 0 : index
    %c0_9 = arith.constant 0 : index
    %9 = vector.load %arg7[%c0_8, %c0_9] : memref<1x32xf32, #tpu.memory_space<vmem>>, vector<1x32xf32>
    %cst_10 = arith.constant 0.000000e+00 : f32
    %10 = vector.broadcast %cst_10 : f32 to vector<2x16xf32>
    %cst_11 = arith.constant 0.000000e+00 : f32
    %11 = vector.broadcast %cst_11 : f32 to vector<2x16xf32>
    %cst_12 = arith.constant 0.000000e+00 : f32
    %12 = vector.broadcast %cst_12 : f32 to vector<2x16xf32>
    %cst_13 = arith.constant 0.000000e+00 : f32
    %13 = vector.broadcast %cst_13 : f32 to vector<2x16xf32>
    %14 = vector.extract_strided_slice %8 {offsets = [0, 0], sizes = [2, 1], strides = [1, 1]} : vector<2x8xf32> to vector<2x1xf32>
    %15 = vector.extract_strided_slice %8 {offsets = [0, 7], sizes = [2, 1], strides = [1, 1]} : vector<2x8xf32> to vector<2x1xf32>
    %16 = vector.extract_strided_slice %7 {offsets = [0, 0, 0], sizes = [2, 1, 64], strides = [1, 1, 1]} : vector<2x8x128xf32> to vector<2x1x64xf32>
    %17 = vector.shape_cast %16 : vector<2x1x64xf32> to vector<2x64xf32>
    %c0_14 = arith.constant 0 : index
    %c0_15 = arith.constant 0 : index
    %18 = vector.load %arg5[%c0_14, %c0_15] : memref<16x64xf32, #tpu.memory_space<vmem>>, vector<16x64xf32>
    %cst_16 = arith.constant dense<0.000000e+00> : vector<2x64xf32>
    %19 = tpu.matmul %10, %18, %cst_16 {dimension_numbers = #tpu.dot_dimension_numbers<[1], [0], [0], [1], [0, 0, 1, 1], [], []>, precision = #tpu.contract_precision<fp32>} : vector<2x16xf32>, vector<16x64xf32>, vector<2x64xf32> -> vector<2x64xf32>
    %20 = arith.addf %17, %19 : vector<2x64xf32>
    %21 = arith.negf %20 : vector<2x64xf32>
    %22 = math.exp %21 : vector<2x64xf32>
    %cst_17 = arith.constant 1.000000e+00 : f32
    %23 = vector.broadcast %cst_17 : f32 to vector<2x64xf32>
    %24 = arith.addf %23, %22 : vector<2x64xf32>
    %25 = arith.divf %23, %24 : vector<2x64xf32>
    %26 = vector.extract_strided_slice %25 {offsets = [0, 0], sizes = [2, 16], strides = [1, 1]} : vector<2x64xf32> to vector<2x16xf32>
    %27 = vector.extract_strided_slice %25 {offsets = [0, 16], sizes = [2, 16], strides = [1, 1]} : vector<2x64xf32> to vector<2x16xf32>
    %28 = vector.extract_strided_slice %20 {offsets = [0, 32], sizes = [2, 16], strides = [1, 1]} : vector<2x64xf32> to vector<2x16xf32>
    %29 = math.tanh %28 : vector<2x16xf32>
    %30 = vector.extract_strided_slice %25 {offsets = [0, 48], sizes = [2, 16], strides = [1, 1]} : vector<2x64xf32> to vector<2x16xf32>
    %31 = arith.mulf %27, %11 : vector<2x16xf32>
    %32 = arith.mulf %26, %29 : vector<2x16xf32>
    %33 = arith.addf %31, %32 : vector<2x16xf32>
    %34 = math.tanh %33 : vector<2x16xf32>
    %35 = arith.mulf %30, %34 : vector<2x16xf32>
    %cst_18 = arith.constant 0.000000e+00 : f32
    %36 = vector.broadcast %cst_18 : f32 to vector<2x1xf32>
    %37 = arith.cmpf ogt, %14, %36 : vector<2x1xf32>
    %38 = vector.shape_cast %37 : vector<2x1xi1> to vector<2x1xi1>
    %39 = vector.broadcast %38 : vector<2x1xi1> to vector<2x16xi1>
    %40 = arith.select %39, %35, %10 : vector<2x16xi1>, vector<2x16xf32>
    %41 = vector.shape_cast %37 : vector<2x1xi1> to vector<2x1xi1>
    %42 = vector.broadcast %41 : vector<2x1xi1> to vector<2x16xi1>
    %43 = arith.select %42, %33, %11 : vector<2x16xi1>, vector<2x16xf32>
    %44 = vector.extract_strided_slice %7 {offsets = [0, 7, 64], sizes = [2, 1, 64], strides = [1, 1, 1]} : vector<2x8x128xf32> to vector<2x1x64xf32>
    %45 = vector.shape_cast %44 : vector<2x1x64xf32> to vector<2x64xf32>
    %c0_19 = arith.constant 0 : index
    %c0_20 = arith.constant 0 : index
    %46 = vector.load %arg6[%c0_19, %c0_20] : memref<16x64xf32, #tpu.memory_space<vmem>>, vector<16x64xf32>
    %cst_21 = arith.constant dense<0.000000e+00> : vector<2x64xf32>
    %47 = tpu.matmul %12, %46, %cst_21 {dimension_numbers = #tpu.dot_dimension_numbers<[1], [0], [0], [1], [0, 0, 1, 1], [], []>, precision = #tpu.contract_precision<fp32>} : vector<2x16xf32>, vector<16x64xf32>, vector<2x64xf32> -> vector<2x64xf32>
    %48 = arith.addf %45, %47 : vector<2x64xf32>
    %49 = arith.negf %48 : vector<2x64xf32>
    %50 = math.exp %49 : vector<2x64xf32>
    %cst_22 = arith.constant 1.000000e+00 : f32
    %51 = vector.broadcast %cst_22 : f32 to vector<2x64xf32>
    %52 = arith.addf %51, %50 : vector<2x64xf32>
    %53 = arith.divf %51, %52 : vector<2x64xf32>
    %54 = vector.extract_strided_slice %53 {offsets = [0, 0], sizes = [2, 16], strides = [1, 1]} : vector<2x64xf32> to vector<2x16xf32>
    %55 = vector.extract_strided_slice %53 {offsets = [0, 16], sizes = [2, 16], strides = [1, 1]} : vector<2x64xf32> to vector<2x16xf32>
    %56 = vector.extract_strided_slice %48 {offsets = [0, 32], sizes = [2, 16], strides = [1, 1]} : vector<2x64xf32> to vector<2x16xf32>
    %57 = math.tanh %56 : vector<2x16xf32>
    %58 = vector.extract_strided_slice %53 {offsets = [0, 48], sizes = [2, 16], strides = [1, 1]} : vector<2x64xf32> to vector<2x16xf32>
    %59 = arith.mulf %55, %13 : vector<2x16xf32>
    %60 = arith.mulf %54, %57 : vector<2x16xf32>
    %61 = arith.addf %59, %60 : vector<2x16xf32>
    %62 = math.tanh %61 : vector<2x16xf32>
    %63 = arith.mulf %58, %62 : vector<2x16xf32>
    %cst_23 = arith.constant 0.000000e+00 : f32
    %64 = vector.broadcast %cst_23 : f32 to vector<2x1xf32>
    %65 = arith.cmpf ogt, %15, %64 : vector<2x1xf32>
    %66 = vector.shape_cast %65 : vector<2x1xi1> to vector<2x1xi1>
    %67 = vector.broadcast %66 : vector<2x1xi1> to vector<2x16xi1>
    %68 = arith.select %67, %63, %12 : vector<2x16xi1>, vector<2x16xf32>
    %69 = vector.shape_cast %65 : vector<2x1xi1> to vector<2x1xi1>
    %70 = vector.broadcast %69 : vector<2x1xi1> to vector<2x16xi1>
    %71 = arith.select %70, %61, %13 : vector<2x16xi1>, vector<2x16xf32>
    %72 = vector.broadcast %14 : vector<2x1xf32> to vector<2x16xf32>
    %73 = arith.mulf %40, %72 : vector<2x16xf32>
    %74 = vector.extract_strided_slice %9 {offsets = [0, 0], sizes = [1, 16], strides = [1, 1]} : vector<1x32xf32> to vector<1x16xf32>
    %75 = vector.broadcast %74 : vector<1x16xf32> to vector<2x16xf32>
    %76 = arith.mulf %73, %75 : vector<2x16xf32>
    %cst_24 = arith.constant dense<0.000000e+00> : vector<2xf32>
    %77 = vector.multi_reduction <add>, %76, %cst_24 [1] : vector<2x16xf32> to vector<2xf32>
    %78 = vector.shape_cast %77 : vector<2xf32> to vector<2x1xf32>
    %79 = vector.broadcast %15 : vector<2x1xf32> to vector<2x16xf32>
    %80 = arith.mulf %68, %79 : vector<2x16xf32>
    %81 = vector.extract_strided_slice %9 {offsets = [0, 16], sizes = [1, 16], strides = [1, 1]} : vector<1x32xf32> to vector<1x16xf32>
    %82 = vector.broadcast %81 : vector<1x16xf32> to vector<2x16xf32>
    %83 = arith.mulf %80, %82 : vector<2x16xf32>
    %cst_25 = arith.constant dense<0.000000e+00> : vector<2xf32>
    %84 = vector.multi_reduction <add>, %83, %cst_25 [1] : vector<2x16xf32> to vector<2xf32>
    %85 = vector.shape_cast %84 : vector<2xf32> to vector<2x1xf32>
    %86 = vector.extract_strided_slice %8 {offsets = [0, 1], sizes = [2, 1], strides = [1, 1]} : vector<2x8xf32> to vector<2x1xf32>
    %87 = vector.extract_strided_slice %8 {offsets = [0, 6], sizes = [2, 1], strides = [1, 1]} : vector<2x8xf32> to vector<2x1xf32>
    %88 = vector.extract_strided_slice %7 {offsets = [0, 1, 0], sizes = [2, 1, 64], strides = [1, 1, 1]} : vector<2x8x128xf32> to vector<2x1x64xf32>
    %89 = vector.shape_cast %88 : vector<2x1x64xf32> to vector<2x64xf32>
    %c0_26 = arith.constant 0 : index
    %c0_27 = arith.constant 0 : index
    %90 = vector.load %arg5[%c0_26, %c0_27] : memref<16x64xf32, #tpu.memory_space<vmem>>, vector<16x64xf32>
    %cst_28 = arith.constant dense<0.000000e+00> : vector<2x64xf32>
    %91 = tpu.matmul %40, %90, %cst_28 {dimension_numbers = #tpu.dot_dimension_numbers<[1], [0], [0], [1], [0, 0, 1, 1], [], []>, precision = #tpu.contract_precision<fp32>} : vector<2x16xf32>, vector<16x64xf32>, vector<2x64xf32> -> vector<2x64xf32>
    %92 = arith.addf %89, %91 : vector<2x64xf32>
    %93 = arith.negf %92 : vector<2x64xf32>
    %94 = math.exp %93 : vector<2x64xf32>
    %cst_29 = arith.constant 1.000000e+00 : f32
    %95 = vector.broadcast %cst_29 : f32 to vector<2x64xf32>
    %96 = arith.addf %95, %94 : vector<2x64xf32>
    %97 = arith.divf %95, %96 : vector<2x64xf32>
    %98 = vector.extract_strided_slice %97 {offsets = [0, 0], sizes = [2, 16], strides = [1, 1]} : vector<2x64xf32> to vector<2x16xf32>
    %99 = vector.extract_strided_slice %97 {offsets = [0, 16], sizes = [2, 16], strides = [1, 1]} : vector<2x64xf32> to vector<2x16xf32>
    %100 = vector.extract_strided_slice %92 {offsets = [0, 32], sizes = [2, 16], strides = [1, 1]} : vector<2x64xf32> to vector<2x16xf32>
    %101 = math.tanh %100 : vector<2x16xf32>
    %102 = vector.extract_strided_slice %97 {offsets = [0, 48], sizes = [2, 16], strides = [1, 1]} : vector<2x64xf32> to vector<2x16xf32>
    %103 = arith.mulf %99, %43 : vector<2x16xf32>
    %104 = arith.mulf %98, %101 : vector<2x16xf32>
    %105 = arith.addf %103, %104 : vector<2x16xf32>
    %106 = math.tanh %105 : vector<2x16xf32>
    %107 = arith.mulf %102, %106 : vector<2x16xf32>
    %cst_30 = arith.constant 0.000000e+00 : f32
    %108 = vector.broadcast %cst_30 : f32 to vector<2x1xf32>
    %109 = arith.cmpf ogt, %86, %108 : vector<2x1xf32>
    %110 = vector.shape_cast %109 : vector<2x1xi1> to vector<2x1xi1>
    %111 = vector.broadcast %110 : vector<2x1xi1> to vector<2x16xi1>
    %112 = arith.select %111, %107, %40 : vector<2x16xi1>, vector<2x16xf32>
    %113 = vector.shape_cast %109 : vector<2x1xi1> to vector<2x1xi1>
    %114 = vector.broadcast %113 : vector<2x1xi1> to vector<2x16xi1>
    %115 = arith.select %114, %105, %43 : vector<2x16xi1>, vector<2x16xf32>
    %116 = vector.extract_strided_slice %7 {offsets = [0, 6, 64], sizes = [2, 1, 64], strides = [1, 1, 1]} : vector<2x8x128xf32> to vector<2x1x64xf32>
    %117 = vector.shape_cast %116 : vector<2x1x64xf32> to vector<2x64xf32>
    %c0_31 = arith.constant 0 : index
    %c0_32 = arith.constant 0 : index
    %118 = vector.load %arg6[%c0_31, %c0_32] : memref<16x64xf32, #tpu.memory_space<vmem>>, vector<16x64xf32>
    %cst_33 = arith.constant dense<0.000000e+00> : vector<2x64xf32>
    %119 = tpu.matmul %68, %118, %cst_33 {dimension_numbers = #tpu.dot_dimension_numbers<[1], [0], [0], [1], [0, 0, 1, 1], [], []>, precision = #tpu.contract_precision<fp32>} : vector<2x16xf32>, vector<16x64xf32>, vector<2x64xf32> -> vector<2x64xf32>
    %120 = arith.addf %117, %119 : vector<2x64xf32>
    %121 = arith.negf %120 : vector<2x64xf32>
    %122 = math.exp %121 : vector<2x64xf32>
    %cst_34 = arith.constant 1.000000e+00 : f32
    %123 = vector.broadcast %cst_34 : f32 to vector<2x64xf32>
    %124 = arith.addf %123, %122 : vector<2x64xf32>
    %125 = arith.divf %123, %124 : vector<2x64xf32>
    %126 = vector.extract_strided_slice %125 {offsets = [0, 0], sizes = [2, 16], strides = [1, 1]} : vector<2x64xf32> to vector<2x16xf32>
    %127 = vector.extract_strided_slice %125 {offsets = [0, 16], sizes = [2, 16], strides = [1, 1]} : vector<2x64xf32> to vector<2x16xf32>
    %128 = vector.extract_strided_slice %120 {offsets = [0, 32], sizes = [2, 16], strides = [1, 1]} : vector<2x64xf32> to vector<2x16xf32>
    %129 = math.tanh %128 : vector<2x16xf32>
    %130 = vector.extract_strided_slice %125 {offsets = [0, 48], sizes = [2, 16], strides = [1, 1]} : vector<2x64xf32> to vector<2x16xf32>
    %131 = arith.mulf %127, %71 : vector<2x16xf32>
    %132 = arith.mulf %126, %129 : vector<2x16xf32>
    %133 = arith.addf %131, %132 : vector<2x16xf32>
    %134 = math.tanh %133 : vector<2x16xf32>
    %135 = arith.mulf %130, %134 : vector<2x16xf32>
    %cst_35 = arith.constant 0.000000e+00 : f32
    %136 = vector.broadcast %cst_35 : f32 to vector<2x1xf32>
    %137 = arith.cmpf ogt, %87, %136 : vector<2x1xf32>
    %138 = vector.shape_cast %137 : vector<2x1xi1> to vector<2x1xi1>
    %139 = vector.broadcast %138 : vector<2x1xi1> to vector<2x16xi1>
    %140 = arith.select %139, %135, %68 : vector<2x16xi1>, vector<2x16xf32>
    %141 = vector.shape_cast %137 : vector<2x1xi1> to vector<2x1xi1>
    %142 = vector.broadcast %141 : vector<2x1xi1> to vector<2x16xi1>
    %143 = arith.select %142, %133, %71 : vector<2x16xi1>, vector<2x16xf32>
    %144 = vector.broadcast %86 : vector<2x1xf32> to vector<2x16xf32>
    %145 = arith.mulf %112, %144 : vector<2x16xf32>
    %146 = vector.extract_strided_slice %9 {offsets = [0, 0], sizes = [1, 16], strides = [1, 1]} : vector<1x32xf32> to vector<1x16xf32>
    %147 = vector.broadcast %146 : vector<1x16xf32> to vector<2x16xf32>
    %148 = arith.mulf %145, %147 : vector<2x16xf32>
    %cst_36 = arith.constant dense<0.000000e+00> : vector<2xf32>
    %149 = vector.multi_reduction <add>, %148, %cst_36 [1] : vector<2x16xf32> to vector<2xf32>
    %150 = vector.shape_cast %149 : vector<2xf32> to vector<2x1xf32>
    %151 = vector.broadcast %87 : vector<2x1xf32> to vector<2x16xf32>
    %152 = arith.mulf %140, %151 : vector<2x16xf32>
    %153 = vector.extract_strided_slice %9 {offsets = [0, 16], sizes = [1, 16], strides = [1, 1]} : vector<1x32xf32> to vector<1x16xf32>
    %154 = vector.broadcast %153 : vector<1x16xf32> to vector<2x16xf32>
    %155 = arith.mulf %152, %154 : vector<2x16xf32>
    %cst_37 = arith.constant dense<0.000000e+00> : vector<2xf32>
    %156 = vector.multi_reduction <add>, %155, %cst_37 [1] : vector<2x16xf32> to vector<2xf32>
    %157 = vector.shape_cast %156 : vector<2xf32> to vector<2x1xf32>
    %158 = vector.extract_strided_slice %8 {offsets = [0, 2], sizes = [2, 1], strides = [1, 1]} : vector<2x8xf32> to vector<2x1xf32>
    %159 = vector.extract_strided_slice %8 {offsets = [0, 5], sizes = [2, 1], strides = [1, 1]} : vector<2x8xf32> to vector<2x1xf32>
    %160 = vector.extract_strided_slice %7 {offsets = [0, 2, 0], sizes = [2, 1, 64], strides = [1, 1, 1]} : vector<2x8x128xf32> to vector<2x1x64xf32>
    %161 = vector.shape_cast %160 : vector<2x1x64xf32> to vector<2x64xf32>
    %c0_38 = arith.constant 0 : index
    %c0_39 = arith.constant 0 : index
    %162 = vector.load %arg5[%c0_38, %c0_39] : memref<16x64xf32, #tpu.memory_space<vmem>>, vector<16x64xf32>
    %cst_40 = arith.constant dense<0.000000e+00> : vector<2x64xf32>
    %163 = tpu.matmul %112, %162, %cst_40 {dimension_numbers = #tpu.dot_dimension_numbers<[1], [0], [0], [1], [0, 0, 1, 1], [], []>, precision = #tpu.contract_precision<fp32>} : vector<2x16xf32>, vector<16x64xf32>, vector<2x64xf32> -> vector<2x64xf32>
    %164 = arith.addf %161, %163 : vector<2x64xf32>
    %165 = arith.negf %164 : vector<2x64xf32>
    %166 = math.exp %165 : vector<2x64xf32>
    %cst_41 = arith.constant 1.000000e+00 : f32
    %167 = vector.broadcast %cst_41 : f32 to vector<2x64xf32>
    %168 = arith.addf %167, %166 : vector<2x64xf32>
    %169 = arith.divf %167, %168 : vector<2x64xf32>
    %170 = vector.extract_strided_slice %169 {offsets = [0, 0], sizes = [2, 16], strides = [1, 1]} : vector<2x64xf32> to vector<2x16xf32>
    %171 = vector.extract_strided_slice %169 {offsets = [0, 16], sizes = [2, 16], strides = [1, 1]} : vector<2x64xf32> to vector<2x16xf32>
    %172 = vector.extract_strided_slice %164 {offsets = [0, 32], sizes = [2, 16], strides = [1, 1]} : vector<2x64xf32> to vector<2x16xf32>
    %173 = math.tanh %172 : vector<2x16xf32>
    %174 = vector.extract_strided_slice %169 {offsets = [0, 48], sizes = [2, 16], strides = [1, 1]} : vector<2x64xf32> to vector<2x16xf32>
    %175 = arith.mulf %171, %115 : vector<2x16xf32>
    %176 = arith.mulf %170, %173 : vector<2x16xf32>
    %177 = arith.addf %175, %176 : vector<2x16xf32>
    %178 = math.tanh %177 : vector<2x16xf32>
    %179 = arith.mulf %174, %178 : vector<2x16xf32>
    %cst_42 = arith.constant 0.000000e+00 : f32
    %180 = vector.broadcast %cst_42 : f32 to vector<2x1xf32>
    %181 = arith.cmpf ogt, %158, %180 : vector<2x1xf32>
    %182 = vector.shape_cast %181 : vector<2x1xi1> to vector<2x1xi1>
    %183 = vector.broadcast %182 : vector<2x1xi1> to vector<2x16xi1>
    %184 = arith.select %183, %179, %112 : vector<2x16xi1>, vector<2x16xf32>
    %185 = vector.shape_cast %181 : vector<2x1xi1> to vector<2x1xi1>
    %186 = vector.broadcast %185 : vector<2x1xi1> to vector<2x16xi1>
    %187 = arith.select %186, %177, %115 : vector<2x16xi1>, vector<2x16xf32>
    %188 = vector.extract_strided_slice %7 {offsets = [0, 5, 64], sizes = [2, 1, 64], strides = [1, 1, 1]} : vector<2x8x128xf32> to vector<2x1x64xf32>
    %189 = vector.shape_cast %188 : vector<2x1x64xf32> to vector<2x64xf32>
    %c0_43 = arith.constant 0 : index
    %c0_44 = arith.constant 0 : index
    %190 = vector.load %arg6[%c0_43, %c0_44] : memref<16x64xf32, #tpu.memory_space<vmem>>, vector<16x64xf32>
    %cst_45 = arith.constant dense<0.000000e+00> : vector<2x64xf32>
    %191 = tpu.matmul %140, %190, %cst_45 {dimension_numbers = #tpu.dot_dimension_numbers<[1], [0], [0], [1], [0, 0, 1, 1], [], []>, precision = #tpu.contract_precision<fp32>} : vector<2x16xf32>, vector<16x64xf32>, vector<2x64xf32> -> vector<2x64xf32>
    %192 = arith.addf %189, %191 : vector<2x64xf32>
    %193 = arith.negf %192 : vector<2x64xf32>
    %194 = math.exp %193 : vector<2x64xf32>
    %cst_46 = arith.constant 1.000000e+00 : f32
    %195 = vector.broadcast %cst_46 : f32 to vector<2x64xf32>
    %196 = arith.addf %195, %194 : vector<2x64xf32>
    %197 = arith.divf %195, %196 : vector<2x64xf32>
    %198 = vector.extract_strided_slice %197 {offsets = [0, 0], sizes = [2, 16], strides = [1, 1]} : vector<2x64xf32> to vector<2x16xf32>
    %199 = vector.extract_strided_slice %197 {offsets = [0, 16], sizes = [2, 16], strides = [1, 1]} : vector<2x64xf32> to vector<2x16xf32>
    %200 = vector.extract_strided_slice %192 {offsets = [0, 32], sizes = [2, 16], strides = [1, 1]} : vector<2x64xf32> to vector<2x16xf32>
    %201 = math.tanh %200 : vector<2x16xf32>
    %202 = vector.extract_strided_slice %197 {offsets = [0, 48], sizes = [2, 16], strides = [1, 1]} : vector<2x64xf32> to vector<2x16xf32>
    %203 = arith.mulf %199, %143 : vector<2x16xf32>
    %204 = arith.mulf %198, %201 : vector<2x16xf32>
    %205 = arith.addf %203, %204 : vector<2x16xf32>
    %206 = math.tanh %205 : vector<2x16xf32>
    %207 = arith.mulf %202, %206 : vector<2x16xf32>
    %cst_47 = arith.constant 0.000000e+00 : f32
    %208 = vector.broadcast %cst_47 : f32 to vector<2x1xf32>
    %209 = arith.cmpf ogt, %159, %208 : vector<2x1xf32>
    %210 = vector.shape_cast %209 : vector<2x1xi1> to vector<2x1xi1>
    %211 = vector.broadcast %210 : vector<2x1xi1> to vector<2x16xi1>
    %212 = arith.select %211, %207, %140 : vector<2x16xi1>, vector<2x16xf32>
    %213 = vector.shape_cast %209 : vector<2x1xi1> to vector<2x1xi1>
    %214 = vector.broadcast %213 : vector<2x1xi1> to vector<2x16xi1>
    %215 = arith.select %214, %205, %143 : vector<2x16xi1>, vector<2x16xf32>
    %216 = vector.broadcast %158 : vector<2x1xf32> to vector<2x16xf32>
    %217 = arith.mulf %184, %216 : vector<2x16xf32>
    %218 = vector.extract_strided_slice %9 {offsets = [0, 0], sizes = [1, 16], strides = [1, 1]} : vector<1x32xf32> to vector<1x16xf32>
    %219 = vector.broadcast %218 : vector<1x16xf32> to vector<2x16xf32>
    %220 = arith.mulf %217, %219 : vector<2x16xf32>
    %cst_48 = arith.constant dense<0.000000e+00> : vector<2xf32>
    %221 = vector.multi_reduction <add>, %220, %cst_48 [1] : vector<2x16xf32> to vector<2xf32>
    %222 = vector.shape_cast %221 : vector<2xf32> to vector<2x1xf32>
    %223 = vector.broadcast %159 : vector<2x1xf32> to vector<2x16xf32>
    %224 = arith.mulf %212, %223 : vector<2x16xf32>
    %225 = vector.extract_strided_slice %9 {offsets = [0, 16], sizes = [1, 16], strides = [1, 1]} : vector<1x32xf32> to vector<1x16xf32>
    %226 = vector.broadcast %225 : vector<1x16xf32> to vector<2x16xf32>
    %227 = arith.mulf %224, %226 : vector<2x16xf32>
    %cst_49 = arith.constant dense<0.000000e+00> : vector<2xf32>
    %228 = vector.multi_reduction <add>, %227, %cst_49 [1] : vector<2x16xf32> to vector<2xf32>
    %229 = vector.shape_cast %228 : vector<2xf32> to vector<2x1xf32>
    %230 = vector.extract_strided_slice %8 {offsets = [0, 3], sizes = [2, 1], strides = [1, 1]} : vector<2x8xf32> to vector<2x1xf32>
    %231 = vector.extract_strided_slice %8 {offsets = [0, 4], sizes = [2, 1], strides = [1, 1]} : vector<2x8xf32> to vector<2x1xf32>
    %232 = vector.extract_strided_slice %7 {offsets = [0, 3, 0], sizes = [2, 1, 64], strides = [1, 1, 1]} : vector<2x8x128xf32> to vector<2x1x64xf32>
    %233 = vector.shape_cast %232 : vector<2x1x64xf32> to vector<2x64xf32>
    %c0_50 = arith.constant 0 : index
    %c0_51 = arith.constant 0 : index
    %234 = vector.load %arg5[%c0_50, %c0_51] : memref<16x64xf32, #tpu.memory_space<vmem>>, vector<16x64xf32>
    %cst_52 = arith.constant dense<0.000000e+00> : vector<2x64xf32>
    %235 = tpu.matmul %184, %234, %cst_52 {dimension_numbers = #tpu.dot_dimension_numbers<[1], [0], [0], [1], [0, 0, 1, 1], [], []>, precision = #tpu.contract_precision<fp32>} : vector<2x16xf32>, vector<16x64xf32>, vector<2x64xf32> -> vector<2x64xf32>
    %236 = arith.addf %233, %235 : vector<2x64xf32>
    %237 = arith.negf %236 : vector<2x64xf32>
    %238 = math.exp %237 : vector<2x64xf32>
    %cst_53 = arith.constant 1.000000e+00 : f32
    %239 = vector.broadcast %cst_53 : f32 to vector<2x64xf32>
    %240 = arith.addf %239, %238 : vector<2x64xf32>
    %241 = arith.divf %239, %240 : vector<2x64xf32>
    %242 = vector.extract_strided_slice %241 {offsets = [0, 0], sizes = [2, 16], strides = [1, 1]} : vector<2x64xf32> to vector<2x16xf32>
    %243 = vector.extract_strided_slice %241 {offsets = [0, 16], sizes = [2, 16], strides = [1, 1]} : vector<2x64xf32> to vector<2x16xf32>
    %244 = vector.extract_strided_slice %236 {offsets = [0, 32], sizes = [2, 16], strides = [1, 1]} : vector<2x64xf32> to vector<2x16xf32>
    %245 = math.tanh %244 : vector<2x16xf32>
    %246 = vector.extract_strided_slice %241 {offsets = [0, 48], sizes = [2, 16], strides = [1, 1]} : vector<2x64xf32> to vector<2x16xf32>
    %247 = arith.mulf %243, %187 : vector<2x16xf32>
    %248 = arith.mulf %242, %245 : vector<2x16xf32>
    %249 = arith.addf %247, %248 : vector<2x16xf32>
    %250 = math.tanh %249 : vector<2x16xf32>
    %251 = arith.mulf %246, %250 : vector<2x16xf32>
    %cst_54 = arith.constant 0.000000e+00 : f32
    %252 = vector.broadcast %cst_54 : f32 to vector<2x1xf32>
    %253 = arith.cmpf ogt, %230, %252 : vector<2x1xf32>
    %254 = vector.shape_cast %253 : vector<2x1xi1> to vector<2x1xi1>
    %255 = vector.broadcast %254 : vector<2x1xi1> to vector<2x16xi1>
    %256 = arith.select %255, %251, %184 : vector<2x16xi1>, vector<2x16xf32>
    %257 = vector.shape_cast %253 : vector<2x1xi1> to vector<2x1xi1>
    %258 = vector.broadcast %257 : vector<2x1xi1> to vector<2x16xi1>
    %259 = arith.select %258, %249, %187 : vector<2x16xi1>, vector<2x16xf32>
    %260 = vector.extract_strided_slice %7 {offsets = [0, 4, 64], sizes = [2, 1, 64], strides = [1, 1, 1]} : vector<2x8x128xf32> to vector<2x1x64xf32>
    %261 = vector.shape_cast %260 : vector<2x1x64xf32> to vector<2x64xf32>
    %c0_55 = arith.constant 0 : index
    %c0_56 = arith.constant 0 : index
    %262 = vector.load %arg6[%c0_55, %c0_56] : memref<16x64xf32, #tpu.memory_space<vmem>>, vector<16x64xf32>
    %cst_57 = arith.constant dense<0.000000e+00> : vector<2x64xf32>
    %263 = tpu.matmul %212, %262, %cst_57 {dimension_numbers = #tpu.dot_dimension_numbers<[1], [0], [0], [1], [0, 0, 1, 1], [], []>, precision = #tpu.contract_precision<fp32>} : vector<2x16xf32>, vector<16x64xf32>, vector<2x64xf32> -> vector<2x64xf32>
    %264 = arith.addf %261, %263 : vector<2x64xf32>
    %265 = arith.negf %264 : vector<2x64xf32>
    %266 = math.exp %265 : vector<2x64xf32>
    %cst_58 = arith.constant 1.000000e+00 : f32
    %267 = vector.broadcast %cst_58 : f32 to vector<2x64xf32>
    %268 = arith.addf %267, %266 : vector<2x64xf32>
    %269 = arith.divf %267, %268 : vector<2x64xf32>
    %270 = vector.extract_strided_slice %269 {offsets = [0, 0], sizes = [2, 16], strides = [1, 1]} : vector<2x64xf32> to vector<2x16xf32>
    %271 = vector.extract_strided_slice %269 {offsets = [0, 16], sizes = [2, 16], strides = [1, 1]} : vector<2x64xf32> to vector<2x16xf32>
    %272 = vector.extract_strided_slice %264 {offsets = [0, 32], sizes = [2, 16], strides = [1, 1]} : vector<2x64xf32> to vector<2x16xf32>
    %273 = math.tanh %272 : vector<2x16xf32>
    %274 = vector.extract_strided_slice %269 {offsets = [0, 48], sizes = [2, 16], strides = [1, 1]} : vector<2x64xf32> to vector<2x16xf32>
    %275 = arith.mulf %271, %215 : vector<2x16xf32>
    %276 = arith.mulf %270, %273 : vector<2x16xf32>
    %277 = arith.addf %275, %276 : vector<2x16xf32>
    %278 = math.tanh %277 : vector<2x16xf32>
    %279 = arith.mulf %274, %278 : vector<2x16xf32>
    %cst_59 = arith.constant 0.000000e+00 : f32
    %280 = vector.broadcast %cst_59 : f32 to vector<2x1xf32>
    %281 = arith.cmpf ogt, %231, %280 : vector<2x1xf32>
    %282 = vector.shape_cast %281 : vector<2x1xi1> to vector<2x1xi1>
    %283 = vector.broadcast %282 : vector<2x1xi1> to vector<2x16xi1>
    %284 = arith.select %283, %279, %212 : vector<2x16xi1>, vector<2x16xf32>
    %285 = vector.shape_cast %281 : vector<2x1xi1> to vector<2x1xi1>
    %286 = vector.broadcast %285 : vector<2x1xi1> to vector<2x16xi1>
    %287 = arith.select %286, %277, %215 : vector<2x16xi1>, vector<2x16xf32>
    %288 = vector.broadcast %230 : vector<2x1xf32> to vector<2x16xf32>
    %289 = arith.mulf %256, %288 : vector<2x16xf32>
    %290 = vector.extract_strided_slice %9 {offsets = [0, 0], sizes = [1, 16], strides = [1, 1]} : vector<1x32xf32> to vector<1x16xf32>
    %291 = vector.broadcast %290 : vector<1x16xf32> to vector<2x16xf32>
    %292 = arith.mulf %289, %291 : vector<2x16xf32>
    %cst_60 = arith.constant dense<0.000000e+00> : vector<2xf32>
    %293 = vector.multi_reduction <add>, %292, %cst_60 [1] : vector<2x16xf32> to vector<2xf32>
    %294 = vector.shape_cast %293 : vector<2xf32> to vector<2x1xf32>
    %295 = vector.broadcast %231 : vector<2x1xf32> to vector<2x16xf32>
    %296 = arith.mulf %284, %295 : vector<2x16xf32>
    %297 = vector.extract_strided_slice %9 {offsets = [0, 16], sizes = [1, 16], strides = [1, 1]} : vector<1x32xf32> to vector<1x16xf32>
    %298 = vector.broadcast %297 : vector<1x16xf32> to vector<2x16xf32>
    %299 = arith.mulf %296, %298 : vector<2x16xf32>
    %cst_61 = arith.constant dense<0.000000e+00> : vector<2xf32>
    %300 = vector.multi_reduction <add>, %299, %cst_61 [1] : vector<2x16xf32> to vector<2xf32>
    %301 = vector.shape_cast %300 : vector<2xf32> to vector<2x1xf32>
    %302 = vector.extract_strided_slice %8 {offsets = [0, 4], sizes = [2, 1], strides = [1, 1]} : vector<2x8xf32> to vector<2x1xf32>
    %303 = vector.extract_strided_slice %8 {offsets = [0, 3], sizes = [2, 1], strides = [1, 1]} : vector<2x8xf32> to vector<2x1xf32>
    %304 = vector.extract_strided_slice %7 {offsets = [0, 4, 0], sizes = [2, 1, 64], strides = [1, 1, 1]} : vector<2x8x128xf32> to vector<2x1x64xf32>
    %305 = vector.shape_cast %304 : vector<2x1x64xf32> to vector<2x64xf32>
    %c0_62 = arith.constant 0 : index
    %c0_63 = arith.constant 0 : index
    %306 = vector.load %arg5[%c0_62, %c0_63] : memref<16x64xf32, #tpu.memory_space<vmem>>, vector<16x64xf32>
    %cst_64 = arith.constant dense<0.000000e+00> : vector<2x64xf32>
    %307 = tpu.matmul %256, %306, %cst_64 {dimension_numbers = #tpu.dot_dimension_numbers<[1], [0], [0], [1], [0, 0, 1, 1], [], []>, precision = #tpu.contract_precision<fp32>} : vector<2x16xf32>, vector<16x64xf32>, vector<2x64xf32> -> vector<2x64xf32>
    %308 = arith.addf %305, %307 : vector<2x64xf32>
    %309 = arith.negf %308 : vector<2x64xf32>
    %310 = math.exp %309 : vector<2x64xf32>
    %cst_65 = arith.constant 1.000000e+00 : f32
    %311 = vector.broadcast %cst_65 : f32 to vector<2x64xf32>
    %312 = arith.addf %311, %310 : vector<2x64xf32>
    %313 = arith.divf %311, %312 : vector<2x64xf32>
    %314 = vector.extract_strided_slice %313 {offsets = [0, 0], sizes = [2, 16], strides = [1, 1]} : vector<2x64xf32> to vector<2x16xf32>
    %315 = vector.extract_strided_slice %313 {offsets = [0, 16], sizes = [2, 16], strides = [1, 1]} : vector<2x64xf32> to vector<2x16xf32>
    %316 = vector.extract_strided_slice %308 {offsets = [0, 32], sizes = [2, 16], strides = [1, 1]} : vector<2x64xf32> to vector<2x16xf32>
    %317 = math.tanh %316 : vector<2x16xf32>
    %318 = vector.extract_strided_slice %313 {offsets = [0, 48], sizes = [2, 16], strides = [1, 1]} : vector<2x64xf32> to vector<2x16xf32>
    %319 = arith.mulf %315, %259 : vector<2x16xf32>
    %320 = arith.mulf %314, %317 : vector<2x16xf32>
    %321 = arith.addf %319, %320 : vector<2x16xf32>
    %322 = math.tanh %321 : vector<2x16xf32>
    %323 = arith.mulf %318, %322 : vector<2x16xf32>
    %cst_66 = arith.constant 0.000000e+00 : f32
    %324 = vector.broadcast %cst_66 : f32 to vector<2x1xf32>
    %325 = arith.cmpf ogt, %302, %324 : vector<2x1xf32>
    %326 = vector.shape_cast %325 : vector<2x1xi1> to vector<2x1xi1>
    %327 = vector.broadcast %326 : vector<2x1xi1> to vector<2x16xi1>
    %328 = arith.select %327, %323, %256 : vector<2x16xi1>, vector<2x16xf32>
    %329 = vector.shape_cast %325 : vector<2x1xi1> to vector<2x1xi1>
    %330 = vector.broadcast %329 : vector<2x1xi1> to vector<2x16xi1>
    %331 = arith.select %330, %321, %259 : vector<2x16xi1>, vector<2x16xf32>
    %332 = vector.extract_strided_slice %7 {offsets = [0, 3, 64], sizes = [2, 1, 64], strides = [1, 1, 1]} : vector<2x8x128xf32> to vector<2x1x64xf32>
    %333 = vector.shape_cast %332 : vector<2x1x64xf32> to vector<2x64xf32>
    %c0_67 = arith.constant 0 : index
    %c0_68 = arith.constant 0 : index
    %334 = vector.load %arg6[%c0_67, %c0_68] : memref<16x64xf32, #tpu.memory_space<vmem>>, vector<16x64xf32>
    %cst_69 = arith.constant dense<0.000000e+00> : vector<2x64xf32>
    %335 = tpu.matmul %284, %334, %cst_69 {dimension_numbers = #tpu.dot_dimension_numbers<[1], [0], [0], [1], [0, 0, 1, 1], [], []>, precision = #tpu.contract_precision<fp32>} : vector<2x16xf32>, vector<16x64xf32>, vector<2x64xf32> -> vector<2x64xf32>
    %336 = arith.addf %333, %335 : vector<2x64xf32>
    %337 = arith.negf %336 : vector<2x64xf32>
    %338 = math.exp %337 : vector<2x64xf32>
    %cst_70 = arith.constant 1.000000e+00 : f32
    %339 = vector.broadcast %cst_70 : f32 to vector<2x64xf32>
    %340 = arith.addf %339, %338 : vector<2x64xf32>
    %341 = arith.divf %339, %340 : vector<2x64xf32>
    %342 = vector.extract_strided_slice %341 {offsets = [0, 0], sizes = [2, 16], strides = [1, 1]} : vector<2x64xf32> to vector<2x16xf32>
    %343 = vector.extract_strided_slice %341 {offsets = [0, 16], sizes = [2, 16], strides = [1, 1]} : vector<2x64xf32> to vector<2x16xf32>
    %344 = vector.extract_strided_slice %336 {offsets = [0, 32], sizes = [2, 16], strides = [1, 1]} : vector<2x64xf32> to vector<2x16xf32>
    %345 = math.tanh %344 : vector<2x16xf32>
    %346 = vector.extract_strided_slice %341 {offsets = [0, 48], sizes = [2, 16], strides = [1, 1]} : vector<2x64xf32> to vector<2x16xf32>
    %347 = arith.mulf %343, %287 : vector<2x16xf32>
    %348 = arith.mulf %342, %345 : vector<2x16xf32>
    %349 = arith.addf %347, %348 : vector<2x16xf32>
    %350 = math.tanh %349 : vector<2x16xf32>
    %351 = arith.mulf %346, %350 : vector<2x16xf32>
    %cst_71 = arith.constant 0.000000e+00 : f32
    %352 = vector.broadcast %cst_71 : f32 to vector<2x1xf32>
    %353 = arith.cmpf ogt, %303, %352 : vector<2x1xf32>
    %354 = vector.shape_cast %353 : vector<2x1xi1> to vector<2x1xi1>
    %355 = vector.broadcast %354 : vector<2x1xi1> to vector<2x16xi1>
    %356 = arith.select %355, %351, %284 : vector<2x16xi1>, vector<2x16xf32>
    %357 = vector.shape_cast %353 : vector<2x1xi1> to vector<2x1xi1>
    %358 = vector.broadcast %357 : vector<2x1xi1> to vector<2x16xi1>
    %359 = arith.select %358, %349, %287 : vector<2x16xi1>, vector<2x16xf32>
    %360 = vector.broadcast %302 : vector<2x1xf32> to vector<2x16xf32>
    %361 = arith.mulf %328, %360 : vector<2x16xf32>
    %362 = vector.extract_strided_slice %9 {offsets = [0, 0], sizes = [1, 16], strides = [1, 1]} : vector<1x32xf32> to vector<1x16xf32>
    %363 = vector.broadcast %362 : vector<1x16xf32> to vector<2x16xf32>
    %364 = arith.mulf %361, %363 : vector<2x16xf32>
    %cst_72 = arith.constant dense<0.000000e+00> : vector<2xf32>
    %365 = vector.multi_reduction <add>, %364, %cst_72 [1] : vector<2x16xf32> to vector<2xf32>
    %366 = vector.shape_cast %365 : vector<2xf32> to vector<2x1xf32>
    %367 = vector.broadcast %303 : vector<2x1xf32> to vector<2x16xf32>
    %368 = arith.mulf %356, %367 : vector<2x16xf32>
    %369 = vector.extract_strided_slice %9 {offsets = [0, 16], sizes = [1, 16], strides = [1, 1]} : vector<1x32xf32> to vector<1x16xf32>
    %370 = vector.broadcast %369 : vector<1x16xf32> to vector<2x16xf32>
    %371 = arith.mulf %368, %370 : vector<2x16xf32>
    %cst_73 = arith.constant dense<0.000000e+00> : vector<2xf32>
    %372 = vector.multi_reduction <add>, %371, %cst_73 [1] : vector<2x16xf32> to vector<2xf32>
    %373 = vector.shape_cast %372 : vector<2xf32> to vector<2x1xf32>
    %374 = vector.extract_strided_slice %8 {offsets = [0, 5], sizes = [2, 1], strides = [1, 1]} : vector<2x8xf32> to vector<2x1xf32>
    %375 = vector.extract_strided_slice %8 {offsets = [0, 2], sizes = [2, 1], strides = [1, 1]} : vector<2x8xf32> to vector<2x1xf32>
    %376 = vector.extract_strided_slice %7 {offsets = [0, 5, 0], sizes = [2, 1, 64], strides = [1, 1, 1]} : vector<2x8x128xf32> to vector<2x1x64xf32>
    %377 = vector.shape_cast %376 : vector<2x1x64xf32> to vector<2x64xf32>
    %c0_74 = arith.constant 0 : index
    %c0_75 = arith.constant 0 : index
    %378 = vector.load %arg5[%c0_74, %c0_75] : memref<16x64xf32, #tpu.memory_space<vmem>>, vector<16x64xf32>
    %cst_76 = arith.constant dense<0.000000e+00> : vector<2x64xf32>
    %379 = tpu.matmul %328, %378, %cst_76 {dimension_numbers = #tpu.dot_dimension_numbers<[1], [0], [0], [1], [0, 0, 1, 1], [], []>, precision = #tpu.contract_precision<fp32>} : vector<2x16xf32>, vector<16x64xf32>, vector<2x64xf32> -> vector<2x64xf32>
    %380 = arith.addf %377, %379 : vector<2x64xf32>
    %381 = arith.negf %380 : vector<2x64xf32>
    %382 = math.exp %381 : vector<2x64xf32>
    %cst_77 = arith.constant 1.000000e+00 : f32
    %383 = vector.broadcast %cst_77 : f32 to vector<2x64xf32>
    %384 = arith.addf %383, %382 : vector<2x64xf32>
    %385 = arith.divf %383, %384 : vector<2x64xf32>
    %386 = vector.extract_strided_slice %385 {offsets = [0, 0], sizes = [2, 16], strides = [1, 1]} : vector<2x64xf32> to vector<2x16xf32>
    %387 = vector.extract_strided_slice %385 {offsets = [0, 16], sizes = [2, 16], strides = [1, 1]} : vector<2x64xf32> to vector<2x16xf32>
    %388 = vector.extract_strided_slice %380 {offsets = [0, 32], sizes = [2, 16], strides = [1, 1]} : vector<2x64xf32> to vector<2x16xf32>
    %389 = math.tanh %388 : vector<2x16xf32>
    %390 = vector.extract_strided_slice %385 {offsets = [0, 48], sizes = [2, 16], strides = [1, 1]} : vector<2x64xf32> to vector<2x16xf32>
    %391 = arith.mulf %387, %331 : vector<2x16xf32>
    %392 = arith.mulf %386, %389 : vector<2x16xf32>
    %393 = arith.addf %391, %392 : vector<2x16xf32>
    %394 = math.tanh %393 : vector<2x16xf32>
    %395 = arith.mulf %390, %394 : vector<2x16xf32>
    %cst_78 = arith.constant 0.000000e+00 : f32
    %396 = vector.broadcast %cst_78 : f32 to vector<2x1xf32>
    %397 = arith.cmpf ogt, %374, %396 : vector<2x1xf32>
    %398 = vector.shape_cast %397 : vector<2x1xi1> to vector<2x1xi1>
    %399 = vector.broadcast %398 : vector<2x1xi1> to vector<2x16xi1>
    %400 = arith.select %399, %395, %328 : vector<2x16xi1>, vector<2x16xf32>
    %401 = vector.shape_cast %397 : vector<2x1xi1> to vector<2x1xi1>
    %402 = vector.broadcast %401 : vector<2x1xi1> to vector<2x16xi1>
    %403 = arith.select %402, %393, %331 : vector<2x16xi1>, vector<2x16xf32>
    %404 = vector.extract_strided_slice %7 {offsets = [0, 2, 64], sizes = [2, 1, 64], strides = [1, 1, 1]} : vector<2x8x128xf32> to vector<2x1x64xf32>
    %405 = vector.shape_cast %404 : vector<2x1x64xf32> to vector<2x64xf32>
    %c0_79 = arith.constant 0 : index
    %c0_80 = arith.constant 0 : index
    %406 = vector.load %arg6[%c0_79, %c0_80] : memref<16x64xf32, #tpu.memory_space<vmem>>, vector<16x64xf32>
    %cst_81 = arith.constant dense<0.000000e+00> : vector<2x64xf32>
    %407 = tpu.matmul %356, %406, %cst_81 {dimension_numbers = #tpu.dot_dimension_numbers<[1], [0], [0], [1], [0, 0, 1, 1], [], []>, precision = #tpu.contract_precision<fp32>} : vector<2x16xf32>, vector<16x64xf32>, vector<2x64xf32> -> vector<2x64xf32>
    %408 = arith.addf %405, %407 : vector<2x64xf32>
    %409 = arith.negf %408 : vector<2x64xf32>
    %410 = math.exp %409 : vector<2x64xf32>
    %cst_82 = arith.constant 1.000000e+00 : f32
    %411 = vector.broadcast %cst_82 : f32 to vector<2x64xf32>
    %412 = arith.addf %411, %410 : vector<2x64xf32>
    %413 = arith.divf %411, %412 : vector<2x64xf32>
    %414 = vector.extract_strided_slice %413 {offsets = [0, 0], sizes = [2, 16], strides = [1, 1]} : vector<2x64xf32> to vector<2x16xf32>
    %415 = vector.extract_strided_slice %413 {offsets = [0, 16], sizes = [2, 16], strides = [1, 1]} : vector<2x64xf32> to vector<2x16xf32>
    %416 = vector.extract_strided_slice %408 {offsets = [0, 32], sizes = [2, 16], strides = [1, 1]} : vector<2x64xf32> to vector<2x16xf32>
    %417 = math.tanh %416 : vector<2x16xf32>
    %418 = vector.extract_strided_slice %413 {offsets = [0, 48], sizes = [2, 16], strides = [1, 1]} : vector<2x64xf32> to vector<2x16xf32>
    %419 = arith.mulf %415, %359 : vector<2x16xf32>
    %420 = arith.mulf %414, %417 : vector<2x16xf32>
    %421 = arith.addf %419, %420 : vector<2x16xf32>
    %422 = math.tanh %421 : vector<2x16xf32>
    %423 = arith.mulf %418, %422 : vector<2x16xf32>
    %cst_83 = arith.constant 0.000000e+00 : f32
    %424 = vector.broadcast %cst_83 : f32 to vector<2x1xf32>
    %425 = arith.cmpf ogt, %375, %424 : vector<2x1xf32>
    %426 = vector.shape_cast %425 : vector<2x1xi1> to vector<2x1xi1>
    %427 = vector.broadcast %426 : vector<2x1xi1> to vector<2x16xi1>
    %428 = arith.select %427, %423, %356 : vector<2x16xi1>, vector<2x16xf32>
    %429 = vector.shape_cast %425 : vector<2x1xi1> to vector<2x1xi1>
    %430 = vector.broadcast %429 : vector<2x1xi1> to vector<2x16xi1>
    %431 = arith.select %430, %421, %359 : vector<2x16xi1>, vector<2x16xf32>
    %432 = vector.broadcast %374 : vector<2x1xf32> to vector<2x16xf32>
    %433 = arith.mulf %400, %432 : vector<2x16xf32>
    %434 = vector.extract_strided_slice %9 {offsets = [0, 0], sizes = [1, 16], strides = [1, 1]} : vector<1x32xf32> to vector<1x16xf32>
    %435 = vector.broadcast %434 : vector<1x16xf32> to vector<2x16xf32>
    %436 = arith.mulf %433, %435 : vector<2x16xf32>
    %cst_84 = arith.constant dense<0.000000e+00> : vector<2xf32>
    %437 = vector.multi_reduction <add>, %436, %cst_84 [1] : vector<2x16xf32> to vector<2xf32>
    %438 = vector.shape_cast %437 : vector<2xf32> to vector<2x1xf32>
    %439 = vector.broadcast %375 : vector<2x1xf32> to vector<2x16xf32>
    %440 = arith.mulf %428, %439 : vector<2x16xf32>
    %441 = vector.extract_strided_slice %9 {offsets = [0, 16], sizes = [1, 16], strides = [1, 1]} : vector<1x32xf32> to vector<1x16xf32>
    %442 = vector.broadcast %441 : vector<1x16xf32> to vector<2x16xf32>
    %443 = arith.mulf %440, %442 : vector<2x16xf32>
    %cst_85 = arith.constant dense<0.000000e+00> : vector<2xf32>
    %444 = vector.multi_reduction <add>, %443, %cst_85 [1] : vector<2x16xf32> to vector<2xf32>
    %445 = vector.shape_cast %444 : vector<2xf32> to vector<2x1xf32>
    %446 = vector.extract_strided_slice %8 {offsets = [0, 6], sizes = [2, 1], strides = [1, 1]} : vector<2x8xf32> to vector<2x1xf32>
    %447 = vector.extract_strided_slice %8 {offsets = [0, 1], sizes = [2, 1], strides = [1, 1]} : vector<2x8xf32> to vector<2x1xf32>
    %448 = vector.extract_strided_slice %7 {offsets = [0, 6, 0], sizes = [2, 1, 64], strides = [1, 1, 1]} : vector<2x8x128xf32> to vector<2x1x64xf32>
    %449 = vector.shape_cast %448 : vector<2x1x64xf32> to vector<2x64xf32>
    %c0_86 = arith.constant 0 : index
    %c0_87 = arith.constant 0 : index
    %450 = vector.load %arg5[%c0_86, %c0_87] : memref<16x64xf32, #tpu.memory_space<vmem>>, vector<16x64xf32>
    %cst_88 = arith.constant dense<0.000000e+00> : vector<2x64xf32>
    %451 = tpu.matmul %400, %450, %cst_88 {dimension_numbers = #tpu.dot_dimension_numbers<[1], [0], [0], [1], [0, 0, 1, 1], [], []>, precision = #tpu.contract_precision<fp32>} : vector<2x16xf32>, vector<16x64xf32>, vector<2x64xf32> -> vector<2x64xf32>
    %452 = arith.addf %449, %451 : vector<2x64xf32>
    %453 = arith.negf %452 : vector<2x64xf32>
    %454 = math.exp %453 : vector<2x64xf32>
    %cst_89 = arith.constant 1.000000e+00 : f32
    %455 = vector.broadcast %cst_89 : f32 to vector<2x64xf32>
    %456 = arith.addf %455, %454 : vector<2x64xf32>
    %457 = arith.divf %455, %456 : vector<2x64xf32>
    %458 = vector.extract_strided_slice %457 {offsets = [0, 0], sizes = [2, 16], strides = [1, 1]} : vector<2x64xf32> to vector<2x16xf32>
    %459 = vector.extract_strided_slice %457 {offsets = [0, 16], sizes = [2, 16], strides = [1, 1]} : vector<2x64xf32> to vector<2x16xf32>
    %460 = vector.extract_strided_slice %452 {offsets = [0, 32], sizes = [2, 16], strides = [1, 1]} : vector<2x64xf32> to vector<2x16xf32>
    %461 = math.tanh %460 : vector<2x16xf32>
    %462 = vector.extract_strided_slice %457 {offsets = [0, 48], sizes = [2, 16], strides = [1, 1]} : vector<2x64xf32> to vector<2x16xf32>
    %463 = arith.mulf %459, %403 : vector<2x16xf32>
    %464 = arith.mulf %458, %461 : vector<2x16xf32>
    %465 = arith.addf %463, %464 : vector<2x16xf32>
    %466 = math.tanh %465 : vector<2x16xf32>
    %467 = arith.mulf %462, %466 : vector<2x16xf32>
    %cst_90 = arith.constant 0.000000e+00 : f32
    %468 = vector.broadcast %cst_90 : f32 to vector<2x1xf32>
    %469 = arith.cmpf ogt, %446, %468 : vector<2x1xf32>
    %470 = vector.shape_cast %469 : vector<2x1xi1> to vector<2x1xi1>
    %471 = vector.broadcast %470 : vector<2x1xi1> to vector<2x16xi1>
    %472 = arith.select %471, %467, %400 : vector<2x16xi1>, vector<2x16xf32>
    %473 = vector.shape_cast %469 : vector<2x1xi1> to vector<2x1xi1>
    %474 = vector.broadcast %473 : vector<2x1xi1> to vector<2x16xi1>
    %475 = arith.select %474, %465, %403 : vector<2x16xi1>, vector<2x16xf32>
    %476 = vector.extract_strided_slice %7 {offsets = [0, 1, 64], sizes = [2, 1, 64], strides = [1, 1, 1]} : vector<2x8x128xf32> to vector<2x1x64xf32>
    %477 = vector.shape_cast %476 : vector<2x1x64xf32> to vector<2x64xf32>
    %c0_91 = arith.constant 0 : index
    %c0_92 = arith.constant 0 : index
    %478 = vector.load %arg6[%c0_91, %c0_92] : memref<16x64xf32, #tpu.memory_space<vmem>>, vector<16x64xf32>
    %cst_93 = arith.constant dense<0.000000e+00> : vector<2x64xf32>
    %479 = tpu.matmul %428, %478, %cst_93 {dimension_numbers = #tpu.dot_dimension_numbers<[1], [0], [0], [1], [0, 0, 1, 1], [], []>, precision = #tpu.contract_precision<fp32>} : vector<2x16xf32>, vector<16x64xf32>, vector<2x64xf32> -> vector<2x64xf32>
    %480 = arith.addf %477, %479 : vector<2x64xf32>
    %481 = arith.negf %480 : vector<2x64xf32>
    %482 = math.exp %481 : vector<2x64xf32>
    %cst_94 = arith.constant 1.000000e+00 : f32
    %483 = vector.broadcast %cst_94 : f32 to vector<2x64xf32>
    %484 = arith.addf %483, %482 : vector<2x64xf32>
    %485 = arith.divf %483, %484 : vector<2x64xf32>
    %486 = vector.extract_strided_slice %485 {offsets = [0, 0], sizes = [2, 16], strides = [1, 1]} : vector<2x64xf32> to vector<2x16xf32>
    %487 = vector.extract_strided_slice %485 {offsets = [0, 16], sizes = [2, 16], strides = [1, 1]} : vector<2x64xf32> to vector<2x16xf32>
    %488 = vector.extract_strided_slice %480 {offsets = [0, 32], sizes = [2, 16], strides = [1, 1]} : vector<2x64xf32> to vector<2x16xf32>
    %489 = math.tanh %488 : vector<2x16xf32>
    %490 = vector.extract_strided_slice %485 {offsets = [0, 48], sizes = [2, 16], strides = [1, 1]} : vector<2x64xf32> to vector<2x16xf32>
    %491 = arith.mulf %487, %431 : vector<2x16xf32>
    %492 = arith.mulf %486, %489 : vector<2x16xf32>
    %493 = arith.addf %491, %492 : vector<2x16xf32>
    %494 = math.tanh %493 : vector<2x16xf32>
    %495 = arith.mulf %490, %494 : vector<2x16xf32>
    %cst_95 = arith.constant 0.000000e+00 : f32
    %496 = vector.broadcast %cst_95 : f32 to vector<2x1xf32>
    %497 = arith.cmpf ogt, %447, %496 : vector<2x1xf32>
    %498 = vector.shape_cast %497 : vector<2x1xi1> to vector<2x1xi1>
    %499 = vector.broadcast %498 : vector<2x1xi1> to vector<2x16xi1>
    %500 = arith.select %499, %495, %428 : vector<2x16xi1>, vector<2x16xf32>
    %501 = vector.shape_cast %497 : vector<2x1xi1> to vector<2x1xi1>
    %502 = vector.broadcast %501 : vector<2x1xi1> to vector<2x16xi1>
    %503 = arith.select %502, %493, %431 : vector<2x16xi1>, vector<2x16xf32>
    %504 = vector.broadcast %446 : vector<2x1xf32> to vector<2x16xf32>
    %505 = arith.mulf %472, %504 : vector<2x16xf32>
    %506 = vector.extract_strided_slice %9 {offsets = [0, 0], sizes = [1, 16], strides = [1, 1]} : vector<1x32xf32> to vector<1x16xf32>
    %507 = vector.broadcast %506 : vector<1x16xf32> to vector<2x16xf32>
    %508 = arith.mulf %505, %507 : vector<2x16xf32>
    %cst_96 = arith.constant dense<0.000000e+00> : vector<2xf32>
    %509 = vector.multi_reduction <add>, %508, %cst_96 [1] : vector<2x16xf32> to vector<2xf32>
    %510 = vector.shape_cast %509 : vector<2xf32> to vector<2x1xf32>
    %511 = vector.broadcast %447 : vector<2x1xf32> to vector<2x16xf32>
    %512 = arith.mulf %500, %511 : vector<2x16xf32>
    %513 = vector.extract_strided_slice %9 {offsets = [0, 16], sizes = [1, 16], strides = [1, 1]} : vector<1x32xf32> to vector<1x16xf32>
    %514 = vector.broadcast %513 : vector<1x16xf32> to vector<2x16xf32>
    %515 = arith.mulf %512, %514 : vector<2x16xf32>
    %cst_97 = arith.constant dense<0.000000e+00> : vector<2xf32>
    %516 = vector.multi_reduction <add>, %515, %cst_97 [1] : vector<2x16xf32> to vector<2xf32>
    %517 = vector.shape_cast %516 : vector<2xf32> to vector<2x1xf32>
    %518 = vector.extract_strided_slice %8 {offsets = [0, 7], sizes = [2, 1], strides = [1, 1]} : vector<2x8xf32> to vector<2x1xf32>
    %519 = vector.extract_strided_slice %8 {offsets = [0, 0], sizes = [2, 1], strides = [1, 1]} : vector<2x8xf32> to vector<2x1xf32>
    %520 = vector.extract_strided_slice %7 {offsets = [0, 7, 0], sizes = [2, 1, 64], strides = [1, 1, 1]} : vector<2x8x128xf32> to vector<2x1x64xf32>
    %521 = vector.shape_cast %520 : vector<2x1x64xf32> to vector<2x64xf32>
    %c0_98 = arith.constant 0 : index
    %c0_99 = arith.constant 0 : index
    %522 = vector.load %arg5[%c0_98, %c0_99] : memref<16x64xf32, #tpu.memory_space<vmem>>, vector<16x64xf32>
    %cst_100 = arith.constant dense<0.000000e+00> : vector<2x64xf32>
    %523 = tpu.matmul %472, %522, %cst_100 {dimension_numbers = #tpu.dot_dimension_numbers<[1], [0], [0], [1], [0, 0, 1, 1], [], []>, precision = #tpu.contract_precision<fp32>} : vector<2x16xf32>, vector<16x64xf32>, vector<2x64xf32> -> vector<2x64xf32>
    %524 = arith.addf %521, %523 : vector<2x64xf32>
    %525 = arith.negf %524 : vector<2x64xf32>
    %526 = math.exp %525 : vector<2x64xf32>
    %cst_101 = arith.constant 1.000000e+00 : f32
    %527 = vector.broadcast %cst_101 : f32 to vector<2x64xf32>
    %528 = arith.addf %527, %526 : vector<2x64xf32>
    %529 = arith.divf %527, %528 : vector<2x64xf32>
    %530 = vector.extract_strided_slice %529 {offsets = [0, 0], sizes = [2, 16], strides = [1, 1]} : vector<2x64xf32> to vector<2x16xf32>
    %531 = vector.extract_strided_slice %529 {offsets = [0, 16], sizes = [2, 16], strides = [1, 1]} : vector<2x64xf32> to vector<2x16xf32>
    %532 = vector.extract_strided_slice %524 {offsets = [0, 32], sizes = [2, 16], strides = [1, 1]} : vector<2x64xf32> to vector<2x16xf32>
    %533 = math.tanh %532 : vector<2x16xf32>
    %534 = vector.extract_strided_slice %529 {offsets = [0, 48], sizes = [2, 16], strides = [1, 1]} : vector<2x64xf32> to vector<2x16xf32>
    %535 = arith.mulf %531, %475 : vector<2x16xf32>
    %536 = arith.mulf %530, %533 : vector<2x16xf32>
    %537 = arith.addf %535, %536 : vector<2x16xf32>
    %538 = math.tanh %537 : vector<2x16xf32>
    %539 = arith.mulf %534, %538 : vector<2x16xf32>
    %cst_102 = arith.constant 0.000000e+00 : f32
    %540 = vector.broadcast %cst_102 : f32 to vector<2x1xf32>
    %541 = arith.cmpf ogt, %518, %540 : vector<2x1xf32>
    %542 = vector.shape_cast %541 : vector<2x1xi1> to vector<2x1xi1>
    %543 = vector.broadcast %542 : vector<2x1xi1> to vector<2x16xi1>
    %544 = arith.select %543, %539, %472 : vector<2x16xi1>, vector<2x16xf32>
    %545 = vector.extract_strided_slice %7 {offsets = [0, 0, 64], sizes = [2, 1, 64], strides = [1, 1, 1]} : vector<2x8x128xf32> to vector<2x1x64xf32>
    %546 = vector.shape_cast %545 : vector<2x1x64xf32> to vector<2x64xf32>
    %c0_103 = arith.constant 0 : index
    %c0_104 = arith.constant 0 : index
    %547 = vector.load %arg6[%c0_103, %c0_104] : memref<16x64xf32, #tpu.memory_space<vmem>>, vector<16x64xf32>
    %cst_105 = arith.constant dense<0.000000e+00> : vector<2x64xf32>
    %548 = tpu.matmul %500, %547, %cst_105 {dimension_numbers = #tpu.dot_dimension_numbers<[1], [0], [0], [1], [0, 0, 1, 1], [], []>, precision = #tpu.contract_precision<fp32>} : vector<2x16xf32>, vector<16x64xf32>, vector<2x64xf32> -> vector<2x64xf32>
    %549 = arith.addf %546, %548 : vector<2x64xf32>
    %550 = arith.negf %549 : vector<2x64xf32>
    %551 = math.exp %550 : vector<2x64xf32>
    %cst_106 = arith.constant 1.000000e+00 : f32
    %552 = vector.broadcast %cst_106 : f32 to vector<2x64xf32>
    %553 = arith.addf %552, %551 : vector<2x64xf32>
    %554 = arith.divf %552, %553 : vector<2x64xf32>
    %555 = vector.extract_strided_slice %554 {offsets = [0, 0], sizes = [2, 16], strides = [1, 1]} : vector<2x64xf32> to vector<2x16xf32>
    %556 = vector.extract_strided_slice %554 {offsets = [0, 16], sizes = [2, 16], strides = [1, 1]} : vector<2x64xf32> to vector<2x16xf32>
    %557 = vector.extract_strided_slice %549 {offsets = [0, 32], sizes = [2, 16], strides = [1, 1]} : vector<2x64xf32> to vector<2x16xf32>
    %558 = math.tanh %557 : vector<2x16xf32>
    %559 = vector.extract_strided_slice %554 {offsets = [0, 48], sizes = [2, 16], strides = [1, 1]} : vector<2x64xf32> to vector<2x16xf32>
    %560 = arith.mulf %556, %503 : vector<2x16xf32>
    %561 = arith.mulf %555, %558 : vector<2x16xf32>
    %562 = arith.addf %560, %561 : vector<2x16xf32>
    %563 = math.tanh %562 : vector<2x16xf32>
    %564 = arith.mulf %559, %563 : vector<2x16xf32>
    %cst_107 = arith.constant 0.000000e+00 : f32
    %565 = vector.broadcast %cst_107 : f32 to vector<2x1xf32>
    %566 = arith.cmpf ogt, %519, %565 : vector<2x1xf32>
    %567 = vector.shape_cast %566 : vector<2x1xi1> to vector<2x1xi1>
    %568 = vector.broadcast %567 : vector<2x1xi1> to vector<2x16xi1>
    %569 = arith.select %568, %564, %500 : vector<2x16xi1>, vector<2x16xf32>
    %570 = vector.broadcast %518 : vector<2x1xf32> to vector<2x16xf32>
    %571 = arith.mulf %544, %570 : vector<2x16xf32>
    %572 = vector.extract_strided_slice %9 {offsets = [0, 0], sizes = [1, 16], strides = [1, 1]} : vector<1x32xf32> to vector<1x16xf32>
    %573 = vector.broadcast %572 : vector<1x16xf32> to vector<2x16xf32>
    %574 = arith.mulf %571, %573 : vector<2x16xf32>
    %cst_108 = arith.constant dense<0.000000e+00> : vector<2xf32>
    %575 = vector.multi_reduction <add>, %574, %cst_108 [1] : vector<2x16xf32> to vector<2xf32>
    %576 = vector.shape_cast %575 : vector<2xf32> to vector<2x1xf32>
    %577 = vector.broadcast %519 : vector<2x1xf32> to vector<2x16xf32>
    %578 = arith.mulf %569, %577 : vector<2x16xf32>
    %579 = vector.extract_strided_slice %9 {offsets = [0, 16], sizes = [1, 16], strides = [1, 1]} : vector<1x32xf32> to vector<1x16xf32>
    %580 = vector.broadcast %579 : vector<1x16xf32> to vector<2x16xf32>
    %581 = arith.mulf %578, %580 : vector<2x16xf32>
    %cst_109 = arith.constant dense<0.000000e+00> : vector<2xf32>
    %582 = vector.multi_reduction <add>, %581, %cst_109 [1] : vector<2x16xf32> to vector<2xf32>
    %583 = vector.shape_cast %582 : vector<2xf32> to vector<2x1xf32>
    %584 = tpu.concatenate %78, %150, %222, %294, %366, %438, %510, %576 in 1 : vector<2x1xf32>, vector<2x1xf32>, vector<2x1xf32>, vector<2x1xf32>, vector<2x1xf32>, vector<2x1xf32>, vector<2x1xf32>, vector<2x1xf32> -> vector<2x8xf32>
    %585 = tpu.concatenate %583, %517, %445, %373, %301, %229, %157, %85 in 1 : vector<2x1xf32>, vector<2x1xf32>, vector<2x1xf32>, vector<2x1xf32>, vector<2x1xf32>, vector<2x1xf32>, vector<2x1xf32>, vector<2x1xf32> -> vector<2x8xf32>
    %586 = arith.addf %584, %585 : vector<2x8xf32>
    %c0_110 = arith.constant 0 : index
    %c0_111 = arith.constant 0 : index
    %587 = vector.load %arg8[%c0_110, %c0_111] : memref<1x1xf32, #tpu.memory_space<vmem>>, vector<1x1xf32>
    %588 = vector.broadcast %587 : vector<1x1xf32> to vector<2x8xf32>
    %589 = arith.addf %586, %588 : vector<2x8xf32>
    %cst_112 = arith.constant 0.000000e+00 : f32
    %590 = vector.broadcast %cst_112 : f32 to vector<2x8xf32>
    %591 = arith.cmpf ogt, %8, %590 : vector<2x8xf32>
    %cst_113 = arith.constant 0.000000e+00 : f32
    %592 = vector.broadcast %cst_113 : f32 to vector<2x8xf32>
    %593 = arith.cmpf oge, %589, %592 : vector<2x8xf32>
    %594 = arith.extui %593 : vector<2x8xi1> to vector<2x8xi32>
    %595 = arith.sitofp %594 : vector<2x8xi32> to vector<2x8xf32>
    %cst_114 = arith.constant 0.000000e+00 : f32
    %596 = vector.broadcast %cst_114 : f32 to vector<2x8xf32>
    %597 = arith.select %591, %595, %596 : vector<2x8xi1>, vector<2x8xf32>
    %c0_115 = arith.constant 0 : index
    %c0_116 = arith.constant 0 : index
    %598 = vector.load %arg9[%c0_115, %c0_116] : memref<2x8xf32, #tpu.memory_space<vmem>>, vector<2x8xf32>
    tpu.vector_store %arg9[%c0_115, %c0_116], %597 {strides = array<i32>} : memref<2x8xf32, #tpu.memory_space<vmem>>, vector<2x8xf32>,
    return
  }
  func.func @transform_0(%arg0: i32) -> (i32, i32, i32) {
    %c0_i32 = arith.constant 0 : i32
    %c0_i32_0 = arith.constant 0 : i32
    %c0_i32_1 = arith.constant 0 : i32
    return %arg0, %c0_i32, %c0_i32_0 : i32, i32, i32
  }
  func.func @transform_1(%arg0: i32) -> (i32, i32) {
    %c0_i32 = arith.constant 0 : i32
    %c0_i32_0 = arith.constant 0 : i32
    return %arg0, %c0_i32 : i32, i32
  }
  func.func @transform_2(%arg0: i32) -> (i32, i32) {
    %c0_i32 = arith.constant 0 : i32
    %c0_i32_0 = arith.constant 0 : i32
    %c0_i32_1 = arith.constant 0 : i32
    return %c0_i32, %c0_i32_0 : i32, i32
  }
  func.func @transform_3(%arg0: i32) -> (i32, i32) {
    %c0_i32 = arith.constant 0 : i32
    %c0_i32_0 = arith.constant 0 : i32
    %c0_i32_1 = arith.constant 0 : i32
    return %c0_i32, %c0_i32_0 : i32, i32
  }
  func.func @transform_4(%arg0: i32) -> (i32, i32) {
    %c0_i32 = arith.constant 0 : i32
    %c0_i32_0 = arith.constant 0 : i32
    %c0_i32_1 = arith.constant 0 : i32
    return %c0_i32, %c0_i32_0 : i32, i32
  }
  func.func @transform_5(%arg0: i32) -> (i32, i32) {
    %c0_i32 = arith.constant 0 : i32
    %c0_i32_0 = arith.constant 0 : i32
    %c0_i32_1 = arith.constant 0 : i32
    return %c0_i32, %c0_i32_0 : i32, i32
  }
  func.func @transform_6(%arg0: i32) -> (i32, i32) {
    %c0_i32 = arith.constant 0 : i32
    %c0_i32_0 = arith.constant 0 : i32
    %c0_i32_1 = arith.constant 0 : i32
    return %c0_i32, %c0_i32_0 : i32, i32
  }
  func.func @transform_7(%arg0: i32) -> (i32, i32) {
    %c0_i32 = arith.constant 0 : i32
    %c0_i32_0 = arith.constant 0 : i32
    %c0_i32_1 = arith.constant 0 : i32
    return %c0_i32, %c0_i32_0 : i32, i32
  }
  func.func @transform_8(%arg0: i32) -> (i32, i32) {
    %c0_i32 = arith.constant 0 : i32
    %c0_i32_0 = arith.constant 0 : i32
    return %arg0, %c0_i32 : i32, i32
  }
}

</mosaic_0001>

<bundles_post_ra>
// kernel: tpu_custom_call.1
= control target key start
LH: loop header
LB: loop body
LE: loop exit
PB: predicated region body
PF: predicated region fallthrough
CT: control target
= control target key end

     0   :  { %s12569_s0 = inlined_call_operand.hbm [shape: f32[2,8,32], index: 0, kind: input, shape index: {}]   ;;  %s12570_s1 = inlined_call_operand.vmem [shape: f32[2,8], index: 1, kind: input, shape index: {}]   ;;  %s12571_s2 = inlined_call_operand.hbm [shape: f32[32,128], index: 2, kind: input, shape index: {}]   ;;  %s12572_s3 = inlined_call_operand.vmem [shape: f32[1,128], index: 3, kind: input, shape index: {}]   ;;  %s12573_s4 = inlined_call_operand.hbm [shape: f32[16,64], index: 4, kind: input, shape index: {}]   ;;  %s12574_s5 = inlined_call_operand.hbm [shape: f32[16,64], index: 5, kind: input, shape index: {}]   ;;  %s12575_s6 = inlined_call_operand.vmem [shape: f32[1,32], index: 6, kind: input, shape index: {}]   ;;  %s12576_s7 = inlined_call_operand.<no memory space> [shape: f32[1,1], index: 7, kind: input, shape index: {}]   ;;  %s12577_s8 = inlined_call_operand.hbm [shape: f32[2,8], index: 8, kind: output, shape index: {}]  }
   0x1   :  { %v13_v0 = vstv %s12576_s7 }
   0x2   :  { %14 = vst [vmem:[#allocation2] sm:$0x1] %v13_v0 }
   0x3   :  { %15 = vsyncpa [#allocation4], 0 }
   0x4   :  { %16 = vsyncpa [#allocation7], 0 }
   0x5   :  { %17 = vsyncpa [#allocation10], 0 }
   0x6   :  { %18 = vsyncpa [#allocation5], 0  ;;  %s11044_s29 = smov [#allocation6]   ;;  %s11045_s9 = smov [#allocation3]  }
   0x7   :  { %s38_s30 = sshll.u32 %s11044_s29, 4  ;;  %s24_s10 = sshll.u32 %s11045_s9, 4  ;;  %s39_s30 = int_to_ptr.vmem [resolvable:$true] %s38_s30  ;;  %s25_s10 = int_to_ptr.vmem [resolvable:$true] %s24_s10 }
   0x8   :  { %s10944_s11 = scalar_lea.vmem %s39_s30, 512  ;;  %p10949_p1 = scmp.lt.s32.totalorder %s39_s30, %s39_s30 }
   0x9   :  { %p10945_p0 = scmp.ne.s32.totalorder %s39_s30, %s10944_s11  ;;  %p10950_p2 = scmp.lt.s32.totalorder %s10944_s11, %s10944_s11 }
   0xb   :  { %p10951_p3 = por %p10950_p2, %p10949_p1 }
   0xd   :  { %p10952_p4 = pnand %p10951_p3, %p10945_p0 }
   0xf   :  { %10955 = shalt.err (!%p10952_p4)
}
  0x10   :  { %s11046_s12 = smov 128   ;;  %s11047_s7 = smov 8  }
  0x11   :  { %44 = dma.hbm_to_vmem [thread:$0]  %s12571_s2, 512, %s39_s30, [#allocation7], %s11046_s12, %s11046_s12, %s11047_s7  }
  0x12   :  { %s10964_s15 = scalar_lea.vmem %s25_s10, 256  ;;  %p10969_p6 = scmp.lt.s32.totalorder %s25_s10, %s25_s10 }
  0x13   :  { %p10965_p5 = scmp.ne.s32.totalorder %s25_s10, %s10964_s15  ;;  %p10970_p7 = scmp.lt.s32.totalorder %s10964_s15, %s10964_s15 }
  0x15   :  { %p10971_p8 = por %p10970_p7, %p10969_p6 }
  0x17   :  { %p10972_p9 = pnand %p10971_p8, %p10965_p5 }
  0x19   :  { %10975 = shalt.err (!%p10972_p9)
}
  0x1a   :  { %30 = dma.hbm_to_vmem [thread:$0]  %s12569_s0, 256, %s25_s10, [#allocation4], %s11046_s12, %s11046_s12, %s11047_s7  }
  0x1b   :  { %s11048_s18 = smov [#allocation8]   ;;  %s11049_s20 = smov [#allocation9]  }
  0x1c   :  { %s52_s19 = sshll.u32 %s11048_s18, 4  ;;  %s64_s21 = sshll.u32 %s11049_s20, 4  ;;  %s53_s19 = int_to_ptr.vmem [resolvable:$true] %s52_s19  ;;  %s65_s21 = int_to_ptr.vmem [resolvable:$true] %s64_s21 }
  0x1d   :  { %s10984_s2 = scalar_lea.vmem %s53_s19, 256  ;;  %p10989_p11 = scmp.lt.s32.totalorder %s53_s19, %s53_s19 }
  0x1e   :  { %p10985_p10 = scmp.ne.s32.totalorder %s53_s19, %s10984_s2  ;;  %p10990_p12 = scmp.lt.s32.totalorder %s10984_s2, %s10984_s2 }
  0x20   :  { %p10991_p13 = por %p10990_p12, %p10989_p11 }
  0x22   :  { %p10992_p0 = pnand %p10991_p13, %p10985_p10 }
  0x24   :  { %10995 = shalt.err (!%p10992_p0)
}
  0x25   :  { %58 = dma.hbm_to_vmem [thread:$0]  %s12573_s4, 256, %s53_s19, [#allocation7], %s11046_s12, %s11046_s12, %s11047_s7  }
  0x26   :  { %s11004_s0 = scalar_lea.vmem %s65_s21, 256  ;;  %p11009_p2 = scmp.lt.s32.totalorder %s65_s21, %s65_s21 }
  0x27   :  { %p11005_p1 = scmp.ne.s32.totalorder %s65_s21, %s11004_s0  ;;  %p11010_p3 = scmp.lt.s32.totalorder %s11004_s0, %s11004_s0 }
  0x29   :  { %p11011_p4 = por %p11010_p3, %p11009_p2 }
  0x2b   :  { %p11012_p5 = pnand %p11011_p4, %p11005_p1 }
  0x2d   :  { %11015 = shalt.err (!%p11012_p5)
}
  0x2e   :  { %70 = dma.hbm_to_vmem [thread:$0]  %s12574_s5, 256, %s65_s21, [#allocation10], %s11046_s12, %s11046_s12, %s11047_s7  }
  0x2f   :  { %11036 = dma.done.wait [#allocation4], 256  }
  0x30   :  { %11037 = vsyncadd [#allocation4], 4294967040 }
  0x31   :  { %11038 = dma.done.wait [#allocation7], 768  }
  0x32   :  { %11039 = vsyncadd [#allocation7], 4294966528 }
  0x33   :  { %11040 = dma.done.wait [#allocation10], 256  }
  0x34   :  { %11041 = vsyncadd [#allocation10], 4294967040  ;;  %vm100_vm0 = vcmask 261120   ;;  %v92_v1 = vld [vmem:[#allocation6 + $0x18] sm:$0xff]  ;;  %v91_v2 = vld [vmem:[#allocation6 + $0x10] sm:$0xff]  ;;  %v12586_v48 = vmov 0.0  }
  0x35   :  { %v90_v3 = vld [vmem:[#allocation6 + $0x8] sm:$0xff]  ;;  %v11140_v4 = vand.u32 4294901760, %v92_v1  ;;  %v11142_v5 = vand.u32 4294901760, %v91_v2  ;;  %v89_v7 = vld [vmem:[#allocation6] sm:$0xff]  ;;  %v87_v8 = vld [vmem:[#allocation3] sm:$0xff]  ;;  %vm11051_vm1 = vmmov 0  }
  0x36   :  { %v11144_v6 = vand.u32 4294901760, %v90_v3  ;;  %v88_v9 = vld [vmem:[#allocation3 + $0x8] sm:$0xff]  ;;  %v11146_v10 = vand.u32 4294901760, %v89_v7  ;;  %v102_v11 = vsel %vm100_vm0, %v87_v8, 0  ;;  %v638_v39 = vld [vmem:[#allocation8 + $0x8] sm:$0xff]  ;;  %v637_v40 = vld [vmem:[#allocation8] sm:$0xff] }
  0x37   :  { %v105_v12 = vsel %vm100_vm0, %v88_v9, 0  ;;  %9899 = vmatprep.subr.mxu0 %v11140_v4  ;;  %v222_v13 = vsub.f32 %v92_v1, %v11140_v4  ;;  %v11150_v14 = vand.u32 4294901760, %v102_v11  ;;  %v229_v16 = vsub.f32 %v91_v2, %v11142_v5  ;;  %v1180_v50 = vld [vmem:[#allocation9 + $0x8] sm:$0xff]  ;;  %v1179_v52 = vld [vmem:[#allocation9] sm:$0xff]  ;;  %s11053_s26 = smov 96   ;;  %s11054_s27 = smov 16  }
  0x38   :  { %v11152_v15 = vand.u32 4294901760, %v105_v12  ;;  %9900 = vmatpush3.msra.mxu0 %v11140_v4  ;;  %v236_v17 = vsub.f32 %v90_v3, %v11144_v6  ;;  %v243_v18 = vsub.f32 %v89_v7, %v11146_v10  ;;  %v11180_v41 = vand.u32 4294901760, %v638_v39  ;;  %s11057_s28 = smov 32   ;;  %s11058_s9 = smov 80  }
  0x39   :  { %9901 = vmatprep.subr.mxu0 %v11142_v5  ;;  %v223_v19 = vand.u32 4294901760, %v222_v13  ;;  %v11160_v20 = vsub.f32 %v102_v11, %v11150_v14  ;;  %v230_v21 = vand.u32 4294901760, %v229_v16  ;;  %9918 = vmatprep.mubr.f32.mxu1 %v11150_v14  ;;  %v11185_v42 = vand.u32 4294901760, %v637_v40  ;;  %v9539_v11 = vld [vmem:[%s12572_s3] ss:$0 sm:$0xff]  ;;  %s11052_s3 = smov 64  }
  0x3a   :  { %v11163_v22 = vsub.f32 %v105_v12, %v11152_v15  ;;  %9902 = vmatpush3.msra.mxu0 %v11142_v5  ;;  %v237_v23 = vand.u32 4294901760, %v236_v17  ;;  %v11167_v24 = vand.u32 4294901760, %v243_v18  ;;  %v11190_v43 = vsub.f32 %v638_v39, %v11180_v41  ;;  %s11059_s10 = smov 112   ;;  %s11060_s11 = smov 48  }
  0x3b   :  { %9903 = vmatprep.subr.mxu0 %v11144_v6  ;;  %v224_v25 = vsub.f32 %v222_v13, %v223_v19  ;;  %v178_v26 = vand.u32 4294901760, %v11160_v20  ;;  %v231_v27 = vsub.f32 %v229_v16, %v230_v21  ;;  %v11195_v44 = vsub.f32 %v637_v40, %v11185_v42 }
  0x3c   :  { %v188_v28 = vand.u32 4294901760, %v11163_v22  ;;  %9904 = vmatpush3.msra.mxu0 %v11144_v6  ;;  %v238_v29 = vsub.f32 %v236_v17, %v237_v23  ;;  %v245_v30 = vsub.f32 %v243_v18, %v11167_v24  ;;  %v11200_v45 = vand.u32 4294901760, %v11190_v43 }
  0x3d   :  { %9905 = vmatprep.subr.mxu0 %v11146_v10  ;;  %v225_v31 = vand.u32 4294901760, %v224_v25  ;;  %v179_v32 = vsub.f32 %v11160_v20, %v178_v26  ;;  %v232_v33 = vand.u32 4294901760, %v231_v27  ;;  %v11205_v46 = vand.u32 4294901760, %v11195_v44 }
  0x3e   :  { %v189_v34 = vsub.f32 %v11163_v22, %v188_v28  ;;  %9906 = vmatpush3.msra.mxu0 %v11146_v10  ;;  %v239_v37 = vand.u32 4294901760, %v238_v29  ;;  %v246_v38 = vand.u32 4294901760, %v245_v30  ;;  %v752_v47 = vsub.f32 %v11190_v43, %v11200_v45 }
  0x3f   :  { %9910 = vmatprep.subr.mxu1 %v225_v31  ;;  %v180_v35 = vand.u32 4294901760, %v179_v32  ;;  %9921 = vmatprep.subr.mxu0 %v222_v13  ;;  %v759_v49 = vsub.f32 %v11195_v44, %v11205_v46  ;;  %v11232_v54 = vand.u32 4294901760, %v1180_v50  ;;  %v11238_v55 = vand.u32 4294901760, %v1179_v52 }
  0x40   :  { %v190_v36 = vand.u32 4294901760, %v189_v34  ;;  %9911 = vmatpush3.msra.mxu1 %v225_v31  ;;  %v11223_v51 = vand.u32 4294901760, %v752_v47  ;;  %vm1165_vm2 = vcmask 1041409   ;;  %vm639_vm4 = vcmask 130048  }
  0x41   :  { %9907 = vmatprep.mubr.f32.mxu0 %v180_v35  ;;  %9912 = vmatprep.subr.mxu1 %v232_v33  ;;  %v11230_v53 = vand.u32 4294901760, %v759_v49  ;;  %v11245_v56 = vsub.f32 %v1180_v50, %v11232_v54  ;;  %v11253_v57 = vsub.f32 %v1179_v52, %v11238_v55  ;;  %vm1734_vm13 = vcmask 123904  }
  0x42   :  { %9908 = vmatmul.mubr.f32.vlgmr.msra.gmra.mxu0 %v190_v36  ;;  %9913 = vmatpush3.msra.mxu1 %v232_v33  ;;  %vm9483_vm14 = vcmask 7168   ;;  %vm9485_vm15 = vcmask 15360   ;;  %vm9487_vm0 = vcmask 23552  }
  0x43   :  { %9922 = vmatpush3.msra.mxu0 %v222_v13  ;;  %9914 = vmatprep.subr.mxu1 %v239_v37  ;;  %v11261_v58 = vand.u32 4294901760, %v11245_v56  ;;  %v11268_v59 = vand.u32 4294901760, %v11253_v57 }
  0x44   :  { %9923 = vmatprep.subr.mxu0 %v229_v16  ;;  %9915 = vmatpush3.msra.mxu1 %v239_v37 }
  0x45   :  { %9924 = vmatpush3.msra.mxu0 %v229_v16  ;;  %9916 = vmatprep.subr.mxu1 %v246_v38  ;;  %v1290_v60 = vsub.f32 %v11245_v56, %v11261_v58  ;;  %v1297_v61 = vsub.f32 %v11253_v57, %v11268_v59 }
  0x46   :  { %9925 = vmatprep.subr.mxu0 %v236_v17  ;;  %9917 = vmatpush3.msra.mxu1 %v246_v38 }
  0x47   :  { %9926 = vmatpush3.msra.mxu0 %v236_v17  ;;  %9919 = vmatmul.mubr.f32.vlgmr.msra.gmra.mxu1 %v11152_v15  ;;  %v11288_v62 = vand.u32 4294901760, %v1290_v60  ;;  %v11295_v63 = vand.u32 4294901760, %v1297_v61 }
  0x48   :  { %9927 = vmatprep.subr.mxu0 %v243_v18  ;;  %9932 = vmatprep.subr.mxu1 %v11140_v4 }
  0x49   :  { %9928 = vmatpush3.msra.mxu0 %v243_v18  ;;  %9929 = vmatprep.mubr.f32.mxu0 %v11160_v20 }
  0x4a   :  { %9933 = vmatpush3.msra.mxu1 %v11140_v4  ;;  %9930 = vmatmul.mubr.f32.vlgmr.msra.gmra.mxu0 %v11163_v22 }
  0x4b   :  { %9934 = vmatprep.subr.mxu1 %v11142_v5  ;;  %9943 = vmatprep.subr.mxu0 %v223_v19 }
  0x4c   :  { %9935 = vmatpush3.msra.mxu1 %v11142_v5  ;;  %9944 = vmatpush3.msra.mxu0 %v223_v19 }
  0x4d   :  { %9936 = vmatprep.subr.mxu1 %v11144_v6  ;;  %9945 = vmatprep.subr.mxu0 %v230_v21 }
  0x4e   :  { %9937 = vmatpush3.msra.mxu1 %v11144_v6  ;;  %9946 = vmatpush3.msra.mxu0 %v230_v21 }
  0x4f   :  { %9938 = vmatprep.subr.mxu1 %v11146_v10  ;;  %9947 = vmatprep.subr.mxu0 %v237_v23 }
  0x50   :  { %9939 = vmatpush3.msra.mxu1 %v11146_v10  ;;  %9940 = vmatprep.mubr.f32.mxu1 %v178_v26 }
  0x51   :  { %9948 = vmatpush3.msra.mxu0 %v237_v23  ;;  %9941 = vmatmul.mubr.f32.vlgmr.msra.gmra.mxu1 %v188_v28 }
  0x52   :  { %9949 = vmatprep.subr.mxu0 %v11167_v24  ;;  %9954 = vmatprep.subr.mxu1 %v11140_v4 }
  0x53   :  { %9950 = vmatpush3.msra.mxu0 %v11167_v24  ;;  %9951 = vmatprep.mubr.f32.mxu0 %v11150_v14 }
  0x54   :  { %9955 = vmatpush3.msra.mxu1 %v11140_v4  ;;  %9952 = vmatmul.mubr.f32.vlgmr.msra.gmra.mxu0 %v11152_v15 }
  0x55   :  { %9956 = vmatprep.subr.mxu1 %v11142_v5  ;;  %9965 = vmatprep.subr.mxu0 %v12586_v48 }
  0x56   :  { %9957 = vmatpush3.msra.mxu1 %v11142_v5  ;;  %9966 = vmatpush3.msra.mxu0 %v11180_v41 }
  0x57   :  { %9958 = vmatprep.subr.mxu1 %v11144_v6  ;;  %9962 = vmatprep.mubr.f32.mxu1 %v11150_v14 }
  0x58   :  { %9959 = vmatpush3.msra.mxu1 %v11144_v6  ;;  %9967 = vmatprep.subr.mxu0 %v12586_v48 }
  0x59   :  { %9960 = vmatprep.subr.mxu1 %v11146_v10  ;;  %9968 = vmatpush3.msra.mxu0 %v11185_v42 }
  0x5a   :  { %9961 = vmatpush3.msra.mxu1 %v11146_v10  ;;  %9969 = vmatprep.mubr.msk.f32.mxu0 %vm11051_vm1, %v12586_v48 }
  0x5b   :  { %9963 = vmatmul.mubr.f32.vlgmr.msra.gmra.mxu1 %v11152_v15  ;;  %9972 = vmatprep.subr.mxu1 %v12586_v48 }
  0x5c   :  { %9970 = vmatmul.mubr.f32.vlgmr.msra.gmra.mxu0 %v12586_v48  ;;  %9973 = vmatpush3.msra.mxu1 %v11223_v51 }
  0x5d   :  { %9979 = vmatprep.subr.mxu0 %v12586_v48  ;;  %9974 = vmatprep.subr.mxu1 %v12586_v48 }
  0x5e   :  { %9980 = vmatpush3.msra.mxu0 %v11190_v43  ;;  %9975 = vmatpush3.msra.mxu1 %v11230_v53 }
  0x5f   :  { %9976 = vmatprep.mubr.msk.f32.mxu1 %vm11051_vm1, %v12586_v48  ;;  %9981 = vmatprep.subr.mxu0 %v12586_v48 }
  0x60   :  { %9977 = vmatmul.mubr.f32.vlgmr.msra.gmra.mxu1 %v12586_v48  ;;  %9982 = vmatpush3.msra.mxu0 %v11195_v44 }
  0x61   :  { %9983 = vmatprep.mubr.msk.f32.mxu0 %vm11051_vm1, %v12586_v48  ;;  %9986 = vmatprep.subr.mxu1 %v12586_v48 }
  0x62   :  { %9984 = vmatmul.mubr.f32.vlgmr.msra.gmra.mxu0 %v12586_v48  ;;  %9987 = vmatpush3.msra.mxu1 %v11180_v41 }
  0x63   :  { %9993 = vmatprep.subr.mxu0 %v12586_v48  ;;  %9988 = vmatprep.subr.mxu1 %v12586_v48 }
  0x64   :  { %9994 = vmatpush3.msra.mxu0 %v11200_v45  ;;  %9989 = vmatpush3.msra.mxu1 %v11185_v42 }
  0x65   :  { %9990 = vmatprep.mubr.msk.f32.mxu1 %vm11051_vm1, %v12586_v48  ;;  %9995 = vmatprep.subr.mxu0 %v12586_v48 }
  0x66   :  { %9991 = vmatmul.mubr.f32.vlgmr.msra.gmra.mxu1 %v12586_v48  ;;  %9996 = vmatpush3.msra.mxu0 %v11205_v46 }
  0x67   :  { %9997 = vmatprep.mubr.msk.f32.mxu0 %vm11051_vm1, %v12586_v48  ;;  %10000 = vmatprep.subr.mxu1 %v12586_v48 }
  0x68   :  { %9998 = vmatmul.mubr.f32.vlgmr.msra.gmra.mxu0 %v12586_v48  ;;  %10001 = vmatpush3.msra.mxu1 %v11180_v41 }
  0x69   :  { %10007 = vmatprep.subr.mxu0 %v12586_v48  ;;  %10002 = vmatprep.subr.mxu1 %v12586_v48 }
  0x6a   :  { %10008 = vmatpush3.msra.mxu0 %v11232_v54  ;;  %10003 = vmatpush3.msra.mxu1 %v11185_v42 }
  0x6b   :  { %10004 = vmatprep.mubr.msk.f32.mxu1 %vm11051_vm1, %v12586_v48  ;;  %10009 = vmatprep.subr.mxu0 %v12586_v48 }
  0x6c   :  { %10005 = vmatmul.mubr.f32.vlgmr.msra.gmra.mxu1 %v12586_v48  ;;  %10010 = vmatpush3.msra.mxu0 %v11238_v55 }
  0x6d   :  { %10011 = vmatprep.mubr.msk.f32.mxu0 %vm11051_vm1, %v12586_v48  ;;  %10014 = vmatprep.subr.mxu1 %v12586_v48 }
  0x6e   :  { %10012 = vmatmul.mubr.f32.vlgmr.msra.gmra.mxu0 %v12586_v48  ;;  %10015 = vmatpush3.msra.mxu1 %v11288_v62 }
  0x6f   :  { %10021 = vmatprep.subr.mxu0 %v12586_v48  ;;  %10016 = vmatprep.subr.mxu1 %v12586_v48 }
  0x70   :  { %10022 = vmatpush3.msra.mxu0 %v11245_v56  ;;  %10017 = vmatpush3.msra.mxu1 %v11295_v63 }
  0x71   :  { %10018 = vmatprep.mubr.msk.f32.mxu1 %vm11051_vm1, %v12586_v48  ;;  %10023 = vmatprep.subr.mxu0 %v12586_v48 }
  0x72   :  { %10019 = vmatmul.mubr.f32.vlgmr.msra.gmra.mxu1 %v12586_v48  ;;  %10024 = vmatpush3.msra.mxu0 %v11253_v57 }
  0x73   :  { %10025 = vmatprep.mubr.msk.f32.mxu0 %vm11051_vm1, %v12586_v48  ;;  %10028 = vmatprep.subr.mxu1 %v12586_v48 }
  0x74   :  { %10026 = vmatmul.mubr.f32.vlgmr.msra.gmra.mxu0 %v12586_v48  ;;  %10029 = vmatpush3.msra.mxu1 %v11232_v54 }
  0x75   :  { %10035 = vmatprep.subr.mxu0 %v12586_v48  ;;  %10030 = vmatprep.subr.mxu1 %v12586_v48 }
  0x76   :  { %10036 = vmatpush3.msra.mxu0 %v11261_v58  ;;  %10031 = vmatpush3.msra.mxu1 %v11238_v55 }
  0x77   :  { %10032 = vmatprep.mubr.msk.f32.mxu1 %vm11051_vm1, %v12586_v48  ;;  %10037 = vmatprep.subr.mxu0 %v12586_v48 }
  0x78   :  { %10033 = vmatmul.mubr.f32.vlgmr.msra.gmra.mxu1 %v12586_v48  ;;  %10038 = vmatpush3.msra.mxu0 %v11268_v59 }
  0x79   :  { %10039 = vmatprep.mubr.msk.f32.mxu0 %vm11051_vm1, %v12586_v48  ;;  %10042 = vmatprep.subr.mxu1 %v12586_v48 }
  0x7a   :  { %10040 = vmatmul.mubr.f32.vlgmr.msra.gmra.mxu0 %v12586_v48  ;;  %10043 = vmatpush3.msra.mxu1 %v11232_v54 }
  0x7b   :  { %10044 = vmatprep.subr.mxu1 %v12586_v48  ;;  %10046 = vmatprep.mubr.msk.f32.mxu1 %vm11051_vm1, %v12586_v48 }
  0x7c   :  { %10045 = vmatpush3.msra.mxu1 %v11238_v55  ;;  %10049 = vmatprep.subr.mxu0 %v12586_v48 }
  0x7d   :  { %10047 = vmatmul.mubr.f32.vlgmr.msra.gmra.mxu1 %v12586_v48  ;;  %10056 = vmatprep.subr.mxu1 %v12586_v48 }
  0x7e   :  { %10057 = vmatpush3.msra.mxu1 %v11223_v51  ;;  %10060 = vmatprep.mubr.msk.f32.mxu1 %vm11051_vm1, %v12586_v48 }
  0x7f   :  { %10058 = vmatprep.subr.mxu1 %v12586_v48  ;;  %10050 = vmatpush3.msra.mxu0 %v11180_v41 }
  0x80   :  { %10059 = vmatpush3.msra.mxu1 %v11230_v53  ;;  %10051 = vmatprep.subr.mxu0 %v12586_v48 }
  0x81   :  { %10070 = vmatprep.subr.mxu1 %v12586_v48  ;;  %10052 = vmatpush3.msra.mxu0 %v11185_v42 }
  0x82   :  { %10053 = vmatprep.mubr.msk.f32.mxu0 %vm11051_vm1, %v12586_v48  ;;  %10063 = vmatprep.subr.mxu0 %v12586_v48 }
 0x102   :  { %v9909_v0 = vpop.f32.mrf.mxu0 }
 0x103   :  { %v193_v15 = vadd.f32 %v9909_v0, %v9539_v11 }
 0x104   :  { %v182_v1 = vpop.f32.mrf.mxu0 }
 0x105   :  { %v183_v18 = vadd.f32 %v9539_v11, %v182_v1 }
 0x107   :  { %v9920_v2 = vpop.f32.mrf.mxu1 }
 0x108   :  { %v290_v21 = vadd.f32 %v9920_v2, %v193_v15 }
 0x109   :  { %v283_v4 = vpop.f32.mrf.mxu1 }
 0x10a   :  { %v9931_v3 = vpop.f32.mrf.mxu0  ;;  %v284_v24 = vadd.f32 %v283_v4, %v183_v18 }
 0x10b   :  { %v377_v26 = vadd.f32 %v9931_v3, %v290_v21 }
 0x10c   :  { %v369_v5 = vpop.f32.mrf.mxu0 }
 0x10d   :  { %v370_v32 = vadd.f32 %v369_v5, %v284_v24 }
 0x111   :  { %v9942_v6 = vpop.f32.mrf.mxu1 }
 0x112   :  { %v462_v30 = vadd.f32 %v9942_v6, %v377_v26 }
 0x113   :  { %v453_v8 = vpop.f32.mrf.mxu1 }
 0x114   :  { %v9953_v7 = vpop.f32.mrf.mxu0  ;;  %v454_v34 = vadd.f32 %v453_v8, %v370_v32 }
 0x115   :  { %v551_v36 = vadd.f32 %v9953_v7, %v462_v30 }
 0x116   :  { %v544_v9 = vpop.f32.mrf.mxu0 }
 0x117   :  { %v545_v49 = vadd.f32 %v544_v9, %v454_v34 }
 0x11b   :  { %v9964_v10 = vpop.f32.mrf.mxu1 }
 0x11c   :  { %v716_v12 = vpop.f32.mrf.mxu0  ;;  %v11352_v40 = vadd.f32 %v9964_v10, %v551_v36 }
 0x11d   :  { %v625_v13 = vpop.f32.mrf.mxu1 }
 0x11e   :  { %v9971_v14 = vpop.f32.mrf.mxu0  ;;  %v11355_v60 = vadd.f32 %v625_v13, %v545_v49 }
 0x120   :  { %v797_v16 = vpop.f32.mrf.mxu1 }
 0x121   :  { %v798_v17 = vadd.f32 %v797_v16, %v716_v12 }
 0x122   :  { %v873_v19 = vpop.f32.mrf.mxu0  ;;  %v9978_v20 = vpop.f32.mrf.mxu1 }
 0x123   :  { %v874_v22 = vadd.f32 %v873_v19, %v798_v17 }
 0x124   :  { %v9985_v23 = vpop.f32.mrf.mxu0 }
 0x126   :  { %v948_v25 = vpop.f32.mrf.mxu1 }
 0x127   :  { %v949_v27 = vadd.f32 %v948_v25, %v874_v22 }
 0x128   :  { %v1025_v28 = vpop.f32.mrf.mxu0  ;;  %v9992_v29 = vpop.f32.mrf.mxu1 }
 0x129   :  { %v1026_v31 = vadd.f32 %v1025_v28, %v949_v27 }
 0x12a   :  { %v9999_v33 = vpop.f32.mrf.mxu0 }
 0x12c   :  { %v1098_v35 = vpop.f32.mrf.mxu1 }
 0x12d   :  { %v1099_v37 = vadd.f32 %v1098_v35, %v1026_v31 }
 0x12e   :  { %v1254_v38 = vpop.f32.mrf.mxu0  ;;  %v10006_v39 = vpop.f32.mrf.mxu1 }
 0x12f   :  { %v1103_v47 = vrot.slane %v1099_v37, 1  ;;  %v1106_v1 = vadd.f32 %v1099_v37, %v11355_v60 }
 0x130   :  { %v10013_v50 = vpop.f32.mrf.mxu0 }
 0x131   :  { %v1107_v52 = vadd.f32 %v1103_v47, %v11352_v40  ;;  %v9540_v20 = vmul.f32 -1.442695, %v1106_v1 }
 0x132   :  { %v1335_v61 = vpop.f32.mrf.mxu1 }
 0x133   :  { %v1336_v0 = vadd.f32 %v1335_v61, %v1254_v38  ;;  %10679 = vtanh.f32 %v1107_v52  ;;  %v9541_v19 = vmul.f32 -1.442695, %v1107_v52 }
 0x134   :  { %v1411_v2 = vpop.f32.mrf.mxu0  ;;  %v10020_v3 = vpop.f32.mrf.mxu1  ;;  %10681 = vtanh.f32 %v1106_v1 }
 0x135   :  { %v1412_v4 = vadd.f32 %v1411_v2, %v1336_v0  ;;  %10683 = vpow2.f32 %v9541_v19 }
 0x136   :  { %v10027_v5 = vpop.f32.mrf.mxu0  ;;  %10685 = vpow2.f32 %v9540_v20 }
 0x138   :  { %v1486_v6 = vpop.f32.mrf.mxu1 }
 0x139   :  { %v1487_v7 = vadd.f32 %v1486_v6, %v1412_v4 }
 0x13a   :  { %v1563_v8 = vpop.f32.mrf.mxu0  ;;  %v10034_v10 = vpop.f32.mrf.mxu1 }
 0x13b   :  { %v1564_v9 = vadd.f32 %v1563_v8, %v1487_v7 }
 0x13c   :  { %v10041_v11 = vpop.f32.mrf.mxu0 }
 0x13d   :  { %v1636_v12 = vpop.f32.mrf.mxu1  ;;  %v12580_v11 = vmov 0  }
 0x13e   :  { %v1637_v14 = vadd.f32 %v1636_v12, %v1564_v9  ;;  %10661 = vset.pattern.permute.xlu0 %v12580_v11 }
 0x13f   :  { %v10048_v13 = vpop.f32.mrf.mxu1 }
 0x140   :  { %v1641_v15 = vrot.slane %v1637_v14, 1  ;;  %v10680_v16 = vpop.eup %10679  ;;  %v1642_v17 = vrot.slane %v1637_v14, 2  ;;  %v12585_v14 = vmov 7  }
 0x141   :  { %1128 = vrot.lane.b32.xlu1 %v10680_v16, %s11053_s26  ;;  %v10682_v18 = vpop.eup %10681 }
 0x142   :  { %1643 = vrot.lane.b32.xlu0 %v1641_v15, %s11052_s3  ;;  %v10684_v21 = vpop.eup %10683  ;;  %10662 = vset.pattern.permute.xlu1 %v12585_v14 }
 0x143   :  { %v1115_v23 = vadd.f32 1.0, %v10684_v21  ;;  %v10686_v25 = vpop.eup %10685 }
 0x144   :  { %v1114_v27 = vadd.f32 1.0, %v10686_v25  ;;  %v11391_v25 = vld [vmem:[%s12570_s1] sm:$0x3] }
 0x145   :  { %1126 = vrot.lane.b32.xlu1 %v10682_v18, %s11053_s26  ;;  %vm1156_vm3 = vcmp.gt.f32.partialorder %v11391_v25, 0.0 }
 0x146   :  { %1645 = vrot.lane.b32.xlu0 %v1642_v17, %s11052_s3 }
 0x1b3   :  { %v1129_v29 = vpop.permute.xlu1 %1128 }
 0x1b4   :  { %v1644_v22 = vpop.permute.xlu0 %1643 }
 0x1b5   :  { %v1649_v24 = vadd.f32 %v1644_v22, %v11355_v60 }
 0x1b7   :  { %10687 = vtanh.f32 %v1649_v24  ;;  %v1127_v34 = vpop.permute.xlu1 %1126  ;;  %v9542_v37 = vmul.f32 -1.442695, %v1649_v24 }
 0x1b8   :  { %v1646_v26 = vpop.permute.xlu0 %1645  ;;  %10689 = vrcp.f32 %v1115_v23 }
 0x1b9   :  { %v1650_v28 = vadd.f32 %v1646_v26, %v11352_v40 }
 0x1bb   :  { %10691 = vtanh.f32 %v1650_v28  ;;  %v9543_v38 = vmul.f32 -1.442695, %v1650_v28  ;;  %v11398_v28 = vsel %vm1156_vm3, 1, %v12580_v11 }
 0x1bc   :  { %10693 = vrcp.f32 %v1114_v27 }
 0x1bd   :  { %10695 = vpow2.f32 %v9542_v37 }
 0x1be   :  { %10697 = vpow2.f32 %v9543_v38 }
 0x1c4   :  { %v10688_v30 = vpop.eup %10687 }
 0x1c5   :  { %1669 = vrot.lane.b32.xlu0 %v10688_v30, %s11053_s26  ;;  %v11365_v31 = vpop.eup %10689 }
 0x1c6   :  { %v1133_v32 = vmul.f32 %v11365_v31, %v1129_v29  ;;  %v1123_v1 = vmul.f32 0.0, %v11365_v31 }
 0x1c8   :  { %v10692_v33 = vpop.eup %10691 }
 0x1c9   :  { %1138 = vrot.lane.b32.xlu0 %v1133_v32, %s11054_s27  ;;  %1671 = vrot.lane.b32.xlu1 %v10692_v33, %s11053_s26  ;;  %v11370_v35 = vpop.eup %10693 }
 0x1ca   :  { %v1132_v36 = vmul.f32 %v11370_v35, %v1127_v34  ;;  %v10696_v39 = vpop.eup %10695  ;;  %v1122_v7 = vmul.f32 0.0, %v11370_v35 }
 0x1cb   :  { %v1657_v47 = vadd.f32 1.0, %v10696_v39  ;;  %v10698_v49 = vpop.eup %10697 }
 0x1cc   :  { %v1658_v50 = vadd.f32 1.0, %v10698_v49 }
 0x1cd   :  { %1136 = vrot.lane.b32.xlu1 %v1132_v36, %s11054_s27  ;;  %10699 = vrcp.f32 %v1657_v47 }
 0x1ce   :  { %10701 = vrcp.f32 %v1658_v50 }
 0x1da   :  { %v10700_v52 = vpop.eup %10699 }
 0x1db   :  { %v10702_v2 = vpop.eup %10701  ;;  %v1665_v16 = vmul.f32 0.0, %v10700_v52 }
 0x1dc   :  { %v1666_v19 = vmul.f32 0.0, %v10702_v2 }
 0x237   :  { %v1670_v61 = vpop.permute.xlu0 %1669 }
 0x238   :  { %v1675_v0 = vmul.f32 %v10700_v52, %v1670_v61 }
 0x23a   :  { %1679 = vrot.lane.b32.xlu0 %v1675_v0, %s11054_s27 }
 0x23b   :  { %v1139_v3 = vpop.permute.xlu0 %1138  ;;  %v1672_v4 = vpop.permute.xlu1 %1671 }
 0x23c   :  { %v1143_v5 = vadd.f32 %v1139_v3, %v1123_v1  ;;  %v1676_v6 = vmul.f32 %v10702_v2, %v1672_v4 }
 0x23e   :  { %10703 = vtanh.f32 %v1143_v5  ;;  %1681 = vrot.lane.b32.xlu1 %v1676_v6, %s11054_s27  ;;  %v1173_v10 = vrot.slane %v1143_v5, 7 }
 0x23f   :  { %v1137_v8 = vpop.permute.xlu1 %1136 }
 0x240   :  { %v1142_v9 = vadd.f32 %v1137_v8, %v1122_v7 }
 0x242   :  { %10705 = vtanh.f32 %v1142_v9  ;;  %v11380_v12 = vsel %vm1165_vm2, %v1173_v10, %v1142_v9 }
 0x24b   :  { %v10704_v13 = vpop.eup %10703 }
 0x24c   :  { %1150 = vrot.lane.b32.xlu0 %v10704_v13, %s11057_s28 }
 0x24f   :  { %v10706_v15 = vpop.eup %10705 }
 0x250   :  { %1148 = vrot.lane.b32.xlu1 %v10706_v15, %s11057_s28 }
 0x2ac   :  { %v1680_v17 = vpop.permute.xlu0 %1679 }
 0x2ad   :  { %v1685_v18 = vadd.f32 %v1680_v17, %v1665_v16 }
 0x2af   :  { %10707 = vtanh.f32 %v1685_v18  ;;  %v1714_v22 = vrot.slane %v1685_v18, 7 }
 0x2b0   :  { %v1682_v20 = vpop.permute.xlu1 %1681 }
 0x2b1   :  { %v1686_v21 = vadd.f32 %v1682_v20, %v1666_v19 }
 0x2b3   :  { %10709 = vtanh.f32 %v1686_v21  ;;  %v1715_v23 = vrot.slane %v1686_v21, 6 }
 0x2b5   :  { %v11386_v24 = vsel %vm1165_vm2, %v1715_v23, %v1714_v22 }
 0x2bc   :  { %v10708_v26 = vpop.eup %10707 }
 0x2bd   :  { %1691 = vrot.lane.b32.xlu0 %v10708_v26, %s11057_s28 }
 0x2be   :  { %v1151_v27 = vpop.permute.xlu0 %1150 }
 0x2bf   :  { %v1155_v29 = vmul.f32 %v11365_v31, %v1151_v27 }
 0x2c0   :  { %v10710_v30 = vpop.eup %10709 }
 0x2c1   :  { %1159 = vperm.xlu0 %10661, %v11398_v28   ;;  %1693 = vrot.lane.b32.xlu1 %v10710_v30, %s11057_s28  ;;  %v1164_v33 = vrot.slane %v1155_v29, 7 }
 0x2c2   :  { %v1149_v32 = vpop.permute.xlu1 %1148 }
 0x2c3   :  { %v1154_v34 = vmul.f32 %v11370_v35, %v1149_v32 }
 0x2c5   :  { %v1166_v36 = vsel %vm1165_vm2, %v1164_v33, %v1154_v34 }
 0x2c6   :  { %1167 = vrot.lane.b32.xlu1 %v1166_v36, %s11058_s9 }
 0x2ca   :  { %1700 = vperm.xlu1 %10662, %v11398_v28  }
 0x32f   :  { %v1692_v37 = vpop.permute.xlu0 %1691 }
 0x330   :  { %v1697_v38 = vmul.f32 %v10700_v52, %v1692_v37 }
 0x332   :  { %v1705_v47 = vrot.slane %v1697_v38, 7 }
 0x333   :  { %v1694_v39 = vpop.permute.xlu1 %1693 }
 0x334   :  { %v1698_v31 = vmul.f32 %v10702_v2, %v1694_v39 }
 0x336   :  { %v1706_v49 = vrot.slane %v1698_v31, 6 }
 0x338   :  { %v1707_v50 = vsel %vm1165_vm2, %v1706_v49, %v1705_v47  ;;  %v1168_v35 = vpop.permute.xlu1 %1167 }
 0x339   :  { %1708 = vrot.lane.b32.xlu0 %v1707_v50, %s11054_s27 }
 0x33c   :  { %v11409_v61 = vpop.permute.xlu0 %1159 }
 0x33d   :  { %vm1161_vm5 = vcmp.eq.s32.totalorder %v11409_v61, 1 }
 0x33e   :  { %v11414_v0 = vsel %vm1161_vm5, %v1168_v35, 0.0 }
 0x33f   :  { %v1751_v52 = vsel %vm639_vm4, %v11414_v0, 0 }
 0x340   :  { %v1820_v1 = vand.u32 4294901760, %v1751_v52 }
 0x342   :  { %v1821_v2 = vsub.f32 %v1751_v52, %v1820_v1  ;;  %10061 = vmatmul.mubr.f32.vlgmr.msra.gmra.mxu1 %v1820_v1 }
 0x343   :  { %10071 = vmatpush3.msra.mxu1 %v11180_v41  ;;  %10074 = vmatprep.mubr.msk.f32.mxu1 %vm11051_vm1, %v12586_v48 }
 0x344   :  { %10072 = vmatprep.subr.mxu1 %v12586_v48  ;;  %v1822_v3 = vand.u32 4294901760, %v1821_v2 }
 0x345   :  { %10073 = vmatpush3.msra.mxu1 %v11185_v42  ;;  %v11454_v6 = vpop.permute.xlu1 %1700 }
 0x346   :  { %10075 = vmatmul.mubr.f32.vlgmr.msra.gmra.mxu1 %v1822_v3  ;;  %10084 = vmatprep.subr.mxu1 %v12586_v48  ;;  %v1823_v4 = vsub.f32 %v1821_v2, %v1822_v3  ;;  %vm1702_vm6 = vcmp.eq.s32.totalorder %v11454_v6, 1 }
 0x347   :  { %10085 = vmatpush3.msra.mxu1 %v11180_v41  ;;  %10088 = vmatprep.mubr.msk.f32.mxu1 %vm11051_vm1, %v12586_v48 }
 0x348   :  { %10086 = vmatprep.subr.mxu1 %v12586_v48  ;;  %v1824_v5 = vand.u32 4294901760, %v1823_v4 }
 0x349   :  { %10087 = vmatpush3.msra.mxu1 %v11185_v42 }
 0x34a   :  { %10054 = vmatmul.mubr.f32.vlgmr.msra.gmra.mxu0 %v1824_v5  ;;  %10089 = vmatmul.mubr.f32.vlgmr.msra.gmra.mxu1 %v1820_v1 }
 0x34b   :  { %10064 = vmatpush3.msra.mxu0 %v11190_v43  ;;  %10067 = vmatprep.mubr.msk.f32.mxu0 %vm11051_vm1, %v12586_v48 }
 0x34c   :  { %10065 = vmatprep.subr.mxu0 %v12586_v48  ;;  %10098 = vmatprep.subr.mxu1 %v12586_v48 }
 0x34d   :  { %10066 = vmatpush3.msra.mxu0 %v11195_v44  ;;  %10099 = vmatpush3.msra.mxu1 %v11288_v62 }
 0x34e   :  { %10068 = vmatmul.mubr.f32.vlgmr.msra.gmra.mxu0 %v1821_v2  ;;  %10077 = vmatprep.subr.mxu0 %v12586_v48 }
 0x34f   :  { %10078 = vmatpush3.msra.mxu0 %v11200_v45  ;;  %10081 = vmatprep.mubr.msk.f32.mxu0 %vm11051_vm1, %v12586_v48 }
 0x350   :  { %10079 = vmatprep.subr.mxu0 %v12586_v48  ;;  %10100 = vmatprep.subr.mxu1 %v12586_v48 }
 0x351   :  { %10080 = vmatpush3.msra.mxu0 %v11205_v46  ;;  %10101 = vmatpush3.msra.mxu1 %v11295_v63 }
 0x352   :  { %10082 = vmatmul.mubr.f32.vlgmr.msra.gmra.mxu0 %v1820_v1  ;;  %10102 = vmatprep.mubr.msk.f32.mxu1 %vm11051_vm1, %v12586_v48 }
 0x353   :  { %10112 = vmatprep.subr.mxu1 %v12586_v48  ;;  %10091 = vmatprep.subr.mxu0 %v12586_v48 }
 0x354   :  { %10092 = vmatpush3.msra.mxu0 %v11232_v54  ;;  %10095 = vmatprep.mubr.msk.f32.mxu0 %vm11051_vm1, %v12586_v48 }
 0x355   :  { %10093 = vmatprep.subr.mxu0 %v12586_v48 }
 0x356   :  { %10094 = vmatpush3.msra.mxu0 %v11238_v55 }
 0x357   :  { %10105 = vmatprep.subr.mxu0 %v12586_v48 }
 0x3ab   :  { %v1709_v7 = vpop.permute.xlu0 %1708 }
 0x3ac   :  { %v11459_v8 = vsel %vm1702_vm6, %v1709_v7, 0.0 }
 0x3ad   :  { %v2295_v10 = vsel %vm639_vm4, %v11459_v8, 0 }
 0x3ae   :  { %v2364_v9 = vand.u32 4294901760, %v2295_v10 }
 0x3b0   :  { %v2365_v13 = vsub.f32 %v2295_v10, %v2364_v9  ;;  %10103 = vmatmul.mubr.f32.vlgmr.msra.gmra.mxu1 %v2364_v9 }
 0x3b1   :  { %10113 = vmatpush3.msra.mxu1 %v11232_v54  ;;  %10116 = vmatprep.mubr.msk.f32.mxu1 %vm11051_vm1, %v12586_v48 }
 0x3b2   :  { %10114 = vmatprep.subr.mxu1 %v12586_v48  ;;  %v2366_v15 = vand.u32 4294901760, %v2365_v13 }
 0x3b3   :  { %10115 = vmatpush3.msra.mxu1 %v11238_v55 }
 0x3b4   :  { %10117 = vmatmul.mubr.f32.vlgmr.msra.gmra.mxu1 %v2366_v15  ;;  %10126 = vmatprep.subr.mxu1 %v12586_v48  ;;  %v2367_v16 = vsub.f32 %v2365_v13, %v2366_v15 }
 0x3b5   :  { %10127 = vmatpush3.msra.mxu1 %v11232_v54  ;;  %10130 = vmatprep.mubr.msk.f32.mxu1 %vm11051_vm1, %v12586_v48 }
 0x3b6   :  { %10128 = vmatprep.subr.mxu1 %v12586_v48  ;;  %v2368_v17 = vand.u32 4294901760, %v2367_v16 }
 0x3b7   :  { %10129 = vmatpush3.msra.mxu1 %v11238_v55 }
 0x3b8   :  { %10096 = vmatmul.mubr.f32.vlgmr.msra.gmra.mxu0 %v2368_v17  ;;  %10131 = vmatmul.mubr.f32.vlgmr.msra.gmra.mxu1 %v2364_v9 }
 0x3b9   :  { %10106 = vmatpush3.msra.mxu0 %v11245_v56  ;;  %10109 = vmatprep.mubr.msk.f32.mxu0 %vm11051_vm1, %v12586_v48 }
 0x3ba   :  { %10107 = vmatprep.subr.mxu0 %v12586_v48  ;;  %10140 = vmatprep.subr.mxu1 %v12586_v48 }
 0x3bb   :  { %10108 = vmatpush3.msra.mxu0 %v11253_v57  ;;  %10141 = vmatpush3.msra.mxu1 %v11223_v51 }
 0x3bc   :  { %10110 = vmatmul.mubr.f32.vlgmr.msra.gmra.mxu0 %v2365_v13  ;;  %10119 = vmatprep.subr.mxu0 %v12586_v48 }
 0x3bd   :  { %10120 = vmatpush3.msra.mxu0 %v11261_v58  ;;  %10123 = vmatprep.mubr.msk.f32.mxu0 %vm11051_vm1, %v12586_v48 }
 0x3be   :  { %10121 = vmatprep.subr.mxu0 %v12586_v48  ;;  %10142 = vmatprep.subr.mxu1 %v12586_v48 }
 0x3bf   :  { %10122 = vmatpush3.msra.mxu0 %v11268_v59  ;;  %10143 = vmatpush3.msra.mxu1 %v11230_v53 }
 0x3c0   :  { %10124 = vmatmul.mubr.f32.vlgmr.msra.gmra.mxu0 %v2364_v9  ;;  %10144 = vmatprep.mubr.msk.f32.mxu1 %vm11051_vm1, %v12586_v48 }
 0x3c1   :  { %10154 = vmatprep.subr.mxu1 %v12586_v48  ;;  %10133 = vmatprep.subr.mxu0 %v12586_v48 }
 0x3c2   :  { %10134 = vmatpush3.msra.mxu0 %v11180_v41  ;;  %10137 = vmatprep.mubr.msk.f32.mxu0 %vm11051_vm1, %v12586_v48 }
 0x3c3   :  { %10135 = vmatprep.subr.mxu0 %v12586_v48 }
 0x3c4   :  { %10136 = vmatpush3.msra.mxu0 %v11185_v42 }
 0x3c5   :  { %10147 = vmatprep.subr.mxu0 %v12586_v48 }
 0x402   :  { %v1907_v18 = vpop.f32.mrf.mxu1 }
 0x404   :  { %v10062_v19 = vpop.f32.mrf.mxu1 }
 0x406   :  { %v2058_v20 = vpop.f32.mrf.mxu1 }
 0x408   :  { %v10076_v21 = vpop.f32.mrf.mxu1 }
 0x40a   :  { %v1826_v22 = vpop.f32.mrf.mxu0  ;;  %v2208_v23 = vpop.f32.mrf.mxu1 }
 0x40b   :  { %v1908_v26 = vadd.f32 %v1907_v18, %v1826_v22 }
 0x40c   :  { %v10055_v27 = vpop.f32.mrf.mxu0  ;;  %v10090_v29 = vpop.f32.mrf.mxu1 }
 0x40e   :  { %v1983_v30 = vpop.f32.mrf.mxu0 }
 0x40f   :  { %v1984_v32 = vadd.f32 %v1983_v30, %v1908_v26 }
 0x410   :  { %v10069_v33 = vpop.f32.mrf.mxu0 }
 0x411   :  { %v2059_v34 = vadd.f32 %v2058_v20, %v1984_v32 }
 0x412   :  { %v2135_v36 = vpop.f32.mrf.mxu0 }
 0x413   :  { %v2136_v37 = vadd.f32 %v2135_v36, %v2059_v34 }
 0x414   :  { %v10083_v38 = vpop.f32.mrf.mxu0 }
 0x415   :  { %v2209_v39 = vadd.f32 %v2208_v23, %v2136_v37 }
 0x417   :  { %v2213_v50 = vrot.slane %v2209_v39, 7  ;;  %v2217_v10 = vadd.f32 %v2209_v39, %v11352_v40 }
 0x419   :  { %v2216_v2 = vadd.f32 %v2213_v50, %v11355_v60  ;;  %v9546_v26 = vmul.f32 -1.442695, %v2217_v10 }
 0x41b   :  { %10711 = vtanh.f32 %v2216_v2  ;;  %v9545_v27 = vmul.f32 -1.442695, %v2216_v2 }
 0x41c   :  { %10713 = vtanh.f32 %v2217_v10 }
 0x41d   :  { %10715 = vpow2.f32 %v9546_v26 }
 0x41e   :  { %10717 = vpow2.f32 %v9545_v27 }
 0x428   :  { %v10712_v22 = vpop.eup %10711 }
 0x429   :  { %v10714_v23 = vpop.eup %10713 }
 0x42a   :  { %v10716_v34 = vpop.eup %10715 }
 0x42b   :  { %v10718_v36 = vpop.eup %10717 }
 0x42c   :  { %v2224_v37 = vadd.f32 1.0, %v10718_v36 }
 0x470   :  { %v2451_v31 = vpop.f32.mrf.mxu1 }
 0x472   :  { %v10104_v47 = vpop.f32.mrf.mxu1 }
 0x474   :  { %v2602_v49 = vpop.f32.mrf.mxu1 }
 0x476   :  { %v10118_v35 = vpop.f32.mrf.mxu1 }
 0x478   :  { %v2370_v52 = vpop.f32.mrf.mxu0  ;;  %v2752_v1 = vpop.f32.mrf.mxu1 }
 0x479   :  { %v2452_v5 = vadd.f32 %v2451_v31, %v2370_v52 }
 0x47a   :  { %v10097_v3 = vpop.f32.mrf.mxu0  ;;  %v10132_v4 = vpop.f32.mrf.mxu1 }
 0x47c   :  { %v2527_v7 = vpop.f32.mrf.mxu0 }
 0x47d   :  { %v2528_v9 = vadd.f32 %v2527_v7, %v2452_v5 }
 0x47e   :  { %v10111_v13 = vpop.f32.mrf.mxu0 }
 0x47f   :  { %v2603_v15 = vadd.f32 %v2602_v49, %v2528_v9 }
 0x480   :  { %v2679_v16 = vpop.f32.mrf.mxu0 }
 0x481   :  { %v2680_v17 = vadd.f32 %v2679_v16, %v2603_v15 }
 0x482   :  { %v10125_v18 = vpop.f32.mrf.mxu0 }
 0x483   :  { %v2753_v19 = vadd.f32 %v2752_v1, %v2680_v17 }
 0x485   :  { %v2758_v20 = vrot.slane %v2753_v19, 3  ;;  %v2757_v21 = vrot.slane %v2753_v19, 2 }
 0x487   :  { %2761 = vrot.lane.b32.xlu0 %v2758_v20, %s11052_s3  ;;  %2759 = vrot.lane.b32.xlu1 %v2757_v21, %s11052_s3 }
 0x48b   :  { %2244 = vrot.lane.b32.xlu0 %v10712_v22, %s11053_s26  ;;  %1175 = vrot.lane.b32.xlu1 %v11380_v12, %s11059_s10  ;;  %v2225_v12 = vadd.f32 1.0, %v10716_v34 }
 0x48f   :  { %1717 = vrot.lane.b32.xlu0 %v11386_v24, %s11060_s11  ;;  %2246 = vrot.lane.b32.xlu1 %v10714_v23, %s11053_s26 }
 0x4f9   :  { %v2762_v29 = vpop.permute.xlu0 %2761  ;;  %v2760_v30 = vpop.permute.xlu1 %2759 }
 0x4fa   :  { %v2766_v32 = vadd.f32 %v2762_v29, %v11352_v40  ;;  %v2765_v33 = vadd.f32 %v2760_v30, %v11355_v60 }
 0x4fc   :  { %10719 = vtanh.f32 %v2766_v32  ;;  %v9548_v10 = vmul.f32 -1.442695, %v2766_v32  ;;  %v9547_v9 = vmul.f32 -1.442695, %v2765_v33 }
 0x4fd   :  { %10721 = vtanh.f32 %v2765_v33  ;;  %v1176_v24 = vpop.permute.xlu1 %1175  ;;  %v2245_v38 = vpop.permute.xlu0 %2244  ;;  %v11061_v33 = vmov 1  }
 0x4fe   :  { %10723 = vrcp.f32 %v2225_v12  ;;  %v11514_v47 = vsel %vm1161_vm5, %v1176_v24, 0.0  ;;  %10663 = vset.pattern.permute.xlu1 %v11061_v33  ;;  %10671 = vset.pattern.permute.xlu0 %v11061_v33 }
 0x4ff   :  { %10725 = vrcp.f32 %v2224_v37  ;;  %v2233_v50 = vrot.slane %v11514_v47, 7 }
 0x500   :  { %10727 = vpow2.f32 %v9548_v10 }
 0x501   :  { %v2247_v49 = vpop.permute.xlu1 %2246  ;;  %v1718_v35 = vpop.permute.xlu0 %1717  ;;  %10729 = vpow2.f32 %v9547_v9 }
 0x502   :  { %v11529_v4 = vsel %vm1702_vm6, %v1718_v35, 0.0 }
 0x503   :  { %v2783_v5 = vrot.slane %v11529_v4, 3  ;;  %v2782_v7 = vrot.slane %v11529_v4, 2 }
 0x509   :  { %v10720_v39 = vpop.eup %10719 }
 0x50a   :  { %v10722_v31 = vpop.eup %10721  ;;  %2796 = vrot.lane.b32.xlu0 %v10720_v39, %s11053_s26 }
 0x50b   :  { %2794 = vrot.lane.b32.xlu1 %v10722_v31, %s11053_s26  ;;  %v11520_v52 = vpop.eup %10723 }
 0x50c   :  { %v11523_v1 = vpop.eup %10725  ;;  %v2251_v2 = vmul.f32 %v11520_v52, %v2247_v49 }
 0x50d   :  { %v2250_v3 = vmul.f32 %v11523_v1, %v2245_v38  ;;  %v10728_v13 = vpop.eup %10727 }
 0x50e   :  { %2236 = vrot.lane.b32.xlu0 %v11514_v47, %s11054_s27  ;;  %v10730_v15 = vpop.eup %10729  ;;  %v2774_v16 = vadd.f32 1.0, %v10728_v13 }
 0x50f   :  { %2234 = vrot.lane.b32.xlu1 %v2233_v50, %s11054_s27  ;;  %v2773_v17 = vadd.f32 1.0, %v10730_v15 }
 0x510   :  { %10731 = vrcp.f32 %v2774_v16 }
 0x511   :  { %10733 = vrcp.f32 %v2773_v17 }
 0x512   :  { %2256 = vrot.lane.b32.xlu0 %v2251_v2, %s11054_s27 }
 0x513   :  { %2254 = vrot.lane.b32.xlu1 %v2250_v3, %s11054_s27 }
 0x516   :  { %2786 = vrot.lane.b32.xlu0 %v2783_v5, %s11058_s9 }
 0x517   :  { %2784 = vrot.lane.b32.xlu1 %v2782_v7, %s11058_s9 }
 0x51d   :  { %v10732_v18 = vpop.eup %10731 }
 0x51e   :  { %v10734_v20 = vpop.eup %10733 }
 0x57c   :  { %v2797_v19 = vpop.permute.xlu0 %2796 }
 0x57d   :  { %v2801_v21 = vmul.f32 %v10732_v18, %v2797_v19  ;;  %v2795_v22 = vpop.permute.xlu1 %2794 }
 0x57e   :  { %v2800_v23 = vmul.f32 %v10734_v20, %v2795_v22 }
 0x57f   :  { %2806 = vrot.lane.b32.xlu0 %v2801_v21, %s11054_s27 }
 0x580   :  { %2804 = vrot.lane.b32.xlu1 %v2800_v23, %s11054_s27  ;;  %v2237_v26 = vpop.permute.xlu0 %2236 }
 0x581   :  { %v2235_v27 = vpop.permute.xlu1 %2234  ;;  %v2241_v29 = vmul.f32 %v11520_v52, %v2237_v26  ;;  %v12584_v26 = vmov 6  }
 0x582   :  { %v2240_v30 = vmul.f32 %v11523_v1, %v2235_v27 }
 0x584   :  { %v2257_v32 = vpop.permute.xlu0 %2256 }
 0x585   :  { %v2261_v34 = vadd.f32 %v2257_v32, %v2241_v29  ;;  %v2255_v36 = vpop.permute.xlu1 %2254 }
 0x586   :  { %v2260_v12 = vadd.f32 %v2255_v36, %v2240_v30 }
 0x587   :  { %10735 = vtanh.f32 %v2261_v34 }
 0x588   :  { %10737 = vtanh.f32 %v2260_v12  ;;  %v2288_v37 = vrot.slane %v2260_v12, 1  ;;  %v2787_v31 = vpop.permute.xlu0 %2786 }
 0x589   :  { %v2785_v49 = vpop.permute.xlu1 %2784  ;;  %v2791_v50 = vmul.f32 %v10732_v18, %v2787_v31 }
 0x58a   :  { %v11542_v24 = vsel %vm1165_vm2, %v2261_v34, %v2288_v37  ;;  %v2790_v35 = vmul.f32 %v10734_v20, %v2785_v49 }
 0x594   :  { %v10736_v38 = vpop.eup %10735 }
 0x595   :  { %v10738_v39 = vpop.eup %10737  ;;  %2268 = vrot.lane.b32.xlu0 %v10736_v38, %s11057_s28 }
 0x596   :  { %2266 = vrot.lane.b32.xlu1 %v10738_v39, %s11057_s28 }
 0x5f1   :  { %v2807_v2 = vpop.permute.xlu0 %2806 }
 0x5f2   :  { %v2811_v3 = vadd.f32 %v2807_v2, %v2791_v50  ;;  %v2805_v5 = vpop.permute.xlu1 %2804 }
 0x5f3   :  { %v2810_v7 = vadd.f32 %v2805_v5, %v2790_v35 }
 0x5f4   :  { %10739 = vtanh.f32 %v2811_v3  ;;  %v2840_v10 = vrot.slane %v2811_v3, 5 }
 0x5f5   :  { %10741 = vtanh.f32 %v2810_v7  ;;  %v2839_v9 = vrot.slane %v2810_v7, 6 }
 0x5f7   :  { %v11547_v13 = vsel %vm1165_vm2, %v2840_v10, %v2839_v9 }
 0x601   :  { %v10740_v15 = vpop.eup %10739 }
 0x602   :  { %v10742_v16 = vpop.eup %10741  ;;  %2818 = vrot.lane.b32.xlu0 %v10740_v15, %s11057_s28 }
 0x603   :  { %2816 = vrot.lane.b32.xlu1 %v10742_v16, %s11057_s28 }
 0x607   :  { %2275 = vperm.xlu1 %10663, %v11398_v28   ;;  %v2269_v17 = vpop.permute.xlu0 %2268 }
 0x608   :  { %v2267_v19 = vpop.permute.xlu1 %2266  ;;  %v2273_v22 = vmul.f32 %v11520_v52, %v2269_v17 }
 0x609   :  { %v2272_v21 = vmul.f32 %v11523_v1, %v2267_v19 }
 0x60b   :  { %v2280_v23 = vrot.slane %v2272_v21, 1  ;;  %10664 = vset.pattern.permute.xlu1 %v12584_v26 }
 0x60c   :  { %2825 = vperm.xlu1 %10664, %v11398_v28  }
 0x60d   :  { %v2281_v27 = vsel %vm1165_vm2, %v2273_v22, %v2280_v23 }
 0x60e   :  { %2282 = vrot.lane.b32.xlu0 %v2281_v27, %s11058_s9 }
 0x674   :  { %v2819_v29 = vpop.permute.xlu0 %2818 }
 0x675   :  { %v2823_v30 = vmul.f32 %v10732_v18, %v2819_v29  ;;  %v2817_v32 = vpop.permute.xlu1 %2816 }
 0x676   :  { %v2822_v33 = vmul.f32 %v10734_v20, %v2817_v32 }
 0x677   :  { %v2831_v34 = vrot.slane %v2823_v30, 5 }
 0x678   :  { %v2830_v36 = vrot.slane %v2822_v33, 6 }
 0x67a   :  { %v2832_v1 = vsel %vm1165_vm2, %v2831_v34, %v2830_v36 }
 0x67b   :  { %2833 = vrot.lane.b32.xlu0 %v2832_v1, %s11054_s27 }
 0x680   :  { %v2283_v12 = vpop.permute.xlu0 %2282 }
 0x682   :  { %v11560_v52 = vpop.permute.xlu1 %2275 }
 0x683   :  { %vm2277_vm7 = vcmp.eq.s32.totalorder %v11560_v52, 1 }
 0x684   :  { %v11566_v37 = vsel %vm2277_vm7, %v2283_v12, %v11414_v0 }
 0x685   :  { %v2865_v18 = vsel %vm639_vm4, %v11566_v37, 0 }
 0x686   :  { %v2934_v20 = vand.u32 4294901760, %v2865_v18 }
 0x687   :  { %v11606_v50 = vpop.permute.xlu1 %2825 }
 0x688   :  { %10145 = vmatmul.mubr.f32.vlgmr.msra.gmra.mxu1 %v2934_v20  ;;  %v2935_v38 = vsub.f32 %v2865_v18, %v2934_v20  ;;  %vm2827_vm8 = vcmp.eq.s32.totalorder %v11606_v50, 1 }
 0x689   :  { %10155 = vmatpush3.msra.mxu1 %v11180_v41  ;;  %10158 = vmatprep.mubr.msk.f32.mxu1 %vm11051_vm1, %v12586_v48 }
 0x68a   :  { %10156 = vmatprep.subr.mxu1 %v12586_v48  ;;  %v2936_v39 = vand.u32 4294901760, %v2935_v38 }
 0x68b   :  { %10157 = vmatpush3.msra.mxu1 %v11185_v42 }
 0x68c   :  { %10159 = vmatmul.mubr.f32.vlgmr.msra.gmra.mxu1 %v2936_v39  ;;  %10168 = vmatprep.subr.mxu1 %v12586_v48  ;;  %v2937_v31 = vsub.f32 %v2935_v38, %v2936_v39 }
 0x68d   :  { %10169 = vmatpush3.msra.mxu1 %v11180_v41  ;;  %10172 = vmatprep.mubr.msk.f32.mxu1 %vm11051_vm1, %v12586_v48 }
 0x68e   :  { %10170 = vmatprep.subr.mxu1 %v12586_v48  ;;  %v2938_v49 = vand.u32 4294901760, %v2937_v31 }
 0x68f   :  { %10171 = vmatpush3.msra.mxu1 %v11185_v42 }
 0x690   :  { %10138 = vmatmul.mubr.f32.vlgmr.msra.gmra.mxu0 %v2938_v49  ;;  %10173 = vmatmul.mubr.f32.vlgmr.msra.gmra.mxu1 %v2934_v20 }
 0x691   :  { %10148 = vmatpush3.msra.mxu0 %v11190_v43  ;;  %10151 = vmatprep.mubr.msk.f32.mxu0 %vm11051_vm1, %v12586_v48 }
 0x692   :  { %10149 = vmatprep.subr.mxu0 %v12586_v48  ;;  %10182 = vmatprep.subr.mxu1 %v12586_v48 }
 0x693   :  { %10150 = vmatpush3.msra.mxu0 %v11195_v44  ;;  %10183 = vmatpush3.msra.mxu1 %v11288_v62 }
 0x694   :  { %10152 = vmatmul.mubr.f32.vlgmr.msra.gmra.mxu0 %v2935_v38  ;;  %10161 = vmatprep.subr.mxu0 %v12586_v48 }
 0x695   :  { %10162 = vmatpush3.msra.mxu0 %v11200_v45  ;;  %10165 = vmatprep.mubr.msk.f32.mxu0 %vm11051_vm1, %v12586_v48 }
 0x696   :  { %10163 = vmatprep.subr.mxu0 %v12586_v48  ;;  %10184 = vmatprep.subr.mxu1 %v12586_v48 }
 0x697   :  { %10164 = vmatpush3.msra.mxu0 %v11205_v46  ;;  %10185 = vmatpush3.msra.mxu1 %v11295_v63 }
 0x698   :  { %10166 = vmatmul.mubr.f32.vlgmr.msra.gmra.mxu0 %v2934_v20  ;;  %10186 = vmatprep.mubr.msk.f32.mxu1 %vm11051_vm1, %v12586_v48 }
 0x699   :  { %10196 = vmatprep.subr.mxu1 %v12586_v48  ;;  %10175 = vmatprep.subr.mxu0 %v12586_v48 }
 0x69a   :  { %10176 = vmatpush3.msra.mxu0 %v11232_v54  ;;  %10179 = vmatprep.mubr.msk.f32.mxu0 %vm11051_vm1, %v12586_v48 }
 0x69b   :  { %10177 = vmatprep.subr.mxu0 %v12586_v48 }
 0x69c   :  { %10178 = vmatpush3.msra.mxu0 %v11238_v55 }
 0x69d   :  { %10189 = vmatprep.subr.mxu0 %v12586_v48 }
 0x6ed   :  { %v2834_v35 = vpop.permute.xlu0 %2833 }
 0x6ee   :  { %v11612_v2 = vsel %vm2827_vm8, %v2834_v35, %v11459_v8 }
 0x6ef   :  { %v3413_v3 = vsel %vm639_vm4, %v11612_v2, 0 }
 0x6f0   :  { %v3482_v5 = vand.u32 4294901760, %v3413_v3 }
 0x6f2   :  { %v3483_v7 = vsub.f32 %v3413_v3, %v3482_v5  ;;  %10187 = vmatmul.mubr.f32.vlgmr.msra.gmra.mxu1 %v3482_v5 }
 0x6f3   :  { %10197 = vmatpush3.msra.mxu1 %v11232_v54  ;;  %10200 = vmatprep.mubr.msk.f32.mxu1 %vm11051_vm1, %v12586_v48 }
 0x6f4   :  { %10198 = vmatprep.subr.mxu1 %v12586_v48  ;;  %v3484_v10 = vand.u32 4294901760, %v3483_v7 }
 0x6f5   :  { %10199 = vmatpush3.msra.mxu1 %v11238_v55 }
 0x6f6   :  { %10201 = vmatmul.mubr.f32.vlgmr.msra.gmra.mxu1 %v3484_v10  ;;  %10210 = vmatprep.subr.mxu1 %v12586_v48  ;;  %v3485_v9 = vsub.f32 %v3483_v7, %v3484_v10 }
 0x6f7   :  { %10211 = vmatpush3.msra.mxu1 %v11232_v54  ;;  %10214 = vmatprep.mubr.msk.f32.mxu1 %vm11051_vm1, %v12586_v48 }
 0x6f8   :  { %10212 = vmatprep.subr.mxu1 %v12586_v48  ;;  %v3486_v15 = vand.u32 4294901760, %v3485_v9 }
 0x6f9   :  { %10213 = vmatpush3.msra.mxu1 %v11238_v55 }
 0x6fa   :  { %10180 = vmatmul.mubr.f32.vlgmr.msra.gmra.mxu0 %v3486_v15  ;;  %10215 = vmatmul.mubr.f32.vlgmr.msra.gmra.mxu1 %v3482_v5 }
 0x6fb   :  { %10190 = vmatpush3.msra.mxu0 %v11245_v56  ;;  %10193 = vmatprep.mubr.msk.f32.mxu0 %vm11051_vm1, %v12586_v48 }
 0x6fc   :  { %10191 = vmatprep.subr.mxu0 %v12586_v48  ;;  %10224 = vmatprep.subr.mxu1 %v12586_v48 }
 0x6fd   :  { %10192 = vmatpush3.msra.mxu0 %v11253_v57  ;;  %10225 = vmatpush3.msra.mxu1 %v11223_v51 }
 0x6fe   :  { %10194 = vmatmul.mubr.f32.vlgmr.msra.gmra.mxu0 %v3483_v7  ;;  %10203 = vmatprep.subr.mxu0 %v12586_v48 }
 0x6ff   :  { %10204 = vmatpush3.msra.mxu0 %v11261_v58  ;;  %10207 = vmatprep.mubr.msk.f32.mxu0 %vm11051_vm1, %v12586_v48 }
 0x700   :  { %10205 = vmatprep.subr.mxu0 %v12586_v48  ;;  %10226 = vmatprep.subr.mxu1 %v12586_v48 }
 0x701   :  { %10206 = vmatpush3.msra.mxu0 %v11268_v59  ;;  %10227 = vmatpush3.msra.mxu1 %v11230_v53 }
 0x702   :  { %10208 = vmatmul.mubr.f32.vlgmr.msra.gmra.mxu0 %v3482_v5  ;;  %10228 = vmatprep.mubr.msk.f32.mxu1 %vm11051_vm1, %v12586_v48 }
 0x703   :  { %10238 = vmatprep.subr.mxu1 %v12586_v48  ;;  %10217 = vmatprep.subr.mxu0 %v12586_v48 }
 0x704   :  { %10218 = vmatpush3.msra.mxu0 %v11180_v41  ;;  %10221 = vmatprep.mubr.msk.f32.mxu0 %vm11051_vm1, %v12586_v48 }
 0x705   :  { %10219 = vmatprep.subr.mxu0 %v12586_v48 }
 0x706   :  { %10220 = vmatpush3.msra.mxu0 %v11185_v42 }
 0x707   :  { %10231 = vmatprep.subr.mxu0 %v12586_v48 }
 0x748   :  { %v3021_v16 = vpop.f32.mrf.mxu1 }
 0x74a   :  { %v10146_v17 = vpop.f32.mrf.mxu1 }
 0x74c   :  { %v3172_v19 = vpop.f32.mrf.mxu1 }
 0x74e   :  { %v10160_v21 = vpop.f32.mrf.mxu1 }
 0x750   :  { %v2940_v22 = vpop.f32.mrf.mxu0  ;;  %v3322_v23 = vpop.f32.mrf.mxu1 }
 0x751   :  { %v3022_v27 = vadd.f32 %v3021_v16, %v2940_v22 }
 0x752   :  { %v10139_v29 = vpop.f32.mrf.mxu0  ;;  %v10174_v30 = vpop.f32.mrf.mxu1 }
 0x754   :  { %v3097_v32 = vpop.f32.mrf.mxu0 }
 0x755   :  { %v3098_v33 = vadd.f32 %v3097_v32, %v3022_v27 }
 0x756   :  { %v10153_v34 = vpop.f32.mrf.mxu0 }
 0x757   :  { %v3173_v36 = vadd.f32 %v3172_v19, %v3098_v33 }
 0x758   :  { %v3249_v1 = vpop.f32.mrf.mxu0 }
 0x759   :  { %v3250_v12 = vadd.f32 %v3249_v1, %v3173_v36 }
 0x75a   :  { %v10167_v18 = vpop.f32.mrf.mxu0 }
 0x75b   :  { %v3323_v20 = vadd.f32 %v3322_v23, %v3250_v12 }
 0x75d   :  { %v3327_v49 = vrot.slane %v3323_v20, 6  ;;  %v3328_v7 = vrot.slane %v3323_v20, 7 }
 0x75f   :  { %v3331_v10 = vadd.f32 %v3327_v49, %v11355_v60  ;;  %v3332_v19 = vadd.f32 %v3328_v7, %v11352_v40 }
 0x761   :  { %10743 = vtanh.f32 %v3331_v10  ;;  %v9550_v12 = vmul.f32 -1.442695, %v3332_v19  ;;  %v9549_v18 = vmul.f32 -1.442695, %v3331_v10 }
 0x762   :  { %10745 = vtanh.f32 %v3332_v19 }
 0x763   :  { %10747 = vpow2.f32 %v9550_v12 }
 0x764   :  { %10749 = vpow2.f32 %v9549_v18 }
 0x76e   :  { %v10744_v36 = vpop.eup %10743 }
 0x76f   :  { %v10746_v1 = vpop.eup %10745 }
 0x770   :  { %v10748_v49 = vpop.eup %10747 }
 0x7b2   :  { %v3569_v38 = vpop.f32.mrf.mxu1 }
 0x7b4   :  { %v10188_v39 = vpop.f32.mrf.mxu1 }
 0x7b6   :  { %v3720_v31 = vpop.f32.mrf.mxu1 }
 0x7b8   :  { %v10202_v35 = vpop.f32.mrf.mxu1 }
 0x7b9   :  { %v10750_v35 = vpop.eup %10749 }
 0x7ba   :  { %v3488_v3 = vpop.f32.mrf.mxu0  ;;  %v3870_v5 = vpop.f32.mrf.mxu1 }
 0x7bb   :  { %v3570_v16 = vadd.f32 %v3569_v38, %v3488_v3  ;;  %v3339_v3 = vadd.f32 1.0, %v10750_v35 }
 0x7bc   :  { %v10181_v9 = vpop.f32.mrf.mxu0  ;;  %v10216_v15 = vpop.f32.mrf.mxu1 }
 0x7be   :  { %v3645_v17 = vpop.f32.mrf.mxu0 }
 0x7bf   :  { %v3646_v21 = vadd.f32 %v3645_v17, %v3570_v16 }
 0x7c0   :  { %v10195_v22 = vpop.f32.mrf.mxu0 }
 0x7c1   :  { %v3721_v23 = vadd.f32 %v3720_v31, %v3646_v21 }
 0x7c2   :  { %v3797_v27 = vpop.f32.mrf.mxu0 }
 0x7c3   :  { %v3798_v29 = vadd.f32 %v3797_v27, %v3721_v23 }
 0x7c4   :  { %v10209_v30 = vpop.f32.mrf.mxu0 }
 0x7c5   :  { %v3871_v32 = vadd.f32 %v3870_v5, %v3798_v29 }
 0x7c7   :  { %v3876_v33 = vrot.slane %v3871_v32, 4  ;;  %v3875_v34 = vrot.slane %v3871_v32, 3 }
 0x7c9   :  { %3879 = vrot.lane.b32.xlu0 %v3876_v33, %s11052_s3  ;;  %3877 = vrot.lane.b32.xlu1 %v3875_v34, %s11052_s3 }
 0x7cd   :  { %3360 = vrot.lane.b32.xlu0 %v10744_v36, %s11053_s26  ;;  %2290 = vrot.lane.b32.xlu1 %v11542_v24, %s11059_s10  ;;  %v3340_v24 = vadd.f32 1.0, %v10748_v49 }
 0x7d1   :  { %2842 = vrot.lane.b32.xlu0 %v11547_v13, %s11060_s11  ;;  %3362 = vrot.lane.b32.xlu1 %v10746_v1, %s11053_s26 }
 0x83b   :  { %v3880_v20 = vpop.permute.xlu0 %3879  ;;  %v3878_v38 = vpop.permute.xlu1 %3877 }
 0x83c   :  { %v3884_v39 = vadd.f32 %v3880_v20, %v11352_v40  ;;  %v3883_v31 = vadd.f32 %v3878_v38, %v11355_v60 }
 0x83e   :  { %10751 = vtanh.f32 %v3884_v39  ;;  %v9552_v32 = vmul.f32 -1.442695, %v3884_v39  ;;  %v9551_v33 = vmul.f32 -1.442695, %v3883_v31 }
 0x83f   :  { %10753 = vtanh.f32 %v3883_v31  ;;  %v2291_v13 = vpop.permute.xlu1 %2290  ;;  %v3361_v5 = vpop.permute.xlu0 %3360 }
 0x840   :  { %10755 = vrcp.f32 %v3340_v24  ;;  %v11667_v10 = vsel %vm2277_vm7, %v2291_v13, %v11514_v47 }
 0x841   :  { %10757 = vrcp.f32 %v3339_v3  ;;  %v3349_v15 = vrot.slane %v11667_v10, 7  ;;  %v3348_v17 = vrot.slane %v11667_v10, 6 }
 0x842   :  { %10759 = vpow2.f32 %v9552_v32 }
 0x843   :  { %v3363_v16 = vpop.permute.xlu1 %3362  ;;  %v2843_v19 = vpop.permute.xlu0 %2842  ;;  %10761 = vpow2.f32 %v9551_v33 }
 0x844   :  { %v11684_v27 = vsel %vm2827_vm8, %v2843_v19, %v11529_v4 }
 0x845   :  { %v3901_v29 = vrot.slane %v11684_v27, 4  ;;  %v3900_v30 = vrot.slane %v11684_v27, 3 }
 0x84b   :  { %v10752_v7 = vpop.eup %10751 }
 0x84c   :  { %v10754_v9 = vpop.eup %10753  ;;  %3914 = vrot.lane.b32.xlu0 %v10752_v7, %s11053_s26 }
 0x84d   :  { %3912 = vrot.lane.b32.xlu1 %v10754_v9, %s11053_s26  ;;  %v11674_v21 = vpop.eup %10755 }
 0x84e   :  { %v11677_v22 = vpop.eup %10757  ;;  %v3367_v47 = vmul.f32 %v11674_v21, %v3363_v16 }
 0x84f   :  { %v3366_v23 = vmul.f32 %v11677_v22, %v3361_v5  ;;  %v10760_v34 = vpop.eup %10759  ;;  %v12578_v5 = vmov 2  }
 0x850   :  { %3352 = vrot.lane.b32.xlu0 %v3349_v15, %s11054_s27  ;;  %v10762_v36 = vpop.eup %10761  ;;  %v3892_v4 = vadd.f32 1.0, %v10760_v34  ;;  %10665 = vset.pattern.permute.xlu1 %v12578_v5 }
 0x851   :  { %3350 = vrot.lane.b32.xlu1 %v3348_v17, %s11054_s27  ;;  %v3891_v1 = vadd.f32 1.0, %v10762_v36 }
 0x852   :  { %10763 = vrcp.f32 %v3892_v4 }
 0x853   :  { %10765 = vrcp.f32 %v3891_v1 }
 0x854   :  { %3372 = vrot.lane.b32.xlu0 %v3367_v47, %s11054_s27 }
 0x855   :  { %3370 = vrot.lane.b32.xlu1 %v3366_v23, %s11054_s27 }
 0x858   :  { %3904 = vrot.lane.b32.xlu0 %v3901_v29, %s11058_s9 }
 0x859   :  { %3902 = vrot.lane.b32.xlu1 %v3900_v30, %s11058_s9 }
 0x85f   :  { %v10764_v12 = vpop.eup %10763 }
 0x860   :  { %v10766_v20 = vpop.eup %10765 }
 0x8be   :  { %v3915_v18 = vpop.permute.xlu0 %3914 }
 0x8bf   :  { %v3919_v38 = vmul.f32 %v10764_v12, %v3915_v18  ;;  %v3913_v49 = vpop.permute.xlu1 %3912 }
 0x8c0   :  { %v3918_v35 = vmul.f32 %v10766_v20, %v3913_v49 }
 0x8c1   :  { %3924 = vrot.lane.b32.xlu0 %v3919_v38, %s11054_s27 }
 0x8c2   :  { %3922 = vrot.lane.b32.xlu1 %v3918_v35, %s11054_s27  ;;  %v3353_v39 = vpop.permute.xlu0 %3352 }
 0x8c3   :  { %v3351_v31 = vpop.permute.xlu1 %3350  ;;  %v3357_v24 = vmul.f32 %v11674_v21, %v3353_v39 }
 0x8c4   :  { %v3356_v3 = vmul.f32 %v11677_v22, %v3351_v31 }
 0x8c6   :  { %v3373_v13 = vpop.permute.xlu0 %3372 }
 0x8c7   :  { %v3377_v7 = vadd.f32 %v3373_v13, %v3357_v24  ;;  %v3371_v9 = vpop.permute.xlu1 %3370 }
 0x8c8   :  { %v3376_v15 = vadd.f32 %v3371_v9, %v3356_v3 }
 0x8c9   :  { %10767 = vtanh.f32 %v3377_v7  ;;  %v3406_v16 = vrot.slane %v3377_v7, 1 }
 0x8ca   :  { %10769 = vtanh.f32 %v3376_v15  ;;  %v3405_v17 = vrot.slane %v3376_v15, 2  ;;  %v3905_v29 = vpop.permute.xlu0 %3904  ;;  %v12583_v15 = vmov 5  }
 0x8cb   :  { %v3903_v30 = vpop.permute.xlu1 %3902  ;;  %v3909_v32 = vmul.f32 %v10764_v12, %v3905_v29 }
 0x8cc   :  { %v11698_v19 = vsel %vm1165_vm2, %v3406_v16, %v3405_v17  ;;  %v3908_v33 = vmul.f32 %v10766_v20, %v3903_v30 }
 0x8d6   :  { %v10768_v47 = vpop.eup %10767 }
 0x8d7   :  { %v10770_v23 = vpop.eup %10769  ;;  %3384 = vrot.lane.b32.xlu0 %v10768_v47, %s11057_s28 }
 0x8d8   :  { %3382 = vrot.lane.b32.xlu1 %v10770_v23, %s11057_s28 }
 0x933   :  { %v3925_v34 = vpop.permute.xlu0 %3924 }
 0x934   :  { %v3929_v36 = vadd.f32 %v3925_v34, %v3909_v32  ;;  %v3923_v4 = vpop.permute.xlu1 %3922 }
 0x935   :  { %v3928_v1 = vadd.f32 %v3923_v4, %v3908_v33 }
 0x936   :  { %10771 = vtanh.f32 %v3929_v36  ;;  %v3958_v18 = vrot.slane %v3929_v36, 4 }
 0x937   :  { %10773 = vtanh.f32 %v3928_v1  ;;  %v3957_v38 = vrot.slane %v3928_v1, 5 }
 0x939   :  { %v11703_v49 = vsel %vm1165_vm2, %v3958_v18, %v3957_v38 }
 0x943   :  { %v10772_v35 = vpop.eup %10771 }
 0x944   :  { %v10774_v39 = vpop.eup %10773  ;;  %3936 = vrot.lane.b32.xlu0 %v10772_v35, %s11057_s28 }
 0x945   :  { %3934 = vrot.lane.b32.xlu1 %v10774_v39, %s11057_s28 }
 0x949   :  { %3391 = vperm.xlu1 %10665, %v11398_v28   ;;  %v3385_v31 = vpop.permute.xlu0 %3384 }
 0x94a   :  { %v3389_v24 = vmul.f32 %v11674_v21, %v3385_v31  ;;  %v3383_v3 = vpop.permute.xlu1 %3382 }
 0x94b   :  { %v3388_v13 = vmul.f32 %v11677_v22, %v3383_v3 }
 0x94c   :  { %v3397_v7 = vrot.slane %v3389_v24, 1 }
 0x94d   :  { %v3396_v9 = vrot.slane %v3388_v13, 2  ;;  %10666 = vset.pattern.permute.xlu1 %v12583_v15 }
 0x94e   :  { %3943 = vperm.xlu1 %10666, %v11398_v28  }
 0x94f   :  { %v3398_v16 = vsel %vm1165_vm2, %v3397_v7, %v3396_v9 }
 0x950   :  { %3399 = vrot.lane.b32.xlu0 %v3398_v16, %s11058_s9 }
 0x9b6   :  { %v3937_v17 = vpop.permute.xlu0 %3936 }
 0x9b7   :  { %v3941_v47 = vmul.f32 %v10764_v12, %v3937_v17  ;;  %v3935_v23 = vpop.permute.xlu1 %3934 }
 0x9b8   :  { %v3940_v29 = vmul.f32 %v10766_v20, %v3935_v23 }
 0x9b9   :  { %v3949_v30 = vrot.slane %v3941_v47, 4 }
 0x9ba   :  { %v3948_v21 = vrot.slane %v3940_v29, 5 }
 0x9bc   :  { %v3950_v32 = vsel %vm1165_vm2, %v3949_v30, %v3948_v21 }
 0x9bd   :  { %3951 = vrot.lane.b32.xlu0 %v3950_v32, %s11054_s27 }
 0x9c2   :  { %v3400_v33 = vpop.permute.xlu0 %3399 }
 0x9c4   :  { %v11716_v22 = vpop.permute.xlu1 %3391 }
 0x9c5   :  { %vm3393_vm9 = vcmp.eq.s32.totalorder %v11716_v22, 1 }
 0x9c6   :  { %v11722_v34 = vsel %vm3393_vm9, %v3400_v33, %v11566_v37 }
 0x9c7   :  { %v3983_v12 = vsel %vm639_vm4, %v11722_v34, 0 }
 0x9c8   :  { %v4052_v20 = vand.u32 4294901760, %v3983_v12 }
 0x9c9   :  { %v11762_v38 = vpop.permute.xlu1 %3943 }
 0x9ca   :  { %10229 = vmatmul.mubr.f32.vlgmr.msra.gmra.mxu1 %v4052_v20  ;;  %v4053_v36 = vsub.f32 %v3983_v12, %v4052_v20  ;;  %vm3945_vm10 = vcmp.eq.s32.totalorder %v11762_v38, 1 }
 0x9cb   :  { %10239 = vmatpush3.msra.mxu1 %v11180_v41  ;;  %10242 = vmatprep.mubr.msk.f32.mxu1 %vm11051_vm1, %v12586_v48 }
 0x9cc   :  { %10240 = vmatprep.subr.mxu1 %v12586_v48  ;;  %v4054_v4 = vand.u32 4294901760, %v4053_v36 }
 0x9cd   :  { %10241 = vmatpush3.msra.mxu1 %v11185_v42 }
 0x9ce   :  { %10243 = vmatmul.mubr.f32.vlgmr.msra.gmra.mxu1 %v4054_v4  ;;  %10252 = vmatprep.subr.mxu1 %v12586_v48  ;;  %v4055_v1 = vsub.f32 %v4053_v36, %v4054_v4 }
 0x9cf   :  { %10253 = vmatpush3.msra.mxu1 %v11180_v41  ;;  %10256 = vmatprep.mubr.msk.f32.mxu1 %vm11051_vm1, %v12586_v48 }
 0x9d0   :  { %10254 = vmatprep.subr.mxu1 %v12586_v48  ;;  %v4056_v18 = vand.u32 4294901760, %v4055_v1 }
 0x9d1   :  { %10255 = vmatpush3.msra.mxu1 %v11185_v42 }
 0x9d2   :  { %10222 = vmatmul.mubr.f32.vlgmr.msra.gmra.mxu0 %v4056_v18  ;;  %10257 = vmatmul.mubr.f32.vlgmr.msra.gmra.mxu1 %v4052_v20 }
 0x9d3   :  { %10232 = vmatpush3.msra.mxu0 %v11190_v43  ;;  %10235 = vmatprep.mubr.msk.f32.mxu0 %vm11051_vm1, %v12586_v48 }
 0x9d4   :  { %10233 = vmatprep.subr.mxu0 %v12586_v48  ;;  %10266 = vmatprep.subr.mxu1 %v12586_v48 }
 0x9d5   :  { %10234 = vmatpush3.msra.mxu0 %v11195_v44  ;;  %10267 = vmatpush3.msra.mxu1 %v11288_v62 }
 0x9d6   :  { %10236 = vmatmul.mubr.f32.vlgmr.msra.gmra.mxu0 %v4053_v36  ;;  %10245 = vmatprep.subr.mxu0 %v12586_v48 }
 0x9d7   :  { %10246 = vmatpush3.msra.mxu0 %v11200_v45  ;;  %10249 = vmatprep.mubr.msk.f32.mxu0 %vm11051_vm1, %v12586_v48 }
 0x9d8   :  { %10247 = vmatprep.subr.mxu0 %v12586_v48  ;;  %10268 = vmatprep.subr.mxu1 %v12586_v48 }
 0x9d9   :  { %10248 = vmatpush3.msra.mxu0 %v11205_v46  ;;  %10269 = vmatpush3.msra.mxu1 %v11295_v63 }
 0x9da   :  { %10250 = vmatmul.mubr.f32.vlgmr.msra.gmra.mxu0 %v4052_v20  ;;  %10270 = vmatprep.mubr.msk.f32.mxu1 %vm11051_vm1, %v12586_v48 }
 0x9db   :  { %10280 = vmatprep.subr.mxu1 %v12586_v48  ;;  %10259 = vmatprep.subr.mxu0 %v12586_v48 }
 0x9dc   :  { %10260 = vmatpush3.msra.mxu0 %v11232_v54  ;;  %10263 = vmatprep.mubr.msk.f32.mxu0 %vm11051_vm1, %v12586_v48 }
 0x9dd   :  { %10261 = vmatprep.subr.mxu0 %v12586_v48 }
 0x9de   :  { %10262 = vmatpush3.msra.mxu0 %v11238_v55 }
 0x9df   :  { %10273 = vmatprep.subr.mxu0 %v12586_v48 }
 0xa2f   :  { %v3952_v35 = vpop.permute.xlu0 %3951 }
 0xa30   :  { %v11768_v39 = vsel %vm3945_vm10, %v3952_v35, %v11612_v2 }
 0xa31   :  { %v4531_v31 = vsel %vm639_vm4, %v11768_v39, 0 }
 0xa32   :  { %v4600_v24 = vand.u32 4294901760, %v4531_v31 }
 0xa34   :  { %v4601_v3 = vsub.f32 %v4531_v31, %v4600_v24  ;;  %10271 = vmatmul.mubr.f32.vlgmr.msra.gmra.mxu1 %v4600_v24 }
 0xa35   :  { %10281 = vmatpush3.msra.mxu1 %v11232_v54  ;;  %10284 = vmatprep.mubr.msk.f32.mxu1 %vm11051_vm1, %v12586_v48 }
 0xa36   :  { %10282 = vmatprep.subr.mxu1 %v12586_v48  ;;  %v4602_v13 = vand.u32 4294901760, %v4601_v3 }
 0xa37   :  { %10283 = vmatpush3.msra.mxu1 %v11238_v55 }
 0xa38   :  { %10285 = vmatmul.mubr.f32.vlgmr.msra.gmra.mxu1 %v4602_v13  ;;  %10294 = vmatprep.subr.mxu1 %v12586_v48  ;;  %v4603_v7 = vsub.f32 %v4601_v3, %v4602_v13 }
 0xa39   :  { %10295 = vmatpush3.msra.mxu1 %v11232_v54  ;;  %10298 = vmatprep.mubr.msk.f32.mxu1 %vm11051_vm1, %v12586_v48 }
 0xa3a   :  { %10296 = vmatprep.subr.mxu1 %v12586_v48  ;;  %v4604_v9 = vand.u32 4294901760, %v4603_v7 }
 0xa3b   :  { %10297 = vmatpush3.msra.mxu1 %v11238_v55 }
 0xa3c   :  { %10264 = vmatmul.mubr.f32.vlgmr.msra.gmra.mxu0 %v4604_v9  ;;  %10299 = vmatmul.mubr.f32.vlgmr.msra.gmra.mxu1 %v4600_v24 }
 0xa3d   :  { %10274 = vmatpush3.msra.mxu0 %v11245_v56  ;;  %10277 = vmatprep.mubr.msk.f32.mxu0 %vm11051_vm1, %v12586_v48 }
 0xa3e   :  { %10275 = vmatprep.subr.mxu0 %v12586_v48  ;;  %10308 = vmatprep.subr.mxu1 %v12586_v48 }
 0xa3f   :  { %10276 = vmatpush3.msra.mxu0 %v11253_v57  ;;  %10309 = vmatpush3.msra.mxu1 %v11223_v51 }
 0xa40   :  { %10278 = vmatmul.mubr.f32.vlgmr.msra.gmra.mxu0 %v4601_v3  ;;  %10287 = vmatprep.subr.mxu0 %v12586_v48 }
 0xa41   :  { %10288 = vmatpush3.msra.mxu0 %v11261_v58  ;;  %10291 = vmatprep.mubr.msk.f32.mxu0 %vm11051_vm1, %v12586_v48 }
 0xa42   :  { %10289 = vmatprep.subr.mxu0 %v12586_v48  ;;  %10310 = vmatprep.subr.mxu1 %v12586_v48 }
 0xa43   :  { %10290 = vmatpush3.msra.mxu0 %v11268_v59  ;;  %10311 = vmatpush3.msra.mxu1 %v11230_v53 }
 0xa44   :  { %10292 = vmatmul.mubr.f32.vlgmr.msra.gmra.mxu0 %v4600_v24  ;;  %10312 = vmatprep.mubr.msk.f32.mxu1 %vm11051_vm1, %v12586_v48 }
 0xa45   :  { %10322 = vmatprep.subr.mxu1 %v12586_v48  ;;  %10301 = vmatprep.subr.mxu0 %v12586_v48 }
 0xa46   :  { %10302 = vmatpush3.msra.mxu0 %v11180_v41  ;;  %10305 = vmatprep.mubr.msk.f32.mxu0 %vm11051_vm1, %v12586_v48 }
 0xa47   :  { %10303 = vmatprep.subr.mxu0 %v12586_v48 }
 0xa48   :  { %10304 = vmatpush3.msra.mxu0 %v11185_v42 }
 0xa49   :  { %10315 = vmatprep.subr.mxu0 %v12586_v48 }
 0xa8a   :  { %v4139_v16 = vpop.f32.mrf.mxu1 }
 0xa8c   :  { %v10230_v17 = vpop.f32.mrf.mxu1 }
 0xa8e   :  { %v4290_v47 = vpop.f32.mrf.mxu1 }
 0xa90   :  { %v10244_v23 = vpop.f32.mrf.mxu1 }
 0xa92   :  { %v4058_v29 = vpop.f32.mrf.mxu0  ;;  %v4440_v30 = vpop.f32.mrf.mxu1 }
 0xa93   :  { %v4140_v21 = vadd.f32 %v4139_v16, %v4058_v29 }
 0xa94   :  { %v10223_v32 = vpop.f32.mrf.mxu0  ;;  %v10258_v33 = vpop.f32.mrf.mxu1 }
 0xa96   :  { %v4215_v12 = vpop.f32.mrf.mxu0 }
 0xa97   :  { %v4216_v20 = vadd.f32 %v4215_v12, %v4140_v21 }
 0xa98   :  { %v10237_v36 = vpop.f32.mrf.mxu0 }
 0xa99   :  { %v4291_v4 = vadd.f32 %v4290_v47, %v4216_v20 }
 0xa9a   :  { %v4367_v1 = vpop.f32.mrf.mxu0 }
 0xa9b   :  { %v4368_v18 = vadd.f32 %v4367_v1, %v4291_v4 }
 0xa9c   :  { %v10251_v35 = vpop.f32.mrf.mxu0 }
 0xa9d   :  { %v4441_v31 = vadd.f32 %v4440_v30, %v4368_v18 }
 0xa9f   :  { %v4445_v7 = vrot.slane %v4441_v31, 5  ;;  %v4446_v5 = vrot.slane %v4441_v31, 6 }
 0xaa1   :  { %v4449_v16 = vadd.f32 %v4445_v7, %v11355_v60  ;;  %v4450_v47 = vadd.f32 %v4446_v5, %v11352_v40 }
 0xaa3   :  { %10775 = vtanh.f32 %v4449_v16 }
 0xaa4   :  { %10777 = vtanh.f32 %v4450_v47 }
 0xab0   :  { %v10776_v31 = vpop.eup %10775 }
 0xab1   :  { %v10778_v5 = vpop.eup %10777 }
 0xaf4   :  { %v4687_v24 = vpop.f32.mrf.mxu1 }
 0xaf6   :  { %v10272_v3 = vpop.f32.mrf.mxu1 }
 0xaf8   :  { %v4838_v13 = vpop.f32.mrf.mxu1 }
 0xafa   :  { %v10286_v9 = vpop.f32.mrf.mxu1 }
 0xafc   :  { %v4606_v17 = vpop.f32.mrf.mxu0  ;;  %v4988_v23 = vpop.f32.mrf.mxu1 }
 0xafd   :  { %v4688_v33 = vadd.f32 %v4687_v24, %v4606_v17  ;;  %v9554_v24 = vmul.f32 -1.442695, %v4450_v47 }
 0xafe   :  { %v10265_v29 = vpop.f32.mrf.mxu0  ;;  %v10300_v32 = vpop.f32.mrf.mxu1 }
 0xaff   :  { %10779 = vpow2.f32 %v9554_v24 }
 0xb00   :  { %v4763_v21 = vpop.f32.mrf.mxu0 }
 0xb01   :  { %v4764_v12 = vadd.f32 %v4763_v21, %v4688_v33 }
 0xb02   :  { %v10279_v20 = vpop.f32.mrf.mxu0 }
 0xb03   :  { %v4839_v30 = vadd.f32 %v4838_v13, %v4764_v12  ;;  %v9553_v13 = vmul.f32 -1.442695, %v4449_v16 }
 0xb04   :  { %v4915_v36 = vpop.f32.mrf.mxu0 }
 0xb05   :  { %v4916_v4 = vadd.f32 %v4915_v36, %v4839_v30  ;;  %10781 = vpow2.f32 %v9553_v13 }
 0xb06   :  { %v10293_v1 = vpop.f32.mrf.mxu0 }
 0xb07   :  { %v4989_v18 = vadd.f32 %v4988_v23, %v4916_v4 }
 0xb09   :  { %v4994_v35 = vrot.slane %v4989_v18, 5  ;;  %v4993_v3 = vrot.slane %v4989_v18, 4 }
 0xb0b   :  { %4997 = vrot.lane.b32.xlu0 %v4994_v35, %s11052_s3  ;;  %4995 = vrot.lane.b32.xlu1 %v4993_v3, %s11052_s3 }
 0xb0c   :  { %v10780_v29 = vpop.eup %10779 }
 0xb0f   :  { %4478 = vrot.lane.b32.xlu0 %v10776_v31, %s11053_s26  ;;  %3408 = vrot.lane.b32.xlu1 %v11698_v19, %s11059_s10  ;;  %v4458_v19 = vadd.f32 1.0, %v10780_v29 }
 0xb12   :  { %v10782_v32 = vpop.eup %10781 }
 0xb13   :  { %3960 = vrot.lane.b32.xlu0 %v11703_v49, %s11060_s11  ;;  %4480 = vrot.lane.b32.xlu1 %v10778_v5, %s11053_s26  ;;  %v4457_v33 = vadd.f32 1.0, %v10782_v32 }
 0xb7d   :  { %v4998_v7 = vpop.permute.xlu0 %4997  ;;  %v4996_v9 = vpop.permute.xlu1 %4995 }
 0xb7e   :  { %v5002_v17 = vadd.f32 %v4998_v7, %v11352_v40  ;;  %v5001_v23 = vadd.f32 %v4996_v9, %v11355_v60 }
 0xb80   :  { %10783 = vtanh.f32 %v5002_v17  ;;  %v9556_v24 = vmul.f32 -1.442695, %v5002_v17  ;;  %v9555_v13 = vmul.f32 -1.442695, %v5001_v23 }
 0xb81   :  { %10785 = vtanh.f32 %v5001_v23  ;;  %v3409_v49 = vpop.permute.xlu1 %3408  ;;  %v4479_v21 = vpop.permute.xlu0 %4478 }
 0xb82   :  { %10787 = vrcp.f32 %v4458_v19  ;;  %v11823_v16 = vsel %vm3393_vm9, %v3409_v49, %v11667_v10 }
 0xb83   :  { %10789 = vrcp.f32 %v4457_v33  ;;  %v4467_v20 = vrot.slane %v11823_v16, 6  ;;  %v4466_v36 = vrot.slane %v11823_v16, 5 }
 0xb84   :  { %10791 = vpow2.f32 %v9556_v24 }
 0xb85   :  { %v4481_v30 = vpop.permute.xlu1 %4480  ;;  %v3961_v4 = vpop.permute.xlu0 %3960  ;;  %10793 = vpow2.f32 %v9555_v13 }
 0xb86   :  { %v11840_v3 = vsel %vm3945_vm10, %v3961_v4, %v11684_v27 }
 0xb87   :  { %v5019_v31 = vrot.slane %v11840_v3, 5  ;;  %v5018_v5 = vrot.slane %v11840_v3, 4 }
 0xb8d   :  { %v10784_v47 = vpop.eup %10783 }
 0xb8e   :  { %v10786_v12 = vpop.eup %10785  ;;  %5032 = vrot.lane.b32.xlu0 %v10784_v47, %s11053_s26 }
 0xb8f   :  { %5030 = vrot.lane.b32.xlu1 %v10786_v12, %s11053_s26  ;;  %v11830_v1 = vpop.eup %10787 }
 0xb90   :  { %v11833_v18 = vpop.eup %10789  ;;  %v4485_v10 = vmul.f32 %v11830_v1, %v4481_v30 }
 0xb91   :  { %v4484_v35 = vmul.f32 %v11833_v18, %v4479_v21  ;;  %v10792_v7 = vpop.eup %10791 }
 0xb92   :  { %4470 = vrot.lane.b32.xlu0 %v4467_v20, %s11054_s27  ;;  %v10794_v9 = vpop.eup %10793  ;;  %v5010_v27 = vadd.f32 1.0, %v10792_v7 }
 0xb93   :  { %4468 = vrot.lane.b32.xlu1 %v4466_v36, %s11054_s27  ;;  %v5009_v29 = vadd.f32 1.0, %v10794_v9  ;;  %v12582_v36 = vmov 3  }
 0xb94   :  { %10795 = vrcp.f32 %v5010_v27  ;;  %10667 = vset.pattern.permute.xlu1 %v12582_v36 }
 0xb95   :  { %10797 = vrcp.f32 %v5009_v29 }
 0xb96   :  { %4490 = vrot.lane.b32.xlu0 %v4485_v10, %s11054_s27 }
 0xb97   :  { %4488 = vrot.lane.b32.xlu1 %v4484_v35, %s11054_s27 }
 0xb9a   :  { %5022 = vrot.lane.b32.xlu0 %v5019_v31, %s11058_s9 }
 0xb9b   :  { %5020 = vrot.lane.b32.xlu1 %v5018_v5, %s11058_s9 }
 0xba1   :  { %v10796_v32 = vpop.eup %10795 }
 0xba2   :  { %v10798_v33 = vpop.eup %10797 }
 0xc00   :  { %v5033_v19 = vpop.permute.xlu0 %5032 }
 0xc01   :  { %v5037_v49 = vmul.f32 %v10796_v32, %v5033_v19  ;;  %v5031_v21 = vpop.permute.xlu1 %5030 }
 0xc02   :  { %v5036_v47 = vmul.f32 %v10798_v33, %v5031_v21 }
 0xc03   :  { %5042 = vrot.lane.b32.xlu0 %v5037_v49, %s11054_s27 }
 0xc04   :  { %5040 = vrot.lane.b32.xlu1 %v5036_v47, %s11054_s27  ;;  %v4471_v17 = vpop.permute.xlu0 %4470 }
 0xc05   :  { %v4469_v23 = vpop.permute.xlu1 %4468  ;;  %v4475_v12 = vmul.f32 %v11830_v1, %v4471_v17 }
 0xc06   :  { %v4474_v20 = vmul.f32 %v11833_v18, %v4469_v23 }
 0xc08   :  { %v4491_v30 = vpop.permute.xlu0 %4490 }
 0xc09   :  { %v4495_v4 = vadd.f32 %v4491_v30, %v4475_v12  ;;  %v4489_v10 = vpop.permute.xlu1 %4488 }
 0xc0a   :  { %v4494_v35 = vadd.f32 %v4489_v10, %v4474_v20 }
 0xc0b   :  { %10799 = vtanh.f32 %v4495_v4  ;;  %v4524_v31 = vrot.slane %v4495_v4, 2 }
 0xc0c   :  { %10801 = vtanh.f32 %v4494_v35  ;;  %v4523_v5 = vrot.slane %v4494_v35, 3  ;;  %v5023_v9 = vpop.permute.xlu0 %5022 }
 0xc0d   :  { %v5021_v27 = vpop.permute.xlu1 %5020  ;;  %v5027_v29 = vmul.f32 %v10796_v32, %v5023_v9  ;;  %v12579_v9 = vmov 4  }
 0xc0e   :  { %v11854_v24 = vsel %vm1165_vm2, %v4524_v31, %v4523_v5  ;;  %v5026_v19 = vmul.f32 %v10798_v33, %v5021_v27 }
 0xc18   :  { %v10800_v13 = vpop.eup %10799 }
 0xc19   :  { %v10802_v7 = vpop.eup %10801  ;;  %4502 = vrot.lane.b32.xlu0 %v10800_v13, %s11057_s28 }
 0xc1a   :  { %4500 = vrot.lane.b32.xlu1 %v10802_v7, %s11057_s28 }
 0xc75   :  { %v5043_v49 = vpop.permute.xlu0 %5042 }
 0xc76   :  { %v5047_v21 = vadd.f32 %v5043_v49, %v5027_v29  ;;  %v5041_v47 = vpop.permute.xlu1 %5040 }
 0xc77   :  { %v5046_v17 = vadd.f32 %v5041_v47, %v5026_v19 }
 0xc78   :  { %10803 = vtanh.f32 %v5047_v21  ;;  %v5076_v23 = vrot.slane %v5047_v21, 3 }
 0xc79   :  { %10805 = vtanh.f32 %v5046_v17  ;;  %v5075_v12 = vrot.slane %v5046_v17, 4 }
 0xc7b   :  { %v11859_v20 = vsel %vm1165_vm2, %v5076_v23, %v5075_v12 }
 0xc85   :  { %v10804_v30 = vpop.eup %10803 }
 0xc86   :  { %v10806_v4 = vpop.eup %10805  ;;  %5054 = vrot.lane.b32.xlu0 %v10804_v30, %s11057_s28 }
 0xc87   :  { %5052 = vrot.lane.b32.xlu1 %v10806_v4, %s11057_s28 }
 0xc8b   :  { %4509 = vperm.xlu1 %10667, %v11398_v28   ;;  %v4503_v10 = vpop.permute.xlu0 %4502 }
 0xc8c   :  { %v4507_v35 = vmul.f32 %v11830_v1, %v4503_v10  ;;  %v4501_v31 = vpop.permute.xlu1 %4500 }
 0xc8d   :  { %v4506_v5 = vmul.f32 %v11833_v18, %v4501_v31 }
 0xc8e   :  { %v4515_v13 = vrot.slane %v4507_v35, 2 }
 0xc8f   :  { %v4514_v7 = vrot.slane %v4506_v5, 3  ;;  %10668 = vset.pattern.permute.xlu1 %v12579_v9 }
 0xc90   :  { %5061 = vperm.xlu1 %10668, %v11398_v28  }
 0xc91   :  { %v4516_v27 = vsel %vm1165_vm2, %v4515_v13, %v4514_v7 }
 0xc92   :  { %4517 = vrot.lane.b32.xlu0 %v4516_v27, %s11058_s9 }
 0xc94   :  { %10669 = vset.pattern.permute.xlu1 %v12580_v11 }
 0xcf8   :  { %v5055_v29 = vpop.permute.xlu0 %5054 }
 0xcf9   :  { %v5059_v19 = vmul.f32 %v10796_v32, %v5055_v29  ;;  %v5053_v49 = vpop.permute.xlu1 %5052 }
 0xcfa   :  { %v5058_v1 = vmul.f32 %v10798_v33, %v5053_v49 }
 0xcfb   :  { %v5067_v21 = vrot.slane %v5059_v19, 3 }
 0xcfc   :  { %v5066_v47 = vrot.slane %v5058_v1, 4 }
 0xcfe   :  { %v5068_v18 = vsel %vm1165_vm2, %v5067_v21, %v5066_v47 }
 0xcff   :  { %5069 = vrot.lane.b32.xlu0 %v5068_v18, %s11054_s27 }
 0xd04   :  { %v4518_v23 = vpop.permute.xlu0 %4517 }
 0xd06   :  { %v11873_v17 = vpop.permute.xlu1 %4509 }
 0xd07   :  { %vm4511_vm11 = vcmp.eq.s32.totalorder %v11873_v17, 1 }
 0xd08   :  { %v11879_v28 = vsel %vm4511_vm11, %v4518_v23, %v11722_v34 }
 0xd09   :  { %v5101_v32 = vsel %vm639_vm4, %v11879_v28, 0 }
 0xd0a   :  { %v5170_v33 = vand.u32 4294901760, %v5101_v32 }
 0xd0b   :  { %v11919_v35 = vpop.permute.xlu1 %5061 }
 0xd0c   :  { %10313 = vmatmul.mubr.f32.vlgmr.msra.gmra.mxu1 %v5170_v33  ;;  %v5171_v12 = vsub.f32 %v5101_v32, %v5170_v33  ;;  %vm5063_vm12 = vcmp.eq.s32.totalorder %v11919_v35, 1 }
 0xd0d   :  { %10323 = vmatpush3.msra.mxu1 %v11180_v41  ;;  %10326 = vmatprep.mubr.msk.f32.mxu1 %vm11051_vm1, %v12586_v48 }
 0xd0e   :  { %10324 = vmatprep.subr.mxu1 %v12586_v48  ;;  %v5172_v30 = vand.u32 4294901760, %v5171_v12 }
 0xd0f   :  { %10325 = vmatpush3.msra.mxu1 %v11185_v42 }
 0xd10   :  { %10327 = vmatmul.mubr.f32.vlgmr.msra.gmra.mxu1 %v5172_v30  ;;  %10336 = vmatprep.subr.mxu1 %v12586_v48  ;;  %v5173_v4 = vsub.f32 %v5171_v12, %v5172_v30 }
 0xd11   :  { %10337 = vmatpush3.msra.mxu1 %v11180_v41  ;;  %10340 = vmatprep.mubr.msk.f32.mxu1 %vm11051_vm1, %v12586_v48 }
 0xd12   :  { %10338 = vmatprep.subr.mxu1 %v12586_v48  ;;  %v5174_v10 = vand.u32 4294901760, %v5173_v4 }
 0xd13   :  { %10339 = vmatpush3.msra.mxu1 %v11185_v42 }
 0xd14   :  { %10306 = vmatmul.mubr.f32.vlgmr.msra.gmra.mxu0 %v5174_v10  ;;  %10341 = vmatmul.mubr.f32.vlgmr.msra.gmra.mxu1 %v5170_v33 }
 0xd15   :  { %10316 = vmatpush3.msra.mxu0 %v11190_v43  ;;  %10319 = vmatprep.mubr.msk.f32.mxu0 %vm11051_vm1, %v12586_v48 }
 0xd16   :  { %10317 = vmatprep.subr.mxu0 %v12586_v48  ;;  %10350 = vmatprep.subr.mxu1 %v12586_v48 }
 0xd17   :  { %10318 = vmatpush3.msra.mxu0 %v11195_v44  ;;  %10351 = vmatpush3.msra.mxu1 %v11288_v62 }
 0xd18   :  { %10320 = vmatmul.mubr.f32.vlgmr.msra.gmra.mxu0 %v5171_v12  ;;  %10329 = vmatprep.subr.mxu0 %v12586_v48 }
 0xd19   :  { %10330 = vmatpush3.msra.mxu0 %v11200_v45  ;;  %10333 = vmatprep.mubr.msk.f32.mxu0 %vm11051_vm1, %v12586_v48 }
 0xd1a   :  { %10331 = vmatprep.subr.mxu0 %v12586_v48  ;;  %10352 = vmatprep.subr.mxu1 %v12586_v48 }
 0xd1b   :  { %10332 = vmatpush3.msra.mxu0 %v11205_v46  ;;  %10353 = vmatpush3.msra.mxu1 %v11295_v63 }
 0xd1c   :  { %10334 = vmatmul.mubr.f32.vlgmr.msra.gmra.mxu0 %v5170_v33  ;;  %10354 = vmatprep.mubr.msk.f32.mxu1 %vm11051_vm1, %v12586_v48 }
 0xd1d   :  { %10364 = vmatprep.subr.mxu1 %v12586_v48  ;;  %10343 = vmatprep.subr.mxu0 %v12586_v48 }
 0xd1e   :  { %10344 = vmatpush3.msra.mxu0 %v11232_v54  ;;  %10347 = vmatprep.mubr.msk.f32.mxu0 %vm11051_vm1, %v12586_v48 }
 0xd1f   :  { %10345 = vmatprep.subr.mxu0 %v12586_v48 }
 0xd20   :  { %10346 = vmatpush3.msra.mxu0 %v11238_v55 }
 0xd21   :  { %10357 = vmatprep.subr.mxu0 %v12586_v48 }
 0xd71   :  { %v5070_v31 = vpop.permute.xlu0 %5069 }
 0xd72   :  { %v11925_v5 = vsel %vm5063_vm12, %v5070_v31, %v11768_v39 }
 0xd73   :  { %v5645_v13 = vsel %vm639_vm4, %v11925_v5, 0 }
 0xd74   :  { %v5714_v7 = vand.u32 4294901760, %v5645_v13 }
 0xd76   :  { %v5715_v27 = vsub.f32 %v5645_v13, %v5714_v7  ;;  %10355 = vmatmul.mubr.f32.vlgmr.msra.gmra.mxu1 %v5714_v7 }
 0xd77   :  { %10365 = vmatpush3.msra.mxu1 %v11232_v54  ;;  %10368 = vmatprep.mubr.msk.f32.mxu1 %vm11051_vm1, %v12586_v48 }
 0xd78   :  { %10366 = vmatprep.subr.mxu1 %v12586_v48  ;;  %v5716_v29 = vand.u32 4294901760, %v5715_v27 }
 0xd79   :  { %10367 = vmatpush3.msra.mxu1 %v11238_v55 }
 0xd7a   :  { %10369 = vmatmul.mubr.f32.vlgmr.msra.gmra.mxu1 %v5716_v29  ;;  %10378 = vmatprep.subr.mxu1 %v12586_v48  ;;  %v5717_v19 = vsub.f32 %v5715_v27, %v5716_v29 }
 0xd7b   :  { %10379 = vmatpush3.msra.mxu1 %v11232_v54  ;;  %10382 = vmatprep.mubr.msk.f32.mxu1 %vm11051_vm1, %v12586_v48 }
 0xd7c   :  { %10380 = vmatprep.subr.mxu1 %v12586_v48  ;;  %v5718_v49 = vand.u32 4294901760, %v5717_v19 }
 0xd7d   :  { %10381 = vmatpush3.msra.mxu1 %v11238_v55 }
 0xd7e   :  { %10348 = vmatmul.mubr.f32.vlgmr.msra.gmra.mxu0 %v5718_v49  ;;  %10383 = vmatmul.mubr.f32.vlgmr.msra.gmra.mxu1 %v5714_v7 }
 0xd7f   :  { %10358 = vmatpush3.msra.mxu0 %v11245_v56  ;;  %10361 = vmatprep.mubr.msk.f32.mxu0 %vm11051_vm1, %v12586_v48 }
 0xd80   :  { %10359 = vmatprep.subr.mxu0 %v12586_v48  ;;  %10392 = vmatprep.subr.mxu1 %v12586_v48 }
 0xd81   :  { %10360 = vmatpush3.msra.mxu0 %v11253_v57  ;;  %10393 = vmatpush3.msra.mxu1 %v11223_v51 }
 0xd82   :  { %10362 = vmatmul.mubr.f32.vlgmr.msra.gmra.mxu0 %v5715_v27  ;;  %10371 = vmatprep.subr.mxu0 %v12586_v48 }
 0xd83   :  { %10372 = vmatpush3.msra.mxu0 %v11261_v58  ;;  %10375 = vmatprep.mubr.msk.f32.mxu0 %vm11051_vm1, %v12586_v48 }
 0xd84   :  { %10373 = vmatprep.subr.mxu0 %v12586_v48  ;;  %10394 = vmatprep.subr.mxu1 %v12586_v48 }
 0xd85   :  { %10374 = vmatpush3.msra.mxu0 %v11268_v59  ;;  %10395 = vmatpush3.msra.mxu1 %v11230_v53 }
 0xd86   :  { %10376 = vmatmul.mubr.f32.vlgmr.msra.gmra.mxu0 %v5714_v7  ;;  %10396 = vmatprep.mubr.msk.f32.mxu1 %vm11051_vm1, %v12586_v48 }
 0xd87   :  { %10406 = vmatprep.subr.mxu1 %v12586_v48  ;;  %10385 = vmatprep.subr.mxu0 %v12586_v48 }
 0xd88   :  { %10386 = vmatpush3.msra.mxu0 %v11180_v41  ;;  %10389 = vmatprep.mubr.msk.f32.mxu0 %vm11051_vm1, %v12586_v48 }
 0xd89   :  { %10387 = vmatprep.subr.mxu0 %v12586_v48 }
 0xd8a   :  { %10388 = vmatpush3.msra.mxu0 %v11185_v42 }
 0xd8b   :  { %10399 = vmatprep.subr.mxu0 %v12586_v48 }
 0xdcc   :  { %v5257_v1 = vpop.f32.mrf.mxu1 }
 0xdce   :  { %v10314_v21 = vpop.f32.mrf.mxu1 }
 0xdd0   :  { %v5408_v47 = vpop.f32.mrf.mxu1 }
 0xdd2   :  { %v10328_v18 = vpop.f32.mrf.mxu1 }
 0xdd4   :  { %v5176_v23 = vpop.f32.mrf.mxu0  ;;  %v5558_v32 = vpop.f32.mrf.mxu1 }
 0xdd5   :  { %v5258_v33 = vadd.f32 %v5257_v1, %v5176_v23 }
 0xdd6   :  { %v10307_v12 = vpop.f32.mrf.mxu0  ;;  %v10342_v30 = vpop.f32.mrf.mxu1 }
 0xdd8   :  { %v5333_v4 = vpop.f32.mrf.mxu0 }
 0xdd9   :  { %v5334_v10 = vadd.f32 %v5333_v4, %v5258_v33 }
 0xdda   :  { %v10321_v31 = vpop.f32.mrf.mxu0 }
 0xddb   :  { %v5409_v13 = vadd.f32 %v5408_v47, %v5334_v10 }
 0xddc   :  { %v5485_v7 = vpop.f32.mrf.mxu0 }
 0xddd   :  { %v5486_v27 = vadd.f32 %v5485_v7, %v5409_v13 }
 0xdde   :  { %v10335_v29 = vpop.f32.mrf.mxu0 }
 0xddf   :  { %v5559_v19 = vadd.f32 %v5558_v32, %v5486_v27 }
 0xde1   :  { %v5563_v36 = vrot.slane %v5559_v19, 4  ;;  %v5564_v26 = vrot.slane %v5559_v19, 5 }
 0xde3   :  { %v5567_v1 = vadd.f32 %v5563_v36, %v11355_v60  ;;  %v5568_v47 = vadd.f32 %v5564_v26, %v11352_v40 }
 0xde5   :  { %10807 = vtanh.f32 %v5567_v1 }
 0xde6   :  { %10809 = vtanh.f32 %v5568_v47 }
 0xdf2   :  { %v10808_v36 = vpop.eup %10807 }
 0xdf3   :  { %v10810_v26 = vpop.eup %10809 }
 0xe36   :  { %v5801_v49 = vpop.f32.mrf.mxu1 }
 0xe38   :  { %v10356_v9 = vpop.f32.mrf.mxu1 }
 0xe3a   :  { %v5952_v11 = vpop.f32.mrf.mxu1 }
 0xe3c   :  { %v10370_v21 = vpop.f32.mrf.mxu1 }
 0xe3e   :  { %v5720_v15 = vpop.f32.mrf.mxu0  ;;  %v6102_v18 = vpop.f32.mrf.mxu1 }
 0xe3f   :  { %v5802_v30 = vadd.f32 %v5801_v49, %v5720_v15  ;;  %v9557_v15 = vmul.f32 -1.442695, %v5567_v1 }
 0xe40   :  { %v10349_v23 = vpop.f32.mrf.mxu0  ;;  %v10384_v12 = vpop.f32.mrf.mxu1 }
 0xe42   :  { %v5877_v33 = vpop.f32.mrf.mxu0 }
 0xe43   :  { %v5878_v4 = vadd.f32 %v5877_v33, %v5802_v30 }
 0xe44   :  { %v10363_v10 = vpop.f32.mrf.mxu0 }
 0xe45   :  { %v5953_v32 = vadd.f32 %v5952_v11, %v5878_v4  ;;  %v9558_v11 = vmul.f32 -1.442695, %v5568_v47 }
 0xe46   :  { %v6029_v31 = vpop.f32.mrf.mxu0 }
 0xe47   :  { %v6030_v9 = vadd.f32 %v6029_v31, %v5953_v32  ;;  %10811 = vpow2.f32 %v9558_v11 }
 0xe48   :  { %v10377_v13 = vpop.f32.mrf.mxu0  ;;  %10813 = vpow2.f32 %v9557_v15 }
 0xe49   :  { %v6103_v7 = vadd.f32 %v6102_v18, %v6030_v9 }
 0xe4b   :  { %v6108_v27 = vrot.slane %v6103_v7, 6  ;;  %v6107_v29 = vrot.slane %v6103_v7, 5 }
 0xe4d   :  { %6111 = vrot.lane.b32.xlu0 %v6108_v27, %s11052_s3  ;;  %6109 = vrot.lane.b32.xlu1 %v6107_v29, %s11052_s3 }
 0xe51   :  { %5596 = vrot.lane.b32.xlu0 %v10808_v36, %s11053_s26  ;;  %4526 = vrot.lane.b32.xlu1 %v11854_v24, %s11059_s10 }
 0xe54   :  { %v10812_v23 = vpop.eup %10811 }
 0xe55   :  { %5078 = vrot.lane.b32.xlu0 %v11859_v20, %s11060_s11  ;;  %5598 = vrot.lane.b32.xlu1 %v10810_v26, %s11053_s26  ;;  %v10814_v12 = vpop.eup %10813  ;;  %v5576_v24 = vadd.f32 1.0, %v10812_v23 }
 0xe56   :  { %v5575_v30 = vadd.f32 1.0, %v10814_v12 }
 0xebf   :  { %v6112_v19 = vpop.permute.xlu0 %6111  ;;  %v6110_v49 = vpop.permute.xlu1 %6109 }
 0xec0   :  { %v6116_v21 = vadd.f32 %v6112_v19, %v11352_v40  ;;  %v6115_v18 = vadd.f32 %v6110_v49, %v11355_v60 }
 0xec2   :  { %10815 = vtanh.f32 %v6116_v21  ;;  %v9560_v11 = vmul.f32 -1.442695, %v6116_v21  ;;  %v9559_v15 = vmul.f32 -1.442695, %v6115_v18 }
 0xec3   :  { %10817 = vtanh.f32 %v6115_v18  ;;  %v4527_v20 = vpop.permute.xlu1 %4526  ;;  %v5597_v33 = vpop.permute.xlu0 %5596 }
 0xec4   :  { %10819 = vrcp.f32 %v5576_v24  ;;  %v11980_v1 = vsel %vm4511_vm11, %v4527_v20, %v11823_v16 }
 0xec5   :  { %10821 = vrcp.f32 %v5575_v30  ;;  %v5585_v10 = vrot.slane %v11980_v1, 5  ;;  %v5584_v32 = vrot.slane %v11980_v1, 4 }
 0xec6   :  { %10823 = vpow2.f32 %v9560_v11 }
 0xec7   :  { %v5599_v31 = vpop.permute.xlu1 %5598  ;;  %v5079_v9 = vpop.permute.xlu0 %5078  ;;  %10825 = vpow2.f32 %v9559_v15 }
 0xec8   :  { %v11997_v29 = vsel %vm5063_vm12, %v5079_v9, %v11840_v3 }
 0xec9   :  { %v6133_v36 = vrot.slane %v11997_v29, 6  ;;  %v6132_v26 = vrot.slane %v11997_v29, 5 }
 0xecf   :  { %v10816_v47 = vpop.eup %10815 }
 0xed0   :  { %v10818_v4 = vpop.eup %10817  ;;  %6146 = vrot.lane.b32.xlu0 %v10816_v47, %s11053_s26 }
 0xed1   :  { %6144 = vrot.lane.b32.xlu1 %v10818_v4, %s11053_s26  ;;  %v11987_v13 = vpop.eup %10819 }
 0xed2   :  { %v11990_v7 = vpop.eup %10821  ;;  %v5603_v16 = vmul.f32 %v11987_v13, %v5599_v31 }
 0xed3   :  { %v5602_v27 = vmul.f32 %v11990_v7, %v5597_v33  ;;  %v10824_v19 = vpop.eup %10823 }
 0xed4   :  { %5588 = vrot.lane.b32.xlu0 %v5585_v10, %s11054_s27  ;;  %v10826_v49 = vpop.eup %10825  ;;  %v6124_v3 = vadd.f32 1.0, %v10824_v19 }
 0xed5   :  { %5586 = vrot.lane.b32.xlu1 %v5584_v32, %s11054_s27  ;;  %v6123_v23 = vadd.f32 1.0, %v10826_v49 }
 0xed6   :  { %10827 = vrcp.f32 %v6124_v3 }
 0xed7   :  { %10829 = vrcp.f32 %v6123_v23 }
 0xed8   :  { %5608 = vrot.lane.b32.xlu0 %v5603_v16, %s11054_s27 }
 0xed9   :  { %5606 = vrot.lane.b32.xlu1 %v5602_v27, %s11054_s27 }
 0xedc   :  { %6136 = vrot.lane.b32.xlu0 %v6133_v36, %s11058_s9 }
 0xedd   :  { %6134 = vrot.lane.b32.xlu1 %v6132_v26, %s11058_s9 }
 0xee3   :  { %v10828_v12 = vpop.eup %10827 }
 0xee4   :  { %v10830_v30 = vpop.eup %10829 }
 0xf42   :  { %v6147_v24 = vpop.permute.xlu0 %6146 }
 0xf43   :  { %v6151_v20 = vmul.f32 %v10828_v12, %v6147_v24  ;;  %v6145_v33 = vpop.permute.xlu1 %6144 }
 0xf44   :  { %v6150_v47 = vmul.f32 %v10830_v30, %v6145_v33 }
 0xf45   :  { %6156 = vrot.lane.b32.xlu0 %v6151_v20, %s11054_s27 }
 0xf46   :  { %6154 = vrot.lane.b32.xlu1 %v6150_v47, %s11054_s27  ;;  %v5589_v21 = vpop.permute.xlu0 %5588 }
 0xf47   :  { %v5587_v18 = vpop.permute.xlu1 %5586  ;;  %v5593_v4 = vmul.f32 %v11987_v13, %v5589_v21 }
 0xf48   :  { %v5592_v10 = vmul.f32 %v11990_v7, %v5587_v18 }
 0xf4a   :  { %v5609_v32 = vpop.permute.xlu0 %5608 }
 0xf4b   :  { %v5613_v31 = vadd.f32 %v5609_v32, %v5593_v4  ;;  %v5607_v9 = vpop.permute.xlu1 %5606 }
 0xf4c   :  { %v5612_v16 = vadd.f32 %v5607_v9, %v5592_v10 }
 0xf4d   :  { %10831 = vtanh.f32 %v5613_v31  ;;  %v5638_v27 = vrot.slane %v5613_v31, 3 }
 0xf4e   :  { %10833 = vtanh.f32 %v5612_v16  ;;  %v5637_v36 = vrot.slane %v5612_v16, 4  ;;  %v6137_v19 = vpop.permute.xlu0 %6136 }
 0xf4f   :  { %v6135_v49 = vpop.permute.xlu1 %6134  ;;  %v6141_v3 = vmul.f32 %v10828_v12, %v6137_v19 }
 0xf50   :  { %v12010_v26 = vsel %vm1165_vm2, %v5638_v27, %v5637_v36  ;;  %v6140_v23 = vmul.f32 %v10830_v30, %v6135_v49 }
 0xf5a   :  { %v10832_v11 = vpop.eup %10831 }
 0xf5b   :  { %v10834_v15 = vpop.eup %10833  ;;  %5620 = vrot.lane.b32.xlu0 %v10832_v11, %s11057_s28 }
 0xf5c   :  { %5618 = vrot.lane.b32.xlu1 %v10834_v15, %s11057_s28 }
 0xfb7   :  { %v6157_v24 = vpop.permute.xlu0 %6156 }
 0xfb8   :  { %v6161_v20 = vadd.f32 %v6157_v24, %v6141_v3  ;;  %v6155_v33 = vpop.permute.xlu1 %6154 }
 0xfb9   :  { %v6160_v47 = vadd.f32 %v6155_v33, %v6140_v23 }
 0xfba   :  { %10835 = vtanh.f32 %v6161_v20  ;;  %v6186_v21 = vrot.slane %v6161_v20, 2 }
 0xfbb   :  { %10837 = vtanh.f32 %v6160_v47  ;;  %v6185_v18 = vrot.slane %v6160_v47, 3 }
 0xfbd   :  { %v12015_v4 = vsel %vm1165_vm2, %v6186_v21, %v6185_v18 }
 0xfc7   :  { %v10836_v10 = vpop.eup %10835 }
 0xfc8   :  { %v10838_v32 = vpop.eup %10837  ;;  %6168 = vrot.lane.b32.xlu0 %v10836_v10, %s11057_s28 }
 0xfc9   :  { %6166 = vrot.lane.b32.xlu1 %v10838_v32, %s11057_s28 }
 0xfcd   :  { %v5621_v31 = vpop.permute.xlu0 %5620 }
 0xfce   :  { %v5625_v9 = vmul.f32 %v11987_v13, %v5621_v31  ;;  %v5619_v16 = vpop.permute.xlu1 %5618 }
 0xfcf   :  { %v5624_v27 = vmul.f32 %v11990_v7, %v5619_v16 }
 0xfd0   :  { %v5629_v36 = vrot.slane %v5625_v9, 3 }
 0xfd1   :  { %v5628_v11 = vrot.slane %v5624_v27, 4 }
 0xfd3   :  { %v5630_v15 = vsel %vm1165_vm2, %v5629_v36, %v5628_v11 }
 0xfd4   :  { %5631 = vrot.lane.b32.xlu1 %v5630_v15, %s11058_s9 }
0x103a   :  { %v6169_v19 = vpop.permute.xlu0 %6168 }
0x103b   :  { %v6173_v49 = vmul.f32 %v10828_v12, %v6169_v19  ;;  %v6167_v3 = vpop.permute.xlu1 %6166 }
0x103c   :  { %v6172_v23 = vmul.f32 %v10830_v30, %v6167_v3 }
0x103d   :  { %v6177_v24 = vrot.slane %v6173_v49, 2 }
0x103e   :  { %v6176_v20 = vrot.slane %v6172_v23, 3 }
0x1040   :  { %v6178_v33 = vsel %vm1165_vm2, %v6177_v24, %v6176_v20 }
0x1041   :  { %6179 = vrot.lane.b32.xlu0 %v6178_v33, %s11054_s27 }
0x1046   :  { %v5632_v13 = vpop.permute.xlu1 %5631 }
0x1047   :  { %v12028_v7 = vsel %vm5063_vm12, %v5632_v13, %v11879_v28 }
0x1048   :  { %v6203_v47 = vsel %vm639_vm4, %v12028_v7, 0 }
0x1049   :  { %v6272_v21 = vand.u32 4294901760, %v6203_v47 }
0x104b   :  { %v6273_v18 = vsub.f32 %v6203_v47, %v6272_v21  ;;  %10397 = vmatmul.mubr.f32.vlgmr.msra.gmra.mxu1 %v6272_v21 }
0x104c   :  { %10407 = vmatpush3.msra.mxu1 %v11180_v41  ;;  %10410 = vmatprep.mubr.msk.f32.mxu1 %vm11051_vm1, %v12586_v48 }
0x104d   :  { %10408 = vmatprep.subr.mxu1 %v12586_v48  ;;  %v6274_v12 = vand.u32 4294901760, %v6273_v18 }
0x104e   :  { %10409 = vmatpush3.msra.mxu1 %v11185_v42 }
0x104f   :  { %10411 = vmatmul.mubr.f32.vlgmr.msra.gmra.mxu1 %v6274_v12  ;;  %10420 = vmatprep.subr.mxu1 %v12586_v48  ;;  %v6275_v30 = vsub.f32 %v6273_v18, %v6274_v12 }
0x1050   :  { %10421 = vmatpush3.msra.mxu1 %v11180_v41  ;;  %10424 = vmatprep.mubr.msk.f32.mxu1 %vm11051_vm1, %v12586_v48 }
0x1051   :  { %10422 = vmatprep.subr.mxu1 %v12586_v48  ;;  %v6276_v10 = vand.u32 4294901760, %v6275_v30 }
0x1052   :  { %10423 = vmatpush3.msra.mxu1 %v11185_v42 }
0x1053   :  { %10390 = vmatmul.mubr.f32.vlgmr.msra.gmra.mxu0 %v6276_v10  ;;  %10425 = vmatmul.mubr.f32.vlgmr.msra.gmra.mxu1 %v6272_v21 }
0x1054   :  { %10400 = vmatpush3.msra.mxu0 %v11190_v43  ;;  %10403 = vmatprep.mubr.msk.f32.mxu0 %vm11051_vm1, %v12586_v48 }
0x1055   :  { %10401 = vmatprep.subr.mxu0 %v12586_v48  ;;  %10434 = vmatprep.subr.mxu1 %v12586_v48 }
0x1056   :  { %10402 = vmatpush3.msra.mxu0 %v11195_v44  ;;  %10435 = vmatpush3.msra.mxu1 %v11288_v62 }
0x1057   :  { %10404 = vmatmul.mubr.f32.vlgmr.msra.gmra.mxu0 %v6273_v18  ;;  %10413 = vmatprep.subr.mxu0 %v12586_v48 }
0x1058   :  { %10414 = vmatpush3.msra.mxu0 %v11200_v45  ;;  %10417 = vmatprep.mubr.msk.f32.mxu0 %vm11051_vm1, %v12586_v48 }
0x1059   :  { %10415 = vmatprep.subr.mxu0 %v12586_v48  ;;  %10436 = vmatprep.subr.mxu1 %v12586_v48 }
0x105a   :  { %10416 = vmatpush3.msra.mxu0 %v11205_v46  ;;  %10437 = vmatpush3.msra.mxu1 %v11295_v63 }
0x105b   :  { %10418 = vmatmul.mubr.f32.vlgmr.msra.gmra.mxu0 %v6272_v21  ;;  %10438 = vmatprep.mubr.msk.f32.mxu1 %vm11051_vm1, %v12586_v48 }
0x105c   :  { %10448 = vmatprep.subr.mxu1 %v12586_v48  ;;  %10427 = vmatprep.subr.mxu0 %v12586_v48 }
0x105d   :  { %10428 = vmatpush3.msra.mxu0 %v11232_v54  ;;  %10431 = vmatprep.mubr.msk.f32.mxu0 %vm11051_vm1, %v12586_v48 }
0x105e   :  { %10429 = vmatprep.subr.mxu0 %v12586_v48 }
0x105f   :  { %10430 = vmatpush3.msra.mxu0 %v11238_v55 }
0x1060   :  { %10441 = vmatprep.subr.mxu0 %v12586_v48 }
0x10b3   :  { %v6180_v32 = vpop.permute.xlu0 %6179 }
0x10b4   :  { %v12071_v31 = vsel %vm4511_vm11, %v6180_v32, %v11925_v5 }
0x10b5   :  { %v6747_v9 = vsel %vm639_vm4, %v12071_v31, 0 }
0x10b6   :  { %v6816_v16 = vand.u32 4294901760, %v6747_v9 }
0x10b8   :  { %v6817_v27 = vsub.f32 %v6747_v9, %v6816_v16  ;;  %10439 = vmatmul.mubr.f32.vlgmr.msra.gmra.mxu1 %v6816_v16 }
0x10b9   :  { %10449 = vmatpush3.msra.mxu1 %v11232_v54  ;;  %10452 = vmatprep.mubr.msk.f32.mxu1 %vm11051_vm1, %v12586_v48 }
0x10ba   :  { %10450 = vmatprep.subr.mxu1 %v12586_v48  ;;  %v6818_v36 = vand.u32 4294901760, %v6817_v27 }
0x10bb   :  { %10451 = vmatpush3.msra.mxu1 %v11238_v55 }
0x10bc   :  { %10453 = vmatmul.mubr.f32.vlgmr.msra.gmra.mxu1 %v6818_v36  ;;  %10462 = vmatprep.subr.mxu1 %v12586_v48  ;;  %v6819_v11 = vsub.f32 %v6817_v27, %v6818_v36 }
0x10bd   :  { %10463 = vmatpush3.msra.mxu1 %v11232_v54  ;;  %10466 = vmatprep.mubr.msk.f32.mxu1 %vm11051_vm1, %v12586_v48 }
0x10be   :  { %10464 = vmatprep.subr.mxu1 %v12586_v48  ;;  %v6820_v15 = vand.u32 4294901760, %v6819_v11 }
0x10bf   :  { %10465 = vmatpush3.msra.mxu1 %v11238_v55 }
0x10c0   :  { %10432 = vmatmul.mubr.f32.vlgmr.msra.gmra.mxu0 %v6820_v15  ;;  %10467 = vmatmul.mubr.f32.vlgmr.msra.gmra.mxu1 %v6816_v16 }
0x10c1   :  { %10442 = vmatpush3.msra.mxu0 %v11245_v56  ;;  %10445 = vmatprep.mubr.msk.f32.mxu0 %vm11051_vm1, %v12586_v48 }
0x10c2   :  { %10443 = vmatprep.subr.mxu0 %v12586_v48  ;;  %10476 = vmatprep.subr.mxu1 %v12586_v48 }
0x10c3   :  { %10444 = vmatpush3.msra.mxu0 %v11253_v57  ;;  %10477 = vmatpush3.msra.mxu1 %v11223_v51 }
0x10c4   :  { %10446 = vmatmul.mubr.f32.vlgmr.msra.gmra.mxu0 %v6817_v27  ;;  %10455 = vmatprep.subr.mxu0 %v12586_v48 }
0x10c5   :  { %10456 = vmatpush3.msra.mxu0 %v11261_v58  ;;  %10459 = vmatprep.mubr.msk.f32.mxu0 %vm11051_vm1, %v12586_v48 }
0x10c6   :  { %10457 = vmatprep.subr.mxu0 %v12586_v48  ;;  %10478 = vmatprep.subr.mxu1 %v12586_v48 }
0x10c7   :  { %10458 = vmatpush3.msra.mxu0 %v11268_v59  ;;  %10479 = vmatpush3.msra.mxu1 %v11230_v53 }
0x10c8   :  { %10460 = vmatmul.mubr.f32.vlgmr.msra.gmra.mxu0 %v6816_v16  ;;  %10480 = vmatprep.mubr.msk.f32.mxu1 %vm11051_vm1, %v12586_v48 }
0x10c9   :  { %10490 = vmatprep.subr.mxu1 %v12586_v48  ;;  %10469 = vmatprep.subr.mxu0 %v12586_v48 }
0x10ca   :  { %10470 = vmatpush3.msra.mxu0 %v11180_v41  ;;  %10473 = vmatprep.mubr.msk.f32.mxu0 %vm11051_vm1, %v12586_v48 }
0x10cb   :  { %10471 = vmatprep.subr.mxu0 %v12586_v48 }
0x10cc   :  { %10472 = vmatpush3.msra.mxu0 %v11185_v42 }
0x10cd   :  { %10483 = vmatprep.subr.mxu0 %v12586_v48 }
0x110b   :  { %v6359_v19 = vpop.f32.mrf.mxu1 }
0x110d   :  { %v10398_v49 = vpop.f32.mrf.mxu1 }
0x110f   :  { %v6510_v3 = vpop.f32.mrf.mxu1 }
0x1111   :  { %v10412_v23 = vpop.f32.mrf.mxu1 }
0x1113   :  { %v6278_v24 = vpop.f32.mrf.mxu0  ;;  %v6660_v20 = vpop.f32.mrf.mxu1 }
0x1114   :  { %v6360_v33 = vadd.f32 %v6359_v19, %v6278_v24 }
0x1115   :  { %v10391_v13 = vpop.f32.mrf.mxu0  ;;  %v10426_v47 = vpop.f32.mrf.mxu1 }
0x1117   :  { %v6435_v21 = vpop.f32.mrf.mxu0 }
0x1118   :  { %v6436_v18 = vadd.f32 %v6435_v21, %v6360_v33 }
0x1119   :  { %v10405_v12 = vpop.f32.mrf.mxu0 }
0x111a   :  { %v6511_v30 = vadd.f32 %v6510_v3, %v6436_v18 }
0x111b   :  { %v6587_v10 = vpop.f32.mrf.mxu0 }
0x111c   :  { %v6588_v32 = vadd.f32 %v6587_v10, %v6511_v30 }
0x111d   :  { %v10419_v9 = vpop.f32.mrf.mxu0 }
0x111e   :  { %v6661_v16 = vadd.f32 %v6660_v20, %v6588_v32 }
0x1120   :  { %v6665_v15 = vrot.slane %v6661_v16, 3  ;;  %v6666_v48 = vrot.slane %v6661_v16, 4 }
0x1122   :  { %v6669_v19 = vadd.f32 %v6665_v15, %v11355_v60  ;;  %v6670_v3 = vadd.f32 %v6666_v48, %v11352_v40 }
0x1124   :  { %10839 = vtanh.f32 %v6669_v19 }
0x1125   :  { %10841 = vtanh.f32 %v6670_v3 }
0x1131   :  { %v10840_v16 = vpop.eup %10839 }
0x1132   :  { %v10842_v48 = vpop.eup %10841 }
0x1178   :  { %v6903_v27 = vpop.f32.mrf.mxu1 }
0x117a   :  { %v10440_v36 = vpop.f32.mrf.mxu1 }
0x117c   :  { %v7054_v11 = vpop.f32.mrf.mxu1 }
0x117e   :  { %v10454_v49 = vpop.f32.mrf.mxu1 }
0x1180   :  { %v6822_v14 = vpop.f32.mrf.mxu0  ;;  %v7204_v23 = vpop.f32.mrf.mxu1 }
0x1181   :  { %v6904_v47 = vadd.f32 %v6903_v27, %v6822_v14  ;;  %v9562_v14 = vmul.f32 -1.442695, %v6670_v3  ;;  %v9561_v27 = vmul.f32 -1.442695, %v6669_v19 }
0x1182   :  { %v10433_v24 = vpop.f32.mrf.mxu0  ;;  %v10468_v13 = vpop.f32.mrf.mxu1 }
0x1183   :  { %10843 = vpow2.f32 %v9562_v14 }
0x1184   :  { %v6979_v33 = vpop.f32.mrf.mxu0  ;;  %10845 = vpow2.f32 %v9561_v27 }
0x1185   :  { %v6980_v21 = vadd.f32 %v6979_v33, %v6904_v47 }
0x1186   :  { %v10447_v18 = vpop.f32.mrf.mxu0 }
0x1187   :  { %v7055_v20 = vadd.f32 %v7054_v11, %v6980_v21 }
0x1188   :  { %v7131_v12 = vpop.f32.mrf.mxu0 }
0x1189   :  { %v7132_v30 = vadd.f32 %v7131_v12, %v7055_v20 }
0x118a   :  { %v10461_v10 = vpop.f32.mrf.mxu0 }
0x118b   :  { %v7205_v32 = vadd.f32 %v7204_v23, %v7132_v30 }
0x118d   :  { %v7209_v9 = vrot.slane %v7205_v32, 6  ;;  %v7210_v36 = vrot.slane %v7205_v32, 7 }
0x118f   :  { %7213 = vrot.lane.b32.xlu0 %v7210_v36, %s11052_s3  ;;  %7211 = vrot.lane.b32.xlu1 %v7209_v9, %s11052_s3 }
0x1190   :  { %v10844_v24 = vpop.eup %10843 }
0x1191   :  { %v10846_v13 = vpop.eup %10845 }
0x1192   :  { %v6677_v47 = vadd.f32 1.0, %v10846_v13 }
0x1193   :  { %6698 = vrot.lane.b32.xlu0 %v10840_v16, %s11053_s26  ;;  %5640 = vrot.lane.b32.xlu1 %v12010_v26, %s11059_s10  ;;  %v6678_v26 = vadd.f32 1.0, %v10844_v24 }
0x1197   :  { %6188 = vrot.lane.b32.xlu0 %v12015_v4, %s11060_s11  ;;  %6700 = vrot.lane.b32.xlu1 %v10842_v48, %s11053_s26 }
0x1201   :  { %v7214_v11 = vpop.permute.xlu0 %7213  ;;  %v7212_v15 = vpop.permute.xlu1 %7211 }
0x1202   :  { %v7218_v49 = vadd.f32 %v7214_v11, %v11352_v40  ;;  %v7217_v23 = vadd.f32 %v7212_v15, %v11355_v60 }
0x1204   :  { %10847 = vtanh.f32 %v7218_v49  ;;  %v9564_v48 = vmul.f32 -1.442695, %v7218_v49  ;;  %v9563_v14 = vmul.f32 -1.442695, %v7217_v23 }
0x1205   :  { %10849 = vtanh.f32 %v7217_v23  ;;  %v5641_v4 = vpop.permute.xlu1 %5640  ;;  %v6699_v33 = vpop.permute.xlu0 %6698 }
0x1206   :  { %10851 = vrcp.f32 %v6678_v26  ;;  %v12126_v19 = vsel %vm5063_vm12, %v5641_v4, %v11980_v1 }
0x1207   :  { %10853 = vrcp.f32 %v6677_v47  ;;  %v6687_v18 = vrot.slane %v12126_v19, 4  ;;  %v6686_v20 = vrot.slane %v12126_v19, 3 }
0x1208   :  { %10855 = vpow2.f32 %v9564_v48 }
0x1209   :  { %v6701_v12 = vpop.permute.xlu1 %6700  ;;  %v6189_v30 = vpop.permute.xlu0 %6188  ;;  %10857 = vpow2.f32 %v9563_v14 }
0x120a   :  { %v12143_v9 = vsel %vm4511_vm11, %v6189_v30, %v11997_v29 }
0x120b   :  { %v7235_v36 = vrot.slane %v12143_v9, 7  ;;  %v7234_v16 = vrot.slane %v12143_v9, 6 }
0x1211   :  { %v10848_v3 = vpop.eup %10847 }
0x1212   :  { %v10850_v21 = vpop.eup %10849  ;;  %7248 = vrot.lane.b32.xlu0 %v10848_v3, %s11053_s26 }
0x1213   :  { %7246 = vrot.lane.b32.xlu1 %v10850_v21, %s11053_s26  ;;  %v12133_v10 = vpop.eup %10851 }
0x1214   :  { %v12136_v35 = vpop.eup %10853  ;;  %v6705_v1 = vmul.f32 %v12133_v10, %v6701_v12 }
0x1215   :  { %v6704_v32 = vmul.f32 %v12136_v35, %v6699_v33  ;;  %v10856_v27 = vpop.eup %10855 }
0x1216   :  { %6690 = vrot.lane.b32.xlu0 %v6687_v18, %s11054_s27  ;;  %v10858_v17 = vpop.eup %10857  ;;  %v7226_v29 = vadd.f32 1.0, %v10856_v27 }
0x1217   :  { %6688 = vrot.lane.b32.xlu1 %v6686_v20, %s11054_s27  ;;  %v7225_v11 = vadd.f32 1.0, %v10858_v17 }
0x1218   :  { %10859 = vrcp.f32 %v7226_v29 }
0x1219   :  { %10861 = vrcp.f32 %v7225_v11 }
0x121a   :  { %6710 = vrot.lane.b32.xlu0 %v6705_v1, %s11054_s27 }
0x121b   :  { %6708 = vrot.lane.b32.xlu1 %v6704_v32, %s11054_s27 }
0x121e   :  { %7238 = vrot.lane.b32.xlu0 %v7235_v36, %s11058_s9 }
0x121f   :  { %7236 = vrot.lane.b32.xlu1 %v7234_v16, %s11058_s9 }
0x1225   :  { %v10860_v15 = vpop.eup %10859 }
0x1226   :  { %v10862_v13 = vpop.eup %10861 }
0x1284   :  { %v7249_v24 = vpop.permute.xlu0 %7248 }
0x1285   :  { %v7253_v26 = vmul.f32 %v10860_v15, %v7249_v24  ;;  %v7247_v47 = vpop.permute.xlu1 %7246 }
0x1286   :  { %v7252_v4 = vmul.f32 %v10862_v13, %v7247_v47 }
0x1287   :  { %7258 = vrot.lane.b32.xlu0 %v7253_v26, %s11054_s27 }
0x1288   :  { %7256 = vrot.lane.b32.xlu1 %v7252_v4, %s11054_s27  ;;  %v6691_v49 = vpop.permute.xlu0 %6690 }
0x1289   :  { %v6689_v23 = vpop.permute.xlu1 %6688  ;;  %v6695_v33 = vmul.f32 %v12133_v10, %v6691_v49 }
0x128a   :  { %v6694_v3 = vmul.f32 %v12136_v35, %v6689_v23 }
0x128c   :  { %v6711_v21 = vpop.permute.xlu0 %6710 }
0x128d   :  { %v6715_v18 = vadd.f32 %v6711_v21, %v6695_v33  ;;  %v6709_v20 = vpop.permute.xlu1 %6708 }
0x128e   :  { %v6714_v12 = vadd.f32 %v6709_v20, %v6694_v3 }
0x128f   :  { %10863 = vtanh.f32 %v6715_v18  ;;  %v6740_v30 = vrot.slane %v6715_v18, 4 }
0x1290   :  { %10865 = vtanh.f32 %v6714_v12  ;;  %v6739_v1 = vrot.slane %v6714_v12, 5  ;;  %v7239_v48 = vpop.permute.xlu0 %7238 }
0x1291   :  { %v7237_v14 = vpop.permute.xlu1 %7236  ;;  %v7243_v27 = vmul.f32 %v10860_v15, %v7239_v48 }
0x1292   :  { %v12156_v32 = vsel %vm1165_vm2, %v6740_v30, %v6739_v1  ;;  %v7242_v17 = vmul.f32 %v10862_v13, %v7237_v14 }
0x129c   :  { %v10864_v36 = vpop.eup %10863 }
0x129d   :  { %v10866_v16 = vpop.eup %10865  ;;  %6722 = vrot.lane.b32.xlu0 %v10864_v36, %s11057_s28 }
0x129e   :  { %6720 = vrot.lane.b32.xlu1 %v10866_v16, %s11057_s28 }
0x12f9   :  { %v7259_v29 = vpop.permute.xlu0 %7258 }
0x12fa   :  { %v7263_v11 = vadd.f32 %v7259_v29, %v7243_v27  ;;  %v7257_v24 = vpop.permute.xlu1 %7256 }
0x12fb   :  { %v7262_v26 = vadd.f32 %v7257_v24, %v7242_v17 }
0x12fc   :  { %10867 = vtanh.f32 %v7263_v11  ;;  %v7288_v47 = vrot.slane %v7263_v11, 1 }
0x12fd   :  { %10869 = vtanh.f32 %v7262_v26  ;;  %v7287_v4 = vrot.slane %v7262_v26, 2 }
0x12ff   :  { %v12161_v49 = vsel %vm1165_vm2, %v7288_v47, %v7287_v4 }
0x1309   :  { %v10868_v23 = vpop.eup %10867 }
0x130a   :  { %v10870_v33 = vpop.eup %10869  ;;  %7270 = vrot.lane.b32.xlu0 %v10868_v23, %s11057_s28 }
0x130b   :  { %7268 = vrot.lane.b32.xlu1 %v10870_v33, %s11057_s28 }
0x130f   :  { %v6723_v3 = vpop.permute.xlu0 %6722 }
0x1310   :  { %v6727_v21 = vmul.f32 %v12133_v10, %v6723_v3  ;;  %v6721_v18 = vpop.permute.xlu1 %6720 }
0x1311   :  { %v6726_v20 = vmul.f32 %v12136_v35, %v6721_v18 }
0x1312   :  { %v6731_v12 = vrot.slane %v6727_v21, 4 }
0x1313   :  { %v6730_v30 = vrot.slane %v6726_v20, 5 }
0x1315   :  { %v6732_v1 = vsel %vm1165_vm2, %v6731_v12, %v6730_v30 }
0x1316   :  { %6733 = vrot.lane.b32.xlu1 %v6732_v1, %s11058_s9 }
0x137c   :  { %v7271_v36 = vpop.permute.xlu0 %7270 }
0x137d   :  { %v7275_v16 = vmul.f32 %v10860_v15, %v7271_v36  ;;  %v7269_v48 = vpop.permute.xlu1 %7268  ;;  %v12588_v15 = vmov 0.0  }
0x137e   :  { %v7274_v14 = vmul.f32 %v10862_v13, %v7269_v48 }
0x137f   :  { %v7279_v27 = vrot.slane %v7275_v16, 1 }
0x1380   :  { %v7278_v17 = vrot.slane %v7274_v14, 2 }
0x1382   :  { %v7280_v29 = vsel %vm1165_vm2, %v7279_v27, %v7278_v17 }
0x1383   :  { %7281 = vrot.lane.b32.xlu0 %v7280_v29, %s11054_s27 }
0x1388   :  { %v6734_v10 = vpop.permute.xlu1 %6733 }
0x1389   :  { %v12174_v35 = vsel %vm3945_vm10, %v6734_v10, %v12028_v7 }
0x138a   :  { %v7305_v11 = vsel %vm639_vm4, %v12174_v35, 0 }
0x138b   :  { %v7374_v24 = vand.u32 4294901760, %v7305_v11 }
0x138d   :  { %v7375_v26 = vsub.f32 %v7305_v11, %v7374_v24  ;;  %10481 = vmatmul.mubr.f32.vlgmr.msra.gmra.mxu1 %v7374_v24 }
0x138e   :  { %10491 = vmatpush3.msra.mxu1 %v11180_v41  ;;  %10494 = vmatprep.mubr.msk.f32.mxu1 %vm11051_vm1, %v12588_v15 }
0x138f   :  { %10492 = vmatprep.subr.mxu1 %v12588_v15  ;;  %v7376_v13 = vand.u32 4294901760, %v7375_v26 }
0x1390   :  { %10493 = vmatpush3.msra.mxu1 %v11185_v42 }
0x1391   :  { %10495 = vmatmul.mubr.f32.vlgmr.msra.gmra.mxu1 %v7376_v13  ;;  %10504 = vmatprep.subr.mxu1 %v12588_v15  ;;  %v7377_v47 = vsub.f32 %v7375_v26, %v7376_v13 }
0x1392   :  { %10505 = vmatpush3.msra.mxu1 %v11180_v41  ;;  %10508 = vmatprep.mubr.msk.f32.mxu1 %vm11051_vm1, %v12588_v15 }
0x1393   :  { %10506 = vmatprep.subr.mxu1 %v12588_v15  ;;  %v7378_v4 = vand.u32 4294901760, %v7377_v47 }
0x1394   :  { %10507 = vmatpush3.msra.mxu1 %v11185_v42 }
0x1395   :  { %10474 = vmatmul.mubr.f32.vlgmr.msra.gmra.mxu0 %v7378_v4  ;;  %10509 = vmatmul.mubr.f32.vlgmr.msra.gmra.mxu1 %v7374_v24 }
0x1396   :  { %10484 = vmatpush3.msra.mxu0 %v11190_v43  ;;  %10487 = vmatprep.mubr.msk.f32.mxu0 %vm11051_vm1, %v12588_v15 }
0x1397   :  { %10485 = vmatprep.subr.mxu0 %v12588_v15  ;;  %10518 = vmatprep.subr.mxu1 %v12588_v15 }
0x1398   :  { %10486 = vmatpush3.msra.mxu0 %v11195_v44  ;;  %10519 = vmatpush3.msra.mxu1 %v11288_v62 }
0x1399   :  { %10488 = vmatmul.mubr.f32.vlgmr.msra.gmra.mxu0 %v7375_v26  ;;  %10497 = vmatprep.subr.mxu0 %v12588_v15 }
0x139a   :  { %10498 = vmatpush3.msra.mxu0 %v11200_v45  ;;  %10501 = vmatprep.mubr.msk.f32.mxu0 %vm11051_vm1, %v12588_v15 }
0x139b   :  { %10499 = vmatprep.subr.mxu0 %v12588_v15  ;;  %10520 = vmatprep.subr.mxu1 %v12588_v15 }
0x139c   :  { %10500 = vmatpush3.msra.mxu0 %v11205_v46  ;;  %10521 = vmatpush3.msra.mxu1 %v11295_v63 }
0x139d   :  { %10502 = vmatmul.mubr.f32.vlgmr.msra.gmra.mxu0 %v7374_v24  ;;  %10522 = vmatprep.mubr.msk.f32.mxu1 %vm11051_vm1, %v12588_v15 }
0x139e   :  { %10532 = vmatprep.subr.mxu1 %v12588_v15  ;;  %10511 = vmatprep.subr.mxu0 %v12588_v15 }
0x139f   :  { %10512 = vmatpush3.msra.mxu0 %v11232_v54  ;;  %10515 = vmatprep.mubr.msk.f32.mxu0 %vm11051_vm1, %v12588_v15 }
0x13a0   :  { %10513 = vmatprep.subr.mxu0 %v12588_v15 }
0x13a1   :  { %10514 = vmatpush3.msra.mxu0 %v11238_v55 }
0x13a2   :  { %10525 = vmatprep.subr.mxu0 %v12588_v15 }
0x13f5   :  { %v7282_v23 = vpop.permute.xlu0 %7281 }
0x13f6   :  { %v12217_v33 = vsel %vm3393_vm9, %v7282_v23, %v12071_v31 }
0x13f7   :  { %v7849_v3 = vsel %vm639_vm4, %v12217_v33, 0 }
0x13f8   :  { %v7918_v21 = vand.u32 4294901760, %v7849_v3 }
0x13fa   :  { %v7919_v18 = vsub.f32 %v7849_v3, %v7918_v21  ;;  %10523 = vmatmul.mubr.f32.vlgmr.msra.gmra.mxu1 %v7918_v21 }
0x13fb   :  { %10533 = vmatpush3.msra.mxu1 %v11232_v54  ;;  %10536 = vmatprep.mubr.msk.f32.mxu1 %vm11051_vm1, %v12588_v15 }
0x13fc   :  { %10534 = vmatprep.subr.mxu1 %v12588_v15  ;;  %v7920_v20 = vand.u32 4294901760, %v7919_v18 }
0x13fd   :  { %10535 = vmatpush3.msra.mxu1 %v11238_v55 }
0x13fe   :  { %10537 = vmatmul.mubr.f32.vlgmr.msra.gmra.mxu1 %v7920_v20  ;;  %10546 = vmatprep.subr.mxu1 %v12588_v15  ;;  %v7921_v12 = vsub.f32 %v7919_v18, %v7920_v20 }
0x13ff   :  { %10547 = vmatpush3.msra.mxu1 %v11232_v54  ;;  %10550 = vmatprep.mubr.msk.f32.mxu1 %vm11051_vm1, %v12588_v15 }
0x1400   :  { %10548 = vmatprep.subr.mxu1 %v12588_v15  ;;  %v7922_v30 = vand.u32 4294901760, %v7921_v12 }
0x1401   :  { %10549 = vmatpush3.msra.mxu1 %v11238_v55 }
0x1402   :  { %10516 = vmatmul.mubr.f32.vlgmr.msra.gmra.mxu0 %v7922_v30  ;;  %10551 = vmatmul.mubr.f32.vlgmr.msra.gmra.mxu1 %v7918_v21 }
0x1403   :  { %10526 = vmatpush3.msra.mxu0 %v11245_v56  ;;  %10529 = vmatprep.mubr.msk.f32.mxu0 %vm11051_vm1, %v12588_v15 }
0x1404   :  { %10527 = vmatprep.subr.mxu0 %v12588_v15  ;;  %10560 = vmatprep.subr.mxu1 %v12588_v15 }
0x1405   :  { %10528 = vmatpush3.msra.mxu0 %v11253_v57  ;;  %10561 = vmatpush3.msra.mxu1 %v11223_v51 }
0x1406   :  { %10530 = vmatmul.mubr.f32.vlgmr.msra.gmra.mxu0 %v7919_v18  ;;  %10539 = vmatprep.subr.mxu0 %v12588_v15 }
0x1407   :  { %10540 = vmatpush3.msra.mxu0 %v11261_v58  ;;  %10543 = vmatprep.mubr.msk.f32.mxu0 %vm11051_vm1, %v12588_v15 }
0x1408   :  { %10541 = vmatprep.subr.mxu0 %v12588_v15  ;;  %10562 = vmatprep.subr.mxu1 %v12588_v15 }
0x1409   :  { %10542 = vmatpush3.msra.mxu0 %v11268_v59  ;;  %10563 = vmatpush3.msra.mxu1 %v11230_v53 }
0x140a   :  { %10544 = vmatmul.mubr.f32.vlgmr.msra.gmra.mxu0 %v7918_v21  ;;  %10564 = vmatprep.mubr.msk.f32.mxu1 %vm11051_vm1, %v12588_v15 }
0x140b   :  { %10574 = vmatprep.subr.mxu1 %v12588_v15  ;;  %10553 = vmatprep.subr.mxu0 %v12588_v15 }
0x140c   :  { %10554 = vmatpush3.msra.mxu0 %v11180_v41  ;;  %10557 = vmatprep.mubr.msk.f32.mxu0 %vm11051_vm1, %v12588_v15 }
0x140d   :  { %10555 = vmatprep.subr.mxu0 %v12588_v15 }
0x140e   :  { %10556 = vmatpush3.msra.mxu0 %v11185_v42 }
0x140f   :  { %10567 = vmatprep.subr.mxu0 %v12588_v15 }
0x144d   :  { %v7461_v51 = vpop.f32.mrf.mxu1 }
0x144f   :  { %v10482_v53 = vpop.f32.mrf.mxu1 }
0x1451   :  { %v7612_v1 = vpop.f32.mrf.mxu1 }
0x1453   :  { %v10496_v36 = vpop.f32.mrf.mxu1 }
0x1455   :  { %v7380_v16 = vpop.f32.mrf.mxu0  ;;  %v7762_v48 = vpop.f32.mrf.mxu1 }
0x1456   :  { %v7462_v14 = vadd.f32 %v7461_v51, %v7380_v16 }
0x1457   :  { %v10475_v27 = vpop.f32.mrf.mxu0  ;;  %v10510_v17 = vpop.f32.mrf.mxu1 }
0x1459   :  { %v7537_v29 = vpop.f32.mrf.mxu0 }
0x145a   :  { %v7538_v10 = vadd.f32 %v7537_v29, %v7462_v14 }
0x145b   :  { %v10489_v11 = vpop.f32.mrf.mxu0 }
0x145c   :  { %v7613_v24 = vadd.f32 %v7612_v1, %v7538_v10 }
0x145d   :  { %v7689_v26 = vpop.f32.mrf.mxu0 }
0x145e   :  { %v7690_v13 = vadd.f32 %v7689_v26, %v7613_v24 }
0x145f   :  { %v10503_v47 = vpop.f32.mrf.mxu0 }
0x1460   :  { %v7763_v4 = vadd.f32 %v7762_v48, %v7690_v13 }
0x1462   :  { %v7767_v21 = vrot.slane %v7763_v4, 2  ;;  %v7768_v51 = vrot.slane %v7763_v4, 3 }
0x1464   :  { %v7771_v12 = vadd.f32 %v7767_v21, %v11355_v60  ;;  %v7772_v1 = vadd.f32 %v7768_v51, %v11352_v40 }
0x1466   :  { %10871 = vtanh.f32 %v7771_v12 }
0x1467   :  { %10873 = vtanh.f32 %v7772_v1 }
0x1473   :  { %v10872_v47 = vpop.eup %10871 }
0x1474   :  { %v10874_v4 = vpop.eup %10873 }
0x14ba   :  { %v8005_v23 = vpop.f32.mrf.mxu1 }
0x14bc   :  { %v10524_v3 = vpop.f32.mrf.mxu1 }
0x14bd   :  { %v9565_v3 = vmul.f32 -1.442695, %v7771_v12 }
0x14be   :  { %v8156_v18 = vpop.f32.mrf.mxu1 }
0x14c0   :  { %v10538_v20 = vpop.f32.mrf.mxu1 }
0x14c2   :  { %v7924_v30 = vpop.f32.mrf.mxu0  ;;  %v8306_v53 = vpop.f32.mrf.mxu1 }
0x14c3   :  { %v8006_v14 = vadd.f32 %v8005_v23, %v7924_v30  ;;  %v9566_v23 = vmul.f32 -1.442695, %v7772_v1 }
0x14c4   :  { %v10517_v36 = vpop.f32.mrf.mxu0  ;;  %v10552_v16 = vpop.f32.mrf.mxu1 }
0x14c5   :  { %10875 = vpow2.f32 %v9566_v23 }
0x14c6   :  { %v8081_v27 = vpop.f32.mrf.mxu0  ;;  %10877 = vpow2.f32 %v9565_v3 }
0x14c7   :  { %v8082_v17 = vadd.f32 %v8081_v27, %v8006_v14 }
0x14c8   :  { %v10531_v29 = vpop.f32.mrf.mxu0 }
0x14c9   :  { %v8157_v48 = vadd.f32 %v8156_v18, %v8082_v17 }
0x14ca   :  { %v8233_v10 = vpop.f32.mrf.mxu0 }
0x14cb   :  { %v8234_v11 = vadd.f32 %v8233_v10, %v8157_v48 }
0x14cc   :  { %v10545_v24 = vpop.f32.mrf.mxu0 }
0x14cd   :  { %v8307_v26 = vadd.f32 %v8306_v53, %v8234_v11 }
0x14cf   :  { %v8311_v13 = vrot.slane %v8307_v26, 7  ;;  %8314 = vrot.lane.b32.xlu0 %v8307_v26, %s11052_s3 }
0x14d1   :  { %8312 = vrot.lane.b32.xlu1 %v8311_v13, %s11052_s3 }
0x14d2   :  { %v10876_v20 = vpop.eup %10875 }
0x14d3   :  { %7800 = vrot.lane.b32.xlu0 %v10872_v47, %s11053_s26  ;;  %v10878_v51 = vpop.eup %10877 }
0x14d4   :  { %v7779_v36 = vadd.f32 1.0, %v10878_v51 }
0x14d5   :  { %6742 = vrot.lane.b32.xlu1 %v12156_v32, %s11059_s10  ;;  %v7780_v32 = vadd.f32 1.0, %v10876_v20 }
0x14d7   :  { %7290 = vrot.lane.b32.xlu0 %v12161_v49, %s11060_s11 }
0x14d9   :  { %7802 = vrot.lane.b32.xlu1 %v10874_v4, %s11053_s26 }
0x1541   :  { %v8315_v21 = vpop.permute.xlu0 %8314 }
0x1542   :  { %v8319_v18 = vadd.f32 %v8315_v21, %v11352_v40 }
0x1543   :  { %v8313_v30 = vpop.permute.xlu1 %8312 }
0x1544   :  { %10879 = vtanh.f32 %v8319_v18  ;;  %v8318_v53 = vadd.f32 %v8313_v30, %v11355_v60  ;;  %v9568_v13 = vmul.f32 -1.442695, %v8319_v18 }
0x1545   :  { %v7801_v14 = vpop.permute.xlu0 %7800 }
0x1546   :  { %10881 = vtanh.f32 %v8318_v53  ;;  %v9567_v47 = vmul.f32 -1.442695, %v8318_v53 }
0x1547   :  { %10883 = vrcp.f32 %v7780_v32  ;;  %v6743_v49 = vpop.permute.xlu1 %6742 }
0x1548   :  { %10885 = vrcp.f32 %v7779_v36  ;;  %v12272_v12 = vsel %vm3945_vm10, %v6743_v49, %v12126_v19 }
0x1549   :  { %v7789_v1 = vrot.slane %v12272_v12, 3  ;;  %v7788_v48 = vrot.slane %v12272_v12, 2  ;;  %v7291_v38 = vpop.permute.xlu0 %7290  ;;  %10887 = vpow2.f32 %v9568_v13 }
0x154a   :  { %v12287_v24 = vsel %vm3393_vm9, %v7291_v38, %v12143_v9  ;;  %10889 = vpow2.f32 %v9567_v47 }
0x154b   :  { %v7803_v17 = vpop.permute.xlu1 %7802  ;;  %v8335_v26 = vrot.slane %v12287_v24, 7 }
0x1551   :  { %v10880_v16 = vpop.eup %10879 }
0x1552   :  { %8348 = vrot.lane.b32.xlu0 %v10880_v16, %s11053_s26 }
0x1553   :  { %v10882_v27 = vpop.eup %10881 }
0x1554   :  { %8346 = vrot.lane.b32.xlu1 %v10882_v27, %s11053_s26  ;;  %v12278_v29 = vpop.eup %10883 }
0x1555   :  { %v7807_v10 = vmul.f32 %v12278_v29, %v7803_v17  ;;  %v10886_v19 = vpop.eup %10885 }
0x1556   :  { %7792 = vrot.lane.b32.xlu0 %v7789_v1, %s11054_s27  ;;  %v7806_v11 = vmul.f32 %v10886_v19, %v7801_v14  ;;  %v10888_v4 = vpop.eup %10887 }
0x1557   :  { %v10890_v23 = vpop.eup %10889  ;;  %v8327_v3 = vadd.f32 1.0, %v10888_v4 }
0x1558   :  { %7790 = vrot.lane.b32.xlu1 %v7788_v48, %s11054_s27  ;;  %v8326_v21 = vadd.f32 1.0, %v10890_v23 }
0x1559   :  { %10891 = vrcp.f32 %v8327_v3 }
0x155a   :  { %7812 = vrot.lane.b32.xlu0 %v7807_v10, %s11054_s27  ;;  %10893 = vrcp.f32 %v8326_v21 }
0x155c   :  { %7810 = vrot.lane.b32.xlu1 %v7806_v11, %s11054_s27 }
0x155e   :  { %8338 = vrot.lane.b32.xlu0 %v12287_v24, %s11058_s9 }
0x1560   :  { %8336 = vrot.lane.b32.xlu1 %v8335_v26, %s11058_s9 }
0x1566   :  { %v10892_v22 = vpop.eup %10891 }
0x1567   :  { %v10894_v30 = vpop.eup %10893 }
0x15c4   :  { %v8349_v9 = vpop.permute.xlu0 %8348 }
0x15c5   :  { %v8353_v20 = vmul.f32 %v10892_v22, %v8349_v9 }
0x15c6   :  { %v8347_v51 = vpop.permute.xlu1 %8346 }
0x15c7   :  { %8358 = vrot.lane.b32.xlu0 %v8353_v20, %s11054_s27  ;;  %v8352_v32 = vmul.f32 %v10894_v30, %v8347_v51 }
0x15c8   :  { %v7793_v36 = vpop.permute.xlu0 %7792 }
0x15c9   :  { %8356 = vrot.lane.b32.xlu1 %v8352_v32, %s11054_s27  ;;  %v7797_v18 = vmul.f32 %v12278_v29, %v7793_v36 }
0x15ca   :  { %v7791_v53 = vpop.permute.xlu1 %7790 }
0x15cb   :  { %v7796_v14 = vmul.f32 %v10886_v19, %v7791_v53 }
0x15cc   :  { %v7813_v49 = vpop.permute.xlu0 %7812 }
0x15cd   :  { %v7817_v16 = vadd.f32 %v7813_v49, %v7797_v18 }
0x15ce   :  { %v7811_v27 = vpop.permute.xlu1 %7810 }
0x15cf   :  { %10895 = vtanh.f32 %v7817_v16  ;;  %v7816_v1 = vadd.f32 %v7811_v27, %v7796_v14  ;;  %v7842_v17 = vrot.slane %v7817_v16, 5 }
0x15d0   :  { %v8339_v26 = vpop.permute.xlu0 %8338 }
0x15d1   :  { %10897 = vtanh.f32 %v7816_v1  ;;  %v7841_v48 = vrot.slane %v7816_v1, 6  ;;  %v8343_v13 = vmul.f32 %v10892_v22, %v8339_v26 }
0x15d2   :  { %v8337_v47 = vpop.permute.xlu1 %8336 }
0x15d3   :  { %v12298_v10 = vsel %vm1165_vm2, %v7842_v17, %v7841_v48  ;;  %v8342_v3 = vmul.f32 %v10894_v30, %v8337_v47  ;;  %v12313_v17 = vld [vmem:[%s12570_s1] sm:$0x3]  ;;  %v12589_v48 = vmov 7  }
0x15dc   :  { %v10896_v38 = vpop.eup %10895 }
0x15dd   :  { %7824 = vrot.lane.b32.xlu0 %v10896_v38, %s11057_s28 }
0x15de   :  { %v10898_v11 = vpop.eup %10897 }
0x15df   :  { %7822 = vrot.lane.b32.xlu1 %v10898_v11, %s11057_s28 }
0x1639   :  { %v8359_v4 = vpop.permute.xlu0 %8358 }
0x163a   :  { %v8363_v23 = vadd.f32 %v8359_v4, %v8343_v13 }
0x163b   :  { %v8357_v21 = vpop.permute.xlu1 %8356 }
0x163c   :  { %10899 = vtanh.f32 %v8363_v23  ;;  %v8362_v9 = vadd.f32 %v8357_v21, %v8342_v3 }
0x163e   :  { %10901 = vtanh.f32 %v8362_v9  ;;  %v8386_v20 = vrot.slane %v8362_v9, 1 }
0x1640   :  { %v12303_v51 = vsel %vm1165_vm2, %v8363_v23, %v8386_v20 }
0x1649   :  { %v10900_v32 = vpop.eup %10899 }
0x164a   :  { %8370 = vrot.lane.b32.xlu0 %v10900_v32, %s11057_s28 }
0x164b   :  { %v10902_v36 = vpop.eup %10901 }
0x164c   :  { %8368 = vrot.lane.b32.xlu1 %v10902_v36, %s11057_s28 }
0x164f   :  { %v7825_v18 = vpop.permute.xlu0 %7824 }
0x1650   :  { %v7829_v53 = vmul.f32 %v12278_v29, %v7825_v18 }
0x1651   :  { %v7823_v49 = vpop.permute.xlu1 %7822 }
0x1652   :  { %v7828_v16 = vmul.f32 %v10886_v19, %v7823_v49  ;;  %v7833_v14 = vrot.slane %v7829_v53, 5 }
0x1654   :  { %v7832_v27 = vrot.slane %v7828_v16, 6 }
0x1656   :  { %v7834_v1 = vsel %vm1165_vm2, %v7833_v14, %v7832_v27 }
0x1657   :  { %7835 = vrot.lane.b32.xlu1 %v7834_v1, %s11058_s9 }
0x165b   :  { %1723 = vperm.xlu1 %10669, %v12313_v17  }
0x165f   :  { %10670 = vset.pattern.permute.xlu1 %v12589_v48 }
0x16bc   :  { %v8371_v38 = vpop.permute.xlu0 %8370 }
0x16bd   :  { %v8375_v26 = vmul.f32 %v10892_v22, %v8371_v38 }
0x16be   :  { %v8369_v11 = vpop.permute.xlu1 %8368 }
0x16bf   :  { %v8374_v29 = vmul.f32 %v10894_v30, %v8369_v11 }
0x16c1   :  { %v8378_v19 = vrot.slane %v8374_v29, 1 }
0x16c3   :  { %v8379_v13 = vsel %vm1165_vm2, %v8375_v26, %v8378_v19 }
0x16c4   :  { %8380 = vrot.lane.b32.xlu0 %v8379_v13, %s11054_s27 }
0x16c9   :  { %v7836_v47 = vpop.permute.xlu1 %7835 }
0x16ca   :  { %v12322_v4 = vsel %vm2827_vm8, %v7836_v47, %v12174_v35 }
0x16cb   :  { %v8403_v23 = vsel %vm639_vm4, %v12322_v4, 0 }
0x16cc   :  { %v8472_v3 = vand.u32 4294901760, %v8403_v23 }
0x16ce   :  { %v8473_v21 = vsub.f32 %v8403_v23, %v8472_v3  ;;  %10565 = vmatmul.mubr.f32.vlgmr.msra.gmra.mxu1 %v8472_v3 }
0x16cf   :  { %10575 = vmatpush3.msra.mxu1 %v11180_v41  ;;  %10578 = vmatprep.mubr.msk.f32.mxu1 %vm11051_vm1, %v12588_v15 }
0x16d0   :  { %10576 = vmatprep.subr.mxu1 %v12588_v15  ;;  %v8474_v22 = vand.u32 4294901760, %v8473_v21 }
0x16d1   :  { %10577 = vmatpush3.msra.mxu1 %v11185_v42 }
0x16d2   :  { %10579 = vmatmul.mubr.f32.vlgmr.msra.gmra.mxu1 %v8474_v22  ;;  %10588 = vmatprep.subr.mxu1 %v12588_v15  ;;  %v8475_v30 = vsub.f32 %v8473_v21, %v8474_v22 }
0x16d3   :  { %10589 = vmatpush3.msra.mxu1 %v11180_v41  ;;  %10592 = vmatprep.mubr.msk.f32.mxu1 %vm11051_vm1, %v12588_v15 }
0x16d4   :  { %10590 = vmatprep.subr.mxu1 %v12588_v15  ;;  %v8476_v9 = vand.u32 4294901760, %v8475_v30 }
0x16d5   :  { %10591 = vmatpush3.msra.mxu1 %v11185_v42  ;;  %v12355_v42 = vld [vmem:[%s12575_s6] ss:$0 sm:$0xff]  ;;  %s11067_s6 = smov [#allocation11]  }
0x16d6   :  { %10558 = vmatmul.mubr.f32.vlgmr.msra.gmra.mxu0 %v8476_v9  ;;  %10593 = vmatmul.mubr.f32.vlgmr.msra.gmra.mxu1 %v8472_v3  ;;  %v12337_v20 = vpop.permute.xlu1 %1723  ;;  %s9528_s14 = sshll.u32 %s11067_s6, 4  ;;  %s9529_s14 = int_to_ptr.vmem [resolvable:$true] %s9528_s14 }
0x16d7   :  { %10568 = vmatpush3.msra.mxu0 %v11190_v43  ;;  %10571 = vmatprep.mubr.msk.f32.mxu0 %vm11051_vm1, %v12588_v15  ;;  %v1726_v41 = vmul.f32 %v12337_v20, %v11414_v0  ;;  %s11016_s15 = scalar_lea.vmem %s9529_s14, 32  ;;  %p11021_p7 = scmp.lt.s32.totalorder %s9529_s14, %s9529_s14 }
0x16d8   :  { %10569 = vmatprep.subr.mxu0 %v12588_v15  ;;  %10602 = vmatprep.subr.mxu1 %v12588_v15  ;;  %p11017_p6 = scmp.ne.s32.totalorder %s9529_s14, %s11016_s15  ;;  %p11022_p8 = scmp.lt.s32.totalorder %s11016_s15, %s11016_s15 }
0x16d9   :  { %10570 = vmatpush3.msra.mxu0 %v11195_v44  ;;  %10603 = vmatpush3.msra.mxu1 %v11288_v62  ;;  %v1733_v43 = vmul.f32 %v12355_v42, %v1726_v41 }
0x16da   :  { %10572 = vmatmul.mubr.f32.vlgmr.msra.gmra.mxu0 %v8473_v21  ;;  %10581 = vmatprep.subr.mxu0 %v12588_v15  ;;  %p11023_p9 = por %p11022_p8, %p11021_p7 }
0x16db   :  { %10582 = vmatpush3.msra.mxu0 %v11200_v45  ;;  %10585 = vmatprep.mubr.msk.f32.mxu0 %vm11051_vm1, %v12588_v15  ;;  %v1735_v44 = vsel %vm1734_vm13, %v1733_v43, 0.0  ;;  %v12590_v45 = vmov 6  }
0x16dc   :  { %10583 = vmatprep.subr.mxu0 %v12588_v15  ;;  %10604 = vmatprep.subr.mxu1 %v12588_v15  ;;  %p11024_p10 = pnand %p11023_p9, %p11017_p6 }
0x16dd   :  { %10584 = vmatpush3.msra.mxu0 %v11205_v46  ;;  %10605 = vmatpush3.msra.mxu1 %v11295_v63 }
0x16de   :  { %10586 = vmatmul.mubr.f32.vlgmr.msra.gmra.mxu0 %v8472_v3  ;;  %10606 = vmatprep.mubr.msk.f32.mxu1 %vm11051_vm1, %v12588_v15 }
0x16df   :  { %10616 = vmatprep.subr.mxu1 %v12588_v15  ;;  %10595 = vmatprep.subr.mxu0 %v12588_v15 }
0x16e0   :  { %10596 = vmatpush3.msra.mxu0 %v11232_v54  ;;  %10599 = vmatprep.mubr.msk.f32.mxu0 %vm11051_vm1, %v12588_v15 }
0x16e1   :  { %10597 = vmatprep.subr.mxu0 %v12588_v15 }
0x16e2   :  { %10598 = vmatpush3.msra.mxu0 %v11238_v55 }
0x16e3   :  { %1736 = vadd.xlane.f32.xlu0 %v1735_v44  ;;  %10609 = vmatprep.subr.mxu0 %v12588_v15 }
0x16f9   :  { %2847 = vperm.xlu0 %10671, %v12313_v17  }
0x16fd   :  { %10672 = vset.pattern.permute.xlu0 %v12590_v45 }
0x1736   :  { %v8381_v46 = vpop.permute.xlu0 %8380 }
0x1737   :  { %v12378_v62 = vsel %vm2277_vm7, %v8381_v46, %v12217_v33 }
0x1738   :  { %v8938_v63 = vsel %vm639_vm4, %v12378_v62, 0  ;;  %vm9493_vm4 = vcmask 48128  }
0x1739   :  { %v9007_v0 = vand.u32 4294901760, %v8938_v63 }
0x173b   :  { %v9008_v32 = vsub.f32 %v8938_v63, %v9007_v0  ;;  %10607 = vmatmul.mubr.f32.vlgmr.msra.gmra.mxu1 %v9007_v0 }
0x173c   :  { %10617 = vmatpush3.msra.mxu1 %v11232_v54  ;;  %10620 = vmatprep.mubr.msk.f32.mxu1 %vm11051_vm1, %v12588_v15 }
0x173d   :  { %10618 = vmatprep.subr.mxu1 %v12588_v15  ;;  %v9009_v36 = vand.u32 4294901760, %v9008_v32 }
0x173e   :  { %10619 = vmatpush3.msra.mxu1 %v11238_v55 }
0x173f   :  { %10621 = vmatmul.mubr.f32.vlgmr.msra.gmra.mxu1 %v9009_v36  ;;  %10630 = vmatprep.subr.mxu1 %v12588_v15  ;;  %v9010_v18 = vsub.f32 %v9008_v32, %v9009_v36 }
0x1740   :  { %10631 = vmatpush3.msra.mxu1 %v11232_v54  ;;  %10634 = vmatprep.mubr.msk.f32.mxu1 %vm11051_vm1, %v12588_v15 }
0x1741   :  { %10632 = vmatprep.subr.mxu1 %v12588_v15  ;;  %v9011_v53 = vand.u32 4294901760, %v9010_v18 }
0x1742   :  { %10633 = vmatpush3.msra.mxu1 %v11238_v55 }
0x1743   :  { %10600 = vmatmul.mubr.f32.vlgmr.msra.gmra.mxu0 %v9011_v53  ;;  %10635 = vmatmul.mubr.f32.vlgmr.msra.gmra.mxu1 %v9007_v0  ;;  %v12591_v53 = vmov 5  }
0x1744   :  { %10610 = vmatpush3.msra.mxu0 %v11245_v56  ;;  %10613 = vmatprep.mubr.msk.f32.mxu0 %vm11051_vm1, %v12588_v15 }
0x1745   :  { %10611 = vmatprep.subr.mxu0 %v12588_v15 }
0x1746   :  { %10612 = vmatpush3.msra.mxu0 %v11253_v57 }
0x1747   :  { %10614 = vmatmul.mubr.f32.vlgmr.msra.gmra.mxu0 %v9008_v32  ;;  %10623 = vmatprep.subr.mxu0 %v12588_v15 }
0x1748   :  { %10624 = vmatpush3.msra.mxu0 %v11261_v58  ;;  %10627 = vmatprep.mubr.msk.f32.mxu0 %vm11051_vm1, %v12588_v15  ;;  %vm9489_vm1 = vcmask 31744  }
0x1749   :  { %10625 = vmatprep.subr.mxu0 %v12588_v15 }
0x174a   :  { %10626 = vmatpush3.msra.mxu0 %v11268_v59 }
0x174b   :  { %10628 = vmatmul.mubr.f32.vlgmr.msra.gmra.mxu0 %v9007_v0 }
0x178e   :  { %v8559_v54 = vpop.f32.mrf.mxu1 }
0x1790   :  { %v10566_v55 = vpop.f32.mrf.mxu1 }
0x1792   :  { %v8710_v56 = vpop.f32.mrf.mxu1 }
0x1794   :  { %v10580_v49 = vpop.f32.mrf.mxu1 }
0x1796   :  { %v8478_v16 = vpop.f32.mrf.mxu0  ;;  %v8860_v14 = vpop.f32.mrf.mxu1 }
0x1797   :  { %v8560_v57 = vadd.f32 %v8559_v54, %v8478_v16 }
0x1798   :  { %v10559_v27 = vpop.f32.mrf.mxu0  ;;  %v10594_v1 = vpop.f32.mrf.mxu1 }
0x179a   :  { %v8635_v48 = vpop.f32.mrf.mxu0 }
0x179b   :  { %v8636_v38 = vadd.f32 %v8635_v48, %v8560_v57 }
0x179c   :  { %v10573_v58 = vpop.f32.mrf.mxu0 }
0x179d   :  { %v8711_v11 = vadd.f32 %v8710_v56, %v8636_v38 }
0x179e   :  { %v8787_v29 = vpop.f32.mrf.mxu0 }
0x179f   :  { %v8788_v26 = vadd.f32 %v8787_v29, %v8711_v11 }
0x17a0   :  { %v10587_v19 = vpop.f32.mrf.mxu0 }
0x17a1   :  { %v8861_v13 = vadd.f32 %v8860_v14, %v8788_v26  ;;  %v12412_v14 = vpop.xlane.xlu0 %1736 }
0x17a3   :  { %v8865_v55 = vrot.slane %v8861_v13, 1 }
0x17a5   :  { %v8869_v16 = vadd.f32 %v8865_v55, %v11355_v60  ;;  %v12414_v57 = vpop.permute.xlu0 %2847 }
0x17a6   :  { %v2850_v48 = vmul.f32 %v12414_v57, %v11566_v37  ;;  %v12592_v37 = vmov 2  }
0x17a8   :  { %v2851_v26 = vmul.f32 %v12355_v42, %v2850_v48 }
0x17aa   :  { %v2852_v19 = vsel %vm1734_vm13, %v2851_v26, 0.0 }
0x17fb   :  { %v9094_v47 = vpop.f32.mrf.mxu1 }
0x17fd   :  { %v10608_v59 = vpop.f32.mrf.mxu1 }
0x17fe   :  { %v12593_v59 = vmov 3  }
0x17ff   :  { %v9245_v23 = vpop.f32.mrf.mxu1 }
0x1801   :  { %v10622_v3 = vpop.f32.mrf.mxu1 }
0x1803   :  { %v9013_v21 = vpop.f32.mrf.mxu0  ;;  %v9395_v22 = vpop.f32.mrf.mxu1 }
0x1804   :  { %v9095_v41 = vadd.f32 %v9094_v47, %v9013_v21  ;;  %v8866_v47 = vrot.slane %v8861_v13, 2 }
0x1805   :  { %v10601_v30 = vpop.f32.mrf.mxu0  ;;  %v10636_v9 = vpop.f32.mrf.mxu1 }
0x1807   :  { %v9170_v43 = vpop.f32.mrf.mxu0 }
0x1808   :  { %v9171_v44 = vadd.f32 %v9170_v43, %v9095_v41 }
0x1809   :  { %v10615_v45 = vpop.f32.mrf.mxu0 }
0x180a   :  { %v9246_v46 = vadd.f32 %v9245_v23, %v9171_v44  ;;  %v8870_v23 = vadd.f32 %v8866_v47, %v11352_v40 }
0x180b   :  { %v9322_v63 = vpop.f32.mrf.mxu0 }
0x180c   :  { %v9323_v0 = vadd.f32 %v9322_v63, %v9246_v46  ;;  %v9570_v9 = vmul.f32 -1.442695, %v8870_v23 }
0x180d   :  { %v10629_v32 = vpop.f32.mrf.mxu0 }
0x180e   :  { %v9396_v36 = vadd.f32 %v9395_v22, %v9323_v0  ;;  %v9569_v22 = vmul.f32 -1.442695, %v8869_v16 }
0x1810   :  { %v9400_v18 = vrot.slane %v9396_v36, 1 }
0x1812   :  { %9403 = vrot.lane.b32.xlu1 %v9400_v18, %s11052_s3 }
0x1816   :  { %9401 = vrot.lane.b32.xlu1 %v9396_v36, %s11052_s3 }
0x181a   :  { %1739 = vperm.xlu1 %10670, %v12313_v17  }
0x181e   :  { %1743 = vrot.lane.b32.xlu1 %v12355_v42, %s11059_s10 }
0x181f   :  { %10674 = vset.pattern.permute.xlu1 %v12591_v53 }
0x1884   :  { %v9404_v54 = vpop.permute.xlu1 %9403 }
0x1888   :  { %v9402_v56 = vpop.permute.xlu1 %9401 }
0x1889   :  { %v9407_v49 = vadd.f32 %v9402_v56, %v11355_v60 }
0x188b   :  { %10903 = vtanh.f32 %v9407_v49  ;;  %v9571_v43 = vmul.f32 -1.442695, %v9407_v49 }
0x188c   :  { %10905 = vtanh.f32 %v8869_v16 }
0x1895   :  { %v12416_v27 = vpop.permute.xlu1 %1739 }
0x1896   :  { %v1742_v38 = vmul.f32 %v12416_v27, %v11459_v8  ;;  %v9408_v8 = vadd.f32 %v9404_v54, %v11352_v40 }
0x1898   :  { %v10904_v1 = vpop.eup %10903  ;;  %10907 = vtanh.f32 %v9408_v8  ;;  %v9572_v46 = vmul.f32 -1.442695, %v9408_v8 }
0x1899   :  { %9435 = vrot.lane.b32.xlu0 %v10904_v1, %s11053_s26  ;;  %v12423_v58 = vpop.permute.xlu1 %1743  ;;  %v10906_v11 = vpop.eup %10905  ;;  %10909 = vtanh.f32 %v8870_v23 }
0x189a   :  { %v1746_v60 = vmul.f32 %v12423_v58, %v1742_v38  ;;  %10911 = vpow2.f32 %v9569_v22 }
0x189b   :  { %10913 = vpow2.f32 %v9570_v9 }
0x189c   :  { %v1747_v29 = vsel %vm1734_vm13, %v1746_v60, 0.0  ;;  %10915 = vpow2.f32 %v9571_v43  ;;  %v12594_v60 = vmov 0  }
0x189d   :  { %8898 = vrot.lane.b32.xlu0 %v10906_v11, %s11053_s26  ;;  %1748 = vadd.xlane.f32.xlu1 %v1747_v29 }
0x18a1   :  { %2856 = vperm.xlu0 %10672, %v12313_v17   ;;  %2853 = vadd.xlane.f32.xlu1 %v2852_v19 }
0x18a5   :  { %10673 = vset.pattern.permute.xlu0 %v12592_v37  ;;  %v10908_v3 = vpop.eup %10907 }
0x18a6   :  { %3965 = vperm.xlu0 %10673, %v12313_v17   ;;  %v10910_v21 = vpop.eup %10909 }
0x18a7   :  { %v10912_v41 = vpop.eup %10911 }
0x18a8   :  { %v8877_v44 = vadd.f32 1.0, %v10912_v41  ;;  %v10914_v32 = vpop.eup %10913 }
0x18a9   :  { %v8878_v36 = vadd.f32 1.0, %v10914_v32 }
0x18aa   :  { %10675 = vset.pattern.permute.xlu0 %v12593_v59  ;;  %10917 = vrcp.f32 %v8877_v44 }
0x18ab   :  { %10919 = vpow2.f32 %v9572_v46 }
0x18ac   :  { %10921 = vrcp.f32 %v8878_v36 }
0x18b2   :  { %8388 = vrot.lane.b32.xlu1 %v12303_v51, %s11060_s11 }
0x18b6   :  { %9437 = vrot.lane.b32.xlu1 %v10908_v3, %s11053_s26 }
0x18ba   :  { %7844 = vrot.lane.b32.xlu1 %v12298_v10, %s11059_s10 }
0x18be   :  { %8900 = vrot.lane.b32.xlu1 %v10910_v21, %s11053_s26 }
0x190b   :  { %v9436_v13 = vpop.permute.xlu0 %9435 }
0x190f   :  { %v8899_v30 = vpop.permute.xlu0 %8898 }
0x191c   :  { %v12442_v40 = vpop.permute.xlu0 %2856 }
0x191d   :  { %v2859_v51 = vmul.f32 %v12442_v40, %v11612_v2  ;;  %v10916_v2 = vpop.eup %10915 }
0x191e   :  { %v12455_v54 = vpop.eup %10917  ;;  %v9415_v49 = vadd.f32 1.0, %v10916_v2 }
0x191f   :  { %v2860_v45 = vmul.f32 %v2859_v51, %v12423_v58  ;;  %v8904_v56 = vmul.f32 %v12455_v54, %v8899_v30  ;;  %v10920_v1 = vpop.eup %10919 }
0x1920   :  { %v9416_v48 = vadd.f32 1.0, %v10920_v1  ;;  %10923 = vrcp.f32 %v9415_v49  ;;  %v12468_v26 = vpop.eup %10921 }
0x1921   :  { %v2861_v10 = vsel %vm1734_vm13, %v2860_v45, 0.0  ;;  %v12480_v47 = vpop.permute.xlu0 %3965 }
0x1922   :  { %2862 = vadd.xlane.f32.xlu1 %v2861_v10  ;;  %10925 = vrcp.f32 %v9416_v48  ;;  %v3968_v59 = vmul.f32 %v12480_v47, %v11722_v34 }
0x1924   :  { %v3969_v23 = vmul.f32 %v12355_v42, %v3968_v59 }
0x1926   :  { %v12448_v63 = vpop.xlane.xlu1 %1748  ;;  %v3970_v3 = vsel %vm1734_vm13, %v3969_v23, 0.0 }
0x192a   :  { %v12450_v0 = vpop.xlane.xlu1 %2853 }
0x192d   :  { %v12472_v50 = vpop.eup %10923 }
0x192e   :  { %v8389_v18 = vpop.permute.xlu1 %8388 }
0x192f   :  { %v8391_v53 = vsel %vm2277_vm7, %v8389_v18, %v12287_v24  ;;  %v12476_v8 = vpop.eup %10925  ;;  %vm9520_vm7 = vcmask 58368  }
0x1930   :  { %v9424_v55 = vrot.slane %v8391_v53, 1 }
0x1932   :  { %9427 = vrot.lane.b32.xlu0 %v9424_v55, %s11058_s9  ;;  %v9438_v16 = vpop.permute.xlu1 %9437 }
0x1933   :  { %8908 = vrot.lane.b32.xlu1 %v8904_v56, %s11054_s27  ;;  %v9442_v37 = vmul.f32 %v12476_v8, %v9438_v16 }
0x1936   :  { %9425 = vrot.lane.b32.xlu0 %v8391_v53, %s11058_s9  ;;  %v7845_v38 = vpop.permute.xlu1 %7844 }
0x1937   :  { %v7847_v52 = vsel %vm2827_vm8, %v7845_v38, %v12272_v12  ;;  %3974 = vperm.xlu1 %10674, %v12313_v17   ;;  %v9441_v12 = vmul.f32 %v12472_v50, %v9436_v13  ;;  %v12595_v38 = vmov 4  }
0x1938   :  { %v8886_v24 = vrot.slane %v7847_v52, 1  ;;  %v8887_v11 = vrot.slane %v7847_v52, 2  ;;  %v9484_v52 = vsel %vm9483_vm14, %v12412_v14, %v12450_v0 }
0x193a   :  { %8888 = vrot.lane.b32.xlu0 %v8886_v24, %s11054_s27  ;;  %v8901_v29 = vpop.permute.xlu1 %8900 }
0x193b   :  { %10677 = vset.pattern.permute.xlu1 %v12594_v60  ;;  %v8905_v19 = vmul.f32 %v12468_v26, %v8901_v29 }
0x193e   :  { %8890 = vrot.lane.b32.xlu0 %v8887_v11, %s11054_s27 }
0x1942   :  { %8910 = vrot.lane.b32.xlu0 %v8905_v19, %s11054_s27 }
0x1946   :  { %9445 = vrot.lane.b32.xlu0 %v9441_v12, %s11054_s27 }
0x194a   :  { %9447 = vrot.lane.b32.xlu0 %v9442_v37, %s11054_s27 }
0x1969   :  { %3971 = vadd.xlane.f32.xlu0 %v3970_v3 }
0x19a4   :  { %v9428_v21 = vpop.permute.xlu0 %9427 }
0x19a5   :  { %v9432_v55 = vmul.f32 %v12476_v8, %v9428_v21 }
0x19a8   :  { %v9426_v22 = vpop.permute.xlu0 %9425 }
0x19a9   :  { %v9431_v36 = vmul.f32 %v12472_v50, %v9426_v22 }
0x19ab   :  { %v12486_v13 = vpop.xlane.xlu1 %2862 }
0x19ac   :  { %v8889_v30 = vpop.permute.xlu0 %8888 }
0x19ad   :  { %v8894_v9 = vmul.f32 %v12455_v54, %v8889_v30 }
0x19af   :  { %v8909_v41 = vpop.permute.xlu1 %8908 }
0x19b0   :  { %v8914_v51 = vadd.f32 %v8909_v41, %v8894_v9  ;;  %v8891_v43 = vpop.permute.xlu0 %8890 }
0x19b1   :  { %v8895_v44 = vmul.f32 %v12468_v26, %v8891_v43 }
0x19b2   :  { %10927 = vtanh.f32 %v8914_v51 }
0x19b3   :  { %v3975_v45 = vpop.permute.xlu1 %3974 }
0x19b4   :  { %v3977_v34 = vmul.f32 %v3975_v45, %v11768_v39  ;;  %v8911_v10 = vpop.permute.xlu0 %8910 }
0x19b5   :  { %v8915_v46 = vadd.f32 %v8911_v10, %v8895_v44  ;;  %v7294_v10 = vmul.f32 %v12174_v35, %v3975_v45 }
0x19b6   :  { %v3978_v32 = vmul.f32 %v3977_v34, %v12423_v58 }
0x19b7   :  { %10929 = vtanh.f32 %v8915_v46  ;;  %v8392_v46 = vmul.f32 %v12322_v4, %v12442_v40 }
0x19b8   :  { %v9446_v18 = vpop.permute.xlu0 %9445  ;;  %v3979_v2 = vsel %vm1734_vm13, %v3978_v32, 0.0 }
0x19b9   :  { %v9451_v53 = vadd.f32 %v9446_v18, %v9431_v36  ;;  %3980 = vadd.xlane.f32.xlu1 %v3979_v2  ;;  %v7299_v36 = vmul.f32 %v12217_v33, %v12480_v47  ;;  %v8393_v35 = vmul.f32 %v12355_v42, %v8392_v46  ;;  %v8397_v2 = vmul.f32 %v12378_v62, %v12414_v57 }
0x19bb   :  { %10931 = vtanh.f32 %v9451_v53  ;;  %v8394_v40 = vsel %vm1734_vm13, %v8393_v35, 0.0  ;;  %v8398_v47 = vmul.f32 %v8397_v2, %v12423_v58 }
0x19bc   :  { %v9448_v56 = vpop.permute.xlu0 %9447 }
0x19bd   :  { %v9452_v49 = vadd.f32 %v9448_v56, %v9432_v55  ;;  %v8399_v53 = vsel %vm1734_vm13, %v8398_v47, 0.0 }
0x19bf   :  { %v10928_v16 = vpop.eup %10927  ;;  %10933 = vtanh.f32 %v9452_v49 }
0x19c0   :  { %8920 = vrot.lane.b32.xlu0 %v10928_v16, %s11057_s28 }
0x19c4   :  { %v10930_v39 = vpop.eup %10929 }
0x19c5   :  { %8922 = vrot.lane.b32.xlu0 %v10930_v39, %s11057_s28 }
0x19c8   :  { %v10932_v1 = vpop.eup %10931 }
0x19c9   :  { %5083 = vperm.xlu0 %10675, %v12313_v17  }
0x19ca   :  { %9457 = vrot.lane.b32.xlu1 %v10932_v1, %s11057_s28 }
0x19cc   :  { %v10934_v48 = vpop.eup %10933 }
0x19cd   :  { %9459 = vrot.lane.b32.xlu0 %v10934_v48, %s11057_s28 }
0x19ce   :  { %10676 = vset.pattern.permute.xlu0 %v12595_v38 }
0x19d1   :  { %5092 = vperm.xlu0 %10676, %v12313_v17  }
0x19d5   :  { %10678 = vset.pattern.permute.xlu0 %v12594_v60 }
0x19f2   :  { %v3972_v24 = vpop.xlane.xlu0 %3971 }
0x19f3   :  { %v9486_v11 = vsel %vm9485_vm15, %v9484_v52, %v3972_v24 }
0x1a32   :  { %v8921_v29 = vpop.permute.xlu0 %8920 }
0x1a37   :  { %v8923_v19 = vpop.permute.xlu0 %8922 }
0x1a38   :  { %v8927_v51 = vmul.f32 %v12468_v26, %v8923_v19 }
0x1a3a   :  { %v8931_v43 = vrot.slane %v8927_v51, 6 }
0x1a42   :  { %v12511_v21 = vpop.xlane.xlu1 %3980 }
0x1a44   :  { %v5084_v12 = vpop.permute.xlu0 %5083 }
0x1a45   :  { %v5086_v37 = vmul.f32 %v5084_v12, %v11879_v28  ;;  %v6197_v32 = vmul.f32 %v12071_v31, %v5084_v12  ;;  %v7300_v31 = vmul.f32 %v7299_v36, %v12423_v58 }
0x1a46   :  { %v9458_v30 = vpop.permute.xlu1 %9457 }
0x1a47   :  { %v5087_v59 = vmul.f32 %v12355_v42, %v5086_v37  ;;  %v9463_v9 = vmul.f32 %v12472_v50, %v9458_v30  ;;  %v7301_v33 = vsel %vm1734_vm13, %v7300_v31, 0.0 }
0x1a48   :  { %v9460_v23 = vpop.permute.xlu0 %9459 }
0x1a49   :  { %v5088_v17 = vsel %vm1734_vm13, %v5087_v59, 0.0  ;;  %v9464_v22 = vmul.f32 %v12476_v8, %v9460_v23 }
0x1a4a   :  { %5089 = vadd.xlane.f32.xlu1 %v5088_v17 }
0x1a4b   :  { %v9467_v28 = vrot.slane %v9464_v22, 7 }
0x1a4c   :  { %v5093_v60 = vpop.permute.xlu0 %5092 }
0x1a4d   :  { %v5095_v3 = vmul.f32 %v5093_v60, %v11925_v5  ;;  %v9468_v41 = vsel %vm1165_vm2, %v9467_v28, %v9463_v9  ;;  %v8926_v5 = vmul.f32 %v12455_v54, %v8921_v29  ;;  %v6192_v8 = vmul.f32 %v12028_v7, %v5093_v60 }
0x1a4e   :  { %v7295_v54 = vmul.f32 %v12355_v42, %v7294_v10  ;;  %v6198_v7 = vmul.f32 %v6197_v32, %v12423_v58 }
0x1a4f   :  { %v5096_v14 = vmul.f32 %v5095_v3, %v12423_v58  ;;  %v8930_v44 = vrot.slane %v8926_v5, 7  ;;  %v6193_v50 = vmul.f32 %v12355_v42, %v6192_v8 }
0x1a50   :  { %v7296_v18 = vsel %vm1734_vm13, %v7295_v54, 0.0  ;;  %v6199_v45 = vsel %vm1734_vm13, %v6198_v7, 0.0 }
0x1a51   :  { %v5097_v0 = vsel %vm1734_vm13, %v5096_v14, 0.0  ;;  %v8932_v34 = vsel %vm1165_vm2, %v8931_v43, %v8930_v44  ;;  %v6194_v26 = vsel %vm1734_vm13, %v6193_v50, 0.0  ;;  %vm9491_vm2 = vcmask 39936  }
0x1a52   :  { %5098 = vadd.xlane.f32.xlu0 %v5097_v0 }
0x1a5b   :  { %9469 = vrot.lane.b32.xlu1 %v9468_v41, %s11054_s27 }
0x1a68   :  { %8933 = vrot.lane.b32.xlu0 %v8932_v34, %s11058_s9 }
0x1a7f   :  { %6195 = vadd.xlane.f32.xlu1 %v6194_v26 }
0x1a83   :  { %7297 = vadd.xlane.f32.xlu1 %v7296_v18 }
0x1a87   :  { %6200 = vadd.xlane.f32.xlu0 %v6199_v45  ;;  %8395 = vadd.xlane.f32.xlu1 %v8394_v40 }
0x1a8b   :  { %7302 = vadd.xlane.f32.xlu0 %v7301_v33 }
0x1a8f   :  { %8400 = vadd.xlane.f32.xlu0 %v8399_v53 }
0x1ad3   :  { %v5090_v55 = vpop.xlane.xlu1 %5089 }
0x1ad4   :  { %v9488_v56 = vsel %vm9487_vm0, %v9486_v11, %v5090_v55 }
0x1ad7   :  { %v9470_v49 = vpop.permute.xlu1 %9469 }
0x1ad8   :  { %v9472_v16 = vsel %vm1161_vm5, %v9470_v49, %v12378_v62  ;;  %v9573_v62 = vld [vmem:[#allocation2] ss:$0 sm:$0xff]  ;;  %vm9495_vm5 = vcmask 56320  }
0x1ad9   :  { %v9478_v39 = vmul.f32 %v9472_v16, %v12337_v20 }
0x1adb   :  { %v5099_v57 = vpop.xlane.xlu0 %5098  ;;  %v9479_v1 = vmul.f32 %v9478_v39, %v12423_v58 }
0x1add   :  { %v9480_v48 = vsel %vm1734_vm13, %v9479_v1, 0.0 }
0x1ade   :  { %9481 = vadd.xlane.f32.xlu0 %v9480_v48 }
0x1adf   :  { %v8934_v38 = vpop.permute.xlu0 %8933 }
0x1ae0   :  { %v8936_v52 = vsel %vm1702_vm6, %v8934_v38, %v12322_v4 }
0x1ae1   :  { %v9473_v24 = vmul.f32 %v8936_v52, %v12416_v27 }
0x1ae3   :  { %v9474_v11 = vmul.f32 %v12355_v42, %v9473_v24 }
0x1ae5   :  { %v9475_v61 = vsel %vm1734_vm13, %v9474_v11, 0.0 }
0x1ae6   :  { %9476 = vadd.xlane.f32.xlu1 %v9475_v61 }
0x1af7   :  { %9512 = vperm.xlu1 %10677, %v9573_v62  }
0x1b08   :  { %v6196_v58 = vpop.xlane.xlu1 %6195 }
0x1b09   :  { %v9490_v17 = vsel %vm9489_vm1, %v9488_v56, %v6196_v58 }
0x1b0c   :  { %v7298_v12 = vpop.xlane.xlu1 %7297 }
0x1b0d   :  { %v9492_v3 = vsel %vm9491_vm2, %v9490_v17, %v7298_v12 }
0x1b10   :  { %v6201_v20 = vpop.xlane.xlu0 %6200  ;;  %v8396_v42 = vpop.xlane.xlu1 %8395 }
0x1b11   :  { %v9494_v14 = vsel %vm9493_vm4, %v9492_v3, %v8396_v42 }
0x1b14   :  { %v7303_v29 = vpop.xlane.xlu0 %7302 }
0x1b18   :  { %v8401_v19 = vpop.xlane.xlu0 %8400 }
0x1b67   :  { %v9482_v37 = vpop.xlane.xlu0 %9481 }
0x1b68   :  { %v9497_v59 = vsel %vm9483_vm14, %v9482_v37, %v8401_v19 }
0x1b69   :  { %v9498_v6 = vsel %vm9485_vm15, %v9497_v59, %v7303_v29 }
0x1b6a   :  { %v9499_v4 = vsel %vm9487_vm0, %v9498_v6, %v6201_v20 }
0x1b6b   :  { %v9500_v27 = vsel %vm9489_vm1, %v9499_v4, %v5099_v57 }
0x1b6c   :  { %v9501_v23 = vsel %vm9491_vm2, %v9500_v27, %v12511_v21 }
0x1b6d   :  { %v9502_v60 = vsel %vm9493_vm4, %v9501_v23, %v12486_v13 }
0x1b6e   :  { %v9503_v30 = vsel %vm9495_vm5, %v9502_v60, %v12448_v63 }
0x1b6f   :  { %v9477_v0 = vpop.xlane.xlu1 %9476 }
0x1b70   :  { %v9496_v22 = vsel %vm9495_vm5, %v9494_v14, %v9477_v0 }
0x1b71   :  { %v9504_v28 = vadd.f32 %v9503_v30, %v9496_v22 }
0x1b73   :  { %v9513_v9 = vpop.permute.xlu1 %9512 }
0x1b74   :  { %v9515_v41 = vadd.f32 %v9513_v9, %v9504_v28 }
0x1b76   :  { %vm9516_vm6 = vcmp.ge.f32.partialorder %v9515_v41, 0.0 }
0x1b77   :  { %v9574_v51 = vsel %vm9516_vm6, 1.0, %v12588_v15 }
0x1b78   :  { %v9519_v21 = vsel %vm1156_vm3, %v9574_v51, 0.0 }
0x1b79   :  { %9521 = vst.msk [vmem:[#allocation11] sm:$0x3] %vm9520_vm7, %v9519_v21 }
0x1b7a   :  { %11027 = shalt.err (!%p11024_p10)
}
0x1b7b   :  { %9531 = dma.vmem_to_hbm [thread:$0]  %s9529_s14, 32, %s12577_s8, [#allocation5]  }
0x1b7c   :  { %11042 = dma.done.wait [#allocation5], 32  }
0x1b7d   :  { %11043 = vsyncadd [#allocation5], 4294967264 }
0x1b7e   :  { %9535 = vsyncpa [#allocation4], 1 }
0x1b7f   :  { %9536 = vsyncpa [#allocation7], 1 }
0x1b80   :  { %9537 = vsyncpa [#allocation10], 1 }
0x1b81   :  { %9538 = vsyncpa [#allocation5], 1 }

</bundles_post_ra>
